<compile_context>
chip_gen: v5e
topology: v5e:2x2
jax: 0.10.0
libtpu: 0.0.40
codegen_flags: <defaults>
</compile_context>

<pallas_src>
import math

import jax
import jax.numpy as jnp
from jax import lax
from jax.experimental import pallas as pl
from jax.experimental.pallas import tpu as pltpu

# ---- hyperparameters (small, consistent with ActEncoder(...)) ----------------
SOURCE_DIMS = 13     # source_dims
HIDDEN      = 32     # hidden_size
NUM_LAYERS  = 3      # num_layers (also max_hop for ACT)
NUM_HEADS   = 4      # num_heads
FILTER      = 64     # filter_size (dim_feedforward)
HEAD_DIM    = HIDDEN // NUM_HEADS
THRESHOLD   = 1.0 - 0.1
LN_EPS      = 1e-5   # nn.LayerNorm default (inside TransformerEncoderLayer)

B = 2                # batch
L = 8                # sequence length


# ---- small in-kernel helpers --------------------------------------------------
def _sigmoid(x):
    return 1.0 / (1.0 + jnp.exp(-x))


def _softmax_last(x):
    # exact divide (not pl.reciprocal(approx=True)): keeps the ACT halting decision
    # bit-stable w.r.t. the f32 reference (discrete >0.9 threshold).
    m = jnp.max(x, axis=-1, keepdims=True)
    e = jnp.exp(x - m)
    return e / jnp.sum(e, axis=-1, keepdims=True)


def _layernorm(x, gamma, beta):
    mean = jnp.mean(x, axis=-1, keepdims=True)
    var = jnp.mean((x - mean) ** 2, axis=-1, keepdims=True)
    return (x - mean) * jax.lax.rsqrt(var + LN_EPS) * gamma + beta


# ---- the Pallas kernel --------------------------------------------------------
def act_encoder_kernel(x_ref,
                       wpre_ref, bpre_ref,
                       wqkvp_ref, bqkvp_ref,
                       wo_ref, bo_ref,
                       g1_ref, be1_ref,
                       w1_ref, b1_ref,
                       w2_ref, b2_ref,
                       g2_ref, be2_ref,
                       out_ref, side_ref):
    f32 = jnp.float32
    R = x_ref.shape[0]            # rows in this block = (#sequences in block) * L
    n_seq = R // L                # sequences handled by this grid step

    x = x_ref[...]                                           # (R, S)
    wpre, bpre = wpre_ref[...], bpre_ref[...]
    wqkvp, bqkvp = wqkvp_ref[...], bqkvp_ref[...]            # (H, 3H+1), (1, 3H+1)
    wo, bo = wo_ref[...], bo_ref[...]
    g1, be1 = g1_ref[...], be1_ref[...]
    w1, b1 = w1_ref[...], b1_ref[...]
    w2, b2 = w2_ref[...], b2_ref[...]
    g2, be2 = g2_ref[...], be2_ref[...]

    # preprocess_mlp over all sequences at once
    state = jnp.dot(x, wpre, preferred_element_type=f32) + bpre          # (R, H)

    halting = jnp.zeros((R, 1), f32)
    remainders = jnp.zeros((R, 1), f32)
    n_updates = jnp.zeros((R, 1), f32)
    prev_state = jnp.zeros((R, HIDDEN), f32)

    # contract last dims of both operands: q @ k^T without an explicit transpose
    dn = (((1,), (1,)), ((), ()))

    # ACT loop: the PyTorch while-loop runs at most max_hop == NUM_LAYERS steps and
    # extra steps after all tokens halt are no-ops -> fixed-length (unrolled) loop.
    for _ in range(NUM_LAYERS):
        # ---- fused [Q*scale | K | V | halting-logit] projection (one MXU matmul) ----
        qkvp = jnp.dot(state, wqkvp, preferred_element_type=f32) + bqkvp  # (R, 3H+1)
        p = _sigmoid(qkvp[:, 3 * HIDDEN:3 * HIDDEN + 1])                  # (R, 1), f32

        # ---- ACT halting bookkeeping (per token) ----
        still_running = (halting < 1.0).astype(f32)
        comb = halting + p * still_running
        new_halted = (comb > THRESHOLD).astype(f32) * still_running
        still_running = (comb <= THRESHOLD).astype(f32) * still_running
        halting = halting + p * still_running
        remainders = remainders + new_halted * (1.0 - halting)
        halting = halting + new_halted * remainders
        n_updates = n_updates + still_running + new_halted
        update_weights = p * still_running + new_halted * remainders      # (R, 1)

        q = qkvp[:, 0:HIDDEN]             # already pre-scaled by 1/sqrt(head_dim)
        k = qkvp[:, HIDDEN:2 * HIDDEN]
        v = qkvp[:, 2 * HIDDEN:3 * HIDDEN]

        # ---- self-attention: per-sequence (L, L) softmax, heads concatenated, ----
        # ---- then a single fused out-projection matmul over all rows.          ----
        seq_outs = []
        for s in range(n_seq):
            rs = slice(s * L, (s + 1) * L)
            head_outs = []
            for h in range(NUM_HEADS):
                cs = slice(h * HEAD_DIM, (h + 1) * HEAD_DIM)
                scores = lax.dot_general(q[rs, cs], k[rs, cs], dn,
                                         preferred_element_type=f32)      # (L, L)
                a = _softmax_last(scores)
                head_outs.append(jnp.dot(a, v[rs, cs],
                                         preferred_element_type=f32))     # (L, hd)
            seq_outs.append(jnp.concatenate(head_outs, axis=-1))          # (L, H)
        attn = jnp.concatenate(seq_outs, axis=0)                          # (R, H)
        attn = jnp.dot(attn, wo, preferred_element_type=f32) + bo         # one out-proj

        # ---- TransformerEncoderLayer tail (post-norm, ReLU, eval-mode dropout) ----
        src = _layernorm(state + attn, g1, be1)
        ff = jnp.maximum(jnp.dot(src, w1, preferred_element_type=f32) + b1, 0.0)
        ff = jnp.dot(ff, w2, preferred_element_type=f32) + b2
        state = _layernorm(src + ff, g2, be2)

        # ---- ACT weighted state accumulation ----
        prev_state = state * update_weights + prev_state * (1.0 - update_weights)

    out_ref[...] = prev_state
    # pack the two 1-lane side outputs into one 2-lane slab (fewer masked stores)
    side_ref[...] = jnp.concatenate([remainders, n_updates], axis=-1)     # (R, 2)


# ---- parameter packing (one-time transform, not a per-call op) ----------------
def pack_params(params):
    """Fold 1/sqrt(head_dim) into the Q columns/bias and append the ACT halting
    projection (wp, bp) as an extra output column of the QKV matmul."""
    (wpre, bpre, wp, bp, wqkv, bqkv, wo, bo,
     g1, be1, w1, b1, w2, b2, g2, be2) = params
    scale = 1.0 / math.sqrt(HEAD_DIM)
    wqkvp = jnp.concatenate([wqkv[:, :HIDDEN] * scale, wqkv[:, HIDDEN:], wp], axis=1)
    bqkvp = jnp.concatenate([bqkv[:, :HIDDEN] * scale, bqkv[:, HIDDEN:], bp], axis=1)
    return (wpre, bpre, wqkvp, bqkvp, wo, bo,
            g1, be1, w1, b1, w2, b2, g2, be2)


# ---- wrapper ------------------------------------------------------------------
def _full_spec(shape):
    nd = len(shape)
    return pl.BlockSpec(shape, lambda i, _nd=nd: (0,) * _nd)


def act_encoder_forward(inputs, packed_params, *, seqs_per_block=None):
    """inputs: (B, L, SOURCE_DIMS) float32. Returns (x, (remainders, n_updates)).

    seqs_per_block=None  -> whole batch in a single grid step (default; best on the
                            single-TC v5e/v6e and removes per-step pipeline overhead).
    seqs_per_block=k     -> grid of B//k "parallel" steps (e.g. k=B//2 on v7x to use
                            both TensorCores).
    """
    Bn, Ln, S = inputs.shape
    assert Ln == L and S == SOURCE_DIMS
    bb = Bn if seqs_per_block is None else seqs_per_block
    assert Bn % bb == 0
    R = bb * Ln

    # Flatten batch into rows so dense projections run as single (B*L, .) matmuls.
    x2 = inputs.reshape(Bn * Ln, S)

    in_specs = [pl.BlockSpec((R, S), lambda i: (i, 0))]
    in_specs += [_full_spec(p.shape) for p in packed_params]

    out_shape = (
        jax.ShapeDtypeStruct((Bn * Ln, HIDDEN), jnp.float32),
        jax.ShapeDtypeStruct((Bn * Ln, 2), jnp.float32),   # [remainders | n_updates]
    )
    out_specs = (
        pl.BlockSpec((R, HIDDEN), lambda i: (i, 0)),
        pl.BlockSpec((R, 2), lambda i: (i, 0)),
    )

    fn = pl.pallas_call(
        act_encoder_kernel,
        out_shape=out_shape,
        grid_spec=pltpu.PrefetchScalarGridSpec(
            num_scalar_prefetch=0,
            grid=(Bn // bb,),
            in_specs=in_specs,
            out_specs=out_specs,
        ),
        compiler_params=pltpu.CompilerParams(
            dimension_semantics=("parallel",)),
    )
    out2, side2 = fn(x2, *packed_params)
    out = out2.reshape(Bn, Ln, HIDDEN)
    side = side2.reshape(Bn, Ln, 2)
    return out, (side[..., 0], side[..., 1])


# ---- deterministic parameter init ---------------------------------------------
def init_params(key):
    ks = jax.random.split(key, 10)

    def lin(k, fan_in, shape):
        return (jax.random.normal(k, shape, jnp.float32) / math.sqrt(fan_in))

    wpre = lin(ks[0], SOURCE_DIMS, (SOURCE_DIMS, HIDDEN))
    bpre = lin(ks[1], SOURCE_DIMS, (1, HIDDEN))
    wp = lin(ks[2], HIDDEN, (HIDDEN, 1))
    bp = jnp.ones((1, 1), jnp.float32)          # ACT_basic: p.bias.data.fill_(1)
    wqkv = lin(ks[3], HIDDEN, (HIDDEN, 3 * HIDDEN))
    bqkv = lin(ks[4], HIDDEN, (1, 3 * HIDDEN))
    wo = lin(ks[5], HIDDEN, (HIDDEN, HIDDEN))
    bo = lin(ks[6], HIDDEN, (1, HIDDEN))
    g1 = jnp.ones((1, HIDDEN), jnp.float32)
    be1 = jnp.zeros((1, HIDDEN), jnp.float32)
    w1 = lin(ks[7], HIDDEN, (HIDDEN, FILTER))
    b1 = lin(ks[8], HIDDEN, (1, FILTER))
    w2 = lin(ks[9], FILTER, (FILTER, HIDDEN))
    b2 = jnp.zeros((1, HIDDEN), jnp.float32)
    g2 = jnp.ones((1, HIDDEN), jnp.float32)
    be2 = jnp.zeros((1, HIDDEN), jnp.float32)
    return (wpre, bpre, wp, bp, wqkv, bqkv, wo, bo,
            g1, be1, w1, b1, w2, b2, g2, be2)


# ---- pure-JAX reference (same math, unpacked params) for a sanity check --------
def reference_forward(inputs, params):
    (wpre, bpre, wp, bp, wqkv, bqkv, wo, bo,
     g1, be1, w1, b1, w2, b2, g2, be2) = params
    hd = HEAD_DIM
    scale = 1.0 / math.sqrt(hd)

    def ln(t, g, bt):
        m = t.mean(-1, keepdims=True)
        var = ((t - m) ** 2).mean(-1, keepdims=True)
        return (t - m) / jnp.sqrt(var + LN_EPS) * g + bt

    state = inputs @ wpre + bpre
    halting = jnp.zeros(state.shape[:2])
    remainders = jnp.zeros(state.shape[:2])
    n_updates = jnp.zeros(state.shape[:2])
    prev = jnp.zeros_like(state)
    for _ in range(NUM_LAYERS):
        p = jax.nn.sigmoid(jnp.squeeze(state @ wp, -1) + bp[0, 0])
        still = (halting < 1.0).astype(jnp.float32)
        comb = halting + p * still
        new_halted = (comb > THRESHOLD).astype(jnp.float32) * still
        still = (comb <= THRESHOLD).astype(jnp.float32) * still
        halting = halting + p * still
        remainders = remainders + new_halted * (1.0 - halting)
        halting = halting + new_halted * remainders
        n_updates = n_updates + still + new_halted
        uw = p * still + new_halted * remainders

        qkv = state @ wqkv + bqkv
        q, k, v = jnp.split(qkv, 3, axis=-1)
        heads = lambda t: t.reshape(B, L, NUM_HEADS, hd).transpose(0, 2, 1, 3)
        qh, kh, vh = heads(q) * scale, heads(k), heads(v)
        s = jnp.einsum('bhld,bhmd->bhlm', qh, kh)
        a = jax.nn.softmax(s, axis=-1)
        o = jnp.einsum('bhlm,bhmd->bhld', a, vh).transpose(0, 2, 1, 3).reshape(B, L, HIDDEN)
        attn = o @ wo + bo
        src = ln(state + attn, g1, be1)
        ff = jnp.maximum(src @ w1 + b1, 0.0) @ w2 + b2
        state = ln(src + ff, g2, be2)
        prev = state * uw[..., None] + prev * (1.0 - uw[..., None])
    return prev, remainders, n_updates


if __name__ == "__main__":
    key = jax.random.PRNGKey(0)
    k_in, k_par = jax.random.split(key)
    inputs = jax.random.normal(k_in, (B, L, SOURCE_DIMS), jnp.float32)
    params = init_params(k_par)
    packed = pack_params(params)   # one-time transform (scale fold + wp fusion)

    out, (rem, nup) = act_encoder_forward(inputs, packed)
    out = jax.block_until_ready(out)
    rem = jax.block_until_ready(rem)
    nup = jax.block_until_ready(nup)

    ref_out, ref_rem, ref_nup = reference_forward(inputs, params)
    assert out.shape == (B, L, HIDDEN) and rem.shape == (B, L) and nup.shape == (B, L)
    assert jnp.all(jnp.isfinite(out))
    assert jnp.allclose(out, ref_out, atol=1e-2, rtol=1e-2)
    assert jnp.allclose(rem, ref_rem, atol=1e-2, rtol=1e-2)
    assert jnp.allclose(nup, ref_nup, atol=1e-2, rtol=1e-2)

    print("KERNEL_OK")
</pallas_src>

<mosaic_0001>
module attributes {stable_mosaic.version = 11 : i64} {
  func.func @act_encoder_kernel(%arg0: i32, %arg1: memref<16x13xf32, #tpu.memory_space<vmem>>, %arg2: memref<13x32xf32, #tpu.memory_space<vmem>>, %arg3: memref<1x32xf32, #tpu.memory_space<vmem>>, %arg4: memref<32x97xf32, #tpu.memory_space<vmem>>, %arg5: memref<1x97xf32, #tpu.memory_space<vmem>>, %arg6: memref<32x32xf32, #tpu.memory_space<vmem>>, %arg7: memref<1x32xf32, #tpu.memory_space<vmem>>, %arg8: memref<1x32xf32, #tpu.memory_space<vmem>>, %arg9: memref<1x32xf32, #tpu.memory_space<vmem>>, %arg10: memref<32x64xf32, #tpu.memory_space<vmem>>, %arg11: memref<1x64xf32, #tpu.memory_space<vmem>>, %arg12: memref<64x32xf32, #tpu.memory_space<vmem>>, %arg13: memref<1x32xf32, #tpu.memory_space<vmem>>, %arg14: memref<1x32xf32, #tpu.memory_space<vmem>>, %arg15: memref<1x32xf32, #tpu.memory_space<vmem>>, %arg16: memref<16x32xf32, #tpu.memory_space<vmem>>, %arg17: memref<16x2xf32, #tpu.memory_space<vmem>>) attributes {dimension_semantics = [#tpu.dimension_semantics<parallel>], iteration_bounds = array<i64: 1>, scalar_prefetch = 0 : i64, scratch_operands = 0 : i64, tpu.core_type = #tpu.core_type<tc>, window_params = [{transform_indices = @transform_0, window_bounds = array<i64: 16, 13>}, {pipeline_mode = #tpu.pipeline_mode<synchronous>, transform_indices = @transform_1, window_bounds = array<i64: 13, 32>}, {pipeline_mode = #tpu.pipeline_mode<synchronous>, transform_indices = @transform_2, window_bounds = array<i64: 1, 32>}, {pipeline_mode = #tpu.pipeline_mode<synchronous>, transform_indices = @transform_3, window_bounds = array<i64: 32, 97>}, {pipeline_mode = #tpu.pipeline_mode<synchronous>, transform_indices = @transform_4, window_bounds = array<i64: 1, 97>}, {pipeline_mode = #tpu.pipeline_mode<synchronous>, transform_indices = @transform_5, window_bounds = array<i64: 32, 32>}, {pipeline_mode = #tpu.pipeline_mode<synchronous>, transform_indices = @transform_6, window_bounds = array<i64: 1, 32>}, {pipeline_mode = #tpu.pipeline_mode<synchronous>, transform_indices = @transform_7, window_bounds = array<i64: 1, 32>}, {pipeline_mode = #tpu.pipeline_mode<synchronous>, transform_indices = @transform_8, window_bounds = array<i64: 1, 32>}, {pipeline_mode = #tpu.pipeline_mode<synchronous>, transform_indices = @transform_9, window_bounds = array<i64: 32, 64>}, {pipeline_mode = #tpu.pipeline_mode<synchronous>, transform_indices = @transform_10, window_bounds = array<i64: 1, 64>}, {pipeline_mode = #tpu.pipeline_mode<synchronous>, transform_indices = @transform_11, window_bounds = array<i64: 64, 32>}, {pipeline_mode = #tpu.pipeline_mode<synchronous>, transform_indices = @transform_12, window_bounds = array<i64: 1, 32>}, {pipeline_mode = #tpu.pipeline_mode<synchronous>, transform_indices = @transform_13, window_bounds = array<i64: 1, 32>}, {pipeline_mode = #tpu.pipeline_mode<synchronous>, transform_indices = @transform_14, window_bounds = array<i64: 1, 32>}, {transform_indices = @transform_15, window_bounds = array<i64: 16, 32>}, {transform_indices = @transform_16, window_bounds = array<i64: 16, 2>}]} {
    %c0 = arith.constant 0 : index
    %c0_0 = arith.constant 0 : index
    %0 = vector.load %arg1[%c0, %c0_0] : memref<16x13xf32, #tpu.memory_space<vmem>>, vector<16x13xf32>
    %c0_1 = arith.constant 0 : index
    %c0_2 = arith.constant 0 : index
    %1 = vector.load %arg2[%c0_1, %c0_2] : memref<13x32xf32, #tpu.memory_space<vmem>>, vector<13x32xf32>
    %c0_3 = arith.constant 0 : index
    %c0_4 = arith.constant 0 : index
    %2 = vector.load %arg3[%c0_3, %c0_4] : memref<1x32xf32, #tpu.memory_space<vmem>>, vector<1x32xf32>
    %c0_5 = arith.constant 0 : index
    %c0_6 = arith.constant 0 : index
    %3 = vector.load %arg4[%c0_5, %c0_6] : memref<32x97xf32, #tpu.memory_space<vmem>>, vector<32x97xf32>
    %c0_7 = arith.constant 0 : index
    %c0_8 = arith.constant 0 : index
    %4 = vector.load %arg5[%c0_7, %c0_8] : memref<1x97xf32, #tpu.memory_space<vmem>>, vector<1x97xf32>
    %c0_9 = arith.constant 0 : index
    %c0_10 = arith.constant 0 : index
    %5 = vector.load %arg6[%c0_9, %c0_10] : memref<32x32xf32, #tpu.memory_space<vmem>>, vector<32x32xf32>
    %c0_11 = arith.constant 0 : index
    %c0_12 = arith.constant 0 : index
    %6 = vector.load %arg7[%c0_11, %c0_12] : memref<1x32xf32, #tpu.memory_space<vmem>>, vector<1x32xf32>
    %c0_13 = arith.constant 0 : index
    %c0_14 = arith.constant 0 : index
    %7 = vector.load %arg8[%c0_13, %c0_14] : memref<1x32xf32, #tpu.memory_space<vmem>>, vector<1x32xf32>
    %c0_15 = arith.constant 0 : index
    %c0_16 = arith.constant 0 : index
    %8 = vector.load %arg9[%c0_15, %c0_16] : memref<1x32xf32, #tpu.memory_space<vmem>>, vector<1x32xf32>
    %c0_17 = arith.constant 0 : index
    %c0_18 = arith.constant 0 : index
    %9 = vector.load %arg10[%c0_17, %c0_18] : memref<32x64xf32, #tpu.memory_space<vmem>>, vector<32x64xf32>
    %c0_19 = arith.constant 0 : index
    %c0_20 = arith.constant 0 : index
    %10 = vector.load %arg11[%c0_19, %c0_20] : memref<1x64xf32, #tpu.memory_space<vmem>>, vector<1x64xf32>
    %c0_21 = arith.constant 0 : index
    %c0_22 = arith.constant 0 : index
    %11 = vector.load %arg12[%c0_21, %c0_22] : memref<64x32xf32, #tpu.memory_space<vmem>>, vector<64x32xf32>
    %c0_23 = arith.constant 0 : index
    %c0_24 = arith.constant 0 : index
    %12 = vector.load %arg13[%c0_23, %c0_24] : memref<1x32xf32, #tpu.memory_space<vmem>>, vector<1x32xf32>
    %c0_25 = arith.constant 0 : index
    %c0_26 = arith.constant 0 : index
    %13 = vector.load %arg14[%c0_25, %c0_26] : memref<1x32xf32, #tpu.memory_space<vmem>>, vector<1x32xf32>
    %c0_27 = arith.constant 0 : index
    %c0_28 = arith.constant 0 : index
    %14 = vector.load %arg15[%c0_27, %c0_28] : memref<1x32xf32, #tpu.memory_space<vmem>>, vector<1x32xf32>
    %cst = arith.constant dense<0.000000e+00> : vector<16x32xf32>
    %15 = tpu.matmul %0, %1, %cst {dimension_numbers = #tpu.dot_dimension_numbers<[1], [0], [0], [1], [0, 0, 1, 1], [], []>} : vector<16x13xf32>, vector<13x32xf32>, vector<16x32xf32> -> vector<16x32xf32>
    %16 = vector.broadcast %2 : vector<1x32xf32> to vector<16x32xf32>
    %17 = arith.addf %15, %16 : vector<16x32xf32>
    %cst_29 = arith.constant 0.000000e+00 : f32
    %18 = vector.broadcast %cst_29 : f32 to vector<16x1xf32>
    %cst_30 = arith.constant 0.000000e+00 : f32
    %19 = vector.broadcast %cst_30 : f32 to vector<16x1xf32>
    %cst_31 = arith.constant 0.000000e+00 : f32
    %20 = vector.broadcast %cst_31 : f32 to vector<16x1xf32>
    %cst_32 = arith.constant 0.000000e+00 : f32
    %21 = vector.broadcast %cst_32 : f32 to vector<16x32xf32>
    %cst_33 = arith.constant dense<0.000000e+00> : vector<16x97xf32>
    %22 = tpu.matmul %17, %3, %cst_33 {dimension_numbers = #tpu.dot_dimension_numbers<[1], [0], [0], [1], [0, 0, 1, 1], [], []>} : vector<16x32xf32>, vector<32x97xf32>, vector<16x97xf32> -> vector<16x97xf32>
    %23 = vector.broadcast %4 : vector<1x97xf32> to vector<16x97xf32>
    %24 = arith.addf %22, %23 : vector<16x97xf32>
    %25 = vector.extract_strided_slice %24 {offsets = [0, 96], sizes = [16, 1], strides = [1, 1]} : vector<16x97xf32> to vector<16x1xf32>
    %cst_34 = arith.constant 0.000000e+00 : f32
    %26 = vector.broadcast %cst_34 : f32 to vector<16x1xf32>
    %27 = arith.subf %26, %25 : vector<16x1xf32>
    %28 = math.exp %27 : vector<16x1xf32>
    %cst_35 = arith.constant 1.000000e+00 : f32
    %29 = vector.broadcast %cst_35 : f32 to vector<16x1xf32>
    %30 = arith.addf %29, %28 : vector<16x1xf32>
    %cst_36 = arith.constant 1.000000e+00 : f32
    %31 = vector.broadcast %cst_36 : f32 to vector<16x1xf32>
    %32 = arith.divf %31, %30 : vector<16x1xf32>
    %cst_37 = arith.constant 1.000000e+00 : f32
    %33 = vector.broadcast %cst_37 : f32 to vector<16x1xf32>
    %34 = arith.cmpf olt, %18, %33 : vector<16x1xf32>
    %35 = arith.extui %34 : vector<16x1xi1> to vector<16x1xi32>
    %36 = arith.sitofp %35 : vector<16x1xi32> to vector<16x1xf32>
    %37 = arith.mulf %32, %36 : vector<16x1xf32>
    %38 = arith.addf %18, %37 : vector<16x1xf32>
    %cst_38 = arith.constant 0.899999976 : f32
    %39 = vector.broadcast %cst_38 : f32 to vector<16x1xf32>
    %40 = arith.cmpf ogt, %38, %39 : vector<16x1xf32>
    %41 = arith.extui %40 : vector<16x1xi1> to vector<16x1xi32>
    %42 = arith.sitofp %41 : vector<16x1xi32> to vector<16x1xf32>
    %43 = arith.mulf %42, %36 : vector<16x1xf32>
    %cst_39 = arith.constant 0.899999976 : f32
    %44 = vector.broadcast %cst_39 : f32 to vector<16x1xf32>
    %45 = arith.cmpf ole, %38, %44 : vector<16x1xf32>
    %46 = arith.extui %45 : vector<16x1xi1> to vector<16x1xi32>
    %47 = arith.sitofp %46 : vector<16x1xi32> to vector<16x1xf32>
    %48 = arith.mulf %47, %36 : vector<16x1xf32>
    %49 = arith.mulf %32, %48 : vector<16x1xf32>
    %50 = arith.addf %18, %49 : vector<16x1xf32>
    %cst_40 = arith.constant 1.000000e+00 : f32
    %51 = vector.broadcast %cst_40 : f32 to vector<16x1xf32>
    %52 = arith.subf %51, %50 : vector<16x1xf32>
    %53 = arith.mulf %43, %52 : vector<16x1xf32>
    %54 = arith.addf %19, %53 : vector<16x1xf32>
    %55 = arith.mulf %43, %54 : vector<16x1xf32>
    %56 = arith.addf %50, %55 : vector<16x1xf32>
    %57 = arith.addf %20, %48 : vector<16x1xf32>
    %58 = arith.addf %57, %43 : vector<16x1xf32>
    %59 = arith.mulf %32, %48 : vector<16x1xf32>
    %60 = arith.mulf %43, %54 : vector<16x1xf32>
    %61 = arith.addf %59, %60 : vector<16x1xf32>
    %62 = vector.extract_strided_slice %24 {offsets = [0, 0], sizes = [16, 32], strides = [1, 1]} : vector<16x97xf32> to vector<16x32xf32>
    %63 = vector.extract_strided_slice %24 {offsets = [0, 32], sizes = [16, 32], strides = [1, 1]} : vector<16x97xf32> to vector<16x32xf32>
    %64 = vector.extract_strided_slice %24 {offsets = [0, 64], sizes = [16, 32], strides = [1, 1]} : vector<16x97xf32> to vector<16x32xf32>
    %65 = vector.extract_strided_slice %62 {offsets = [0, 0], sizes = [8, 8], strides = [1, 1]} : vector<16x32xf32> to vector<8x8xf32>
    %66 = vector.extract_strided_slice %63 {offsets = [0, 0], sizes = [8, 8], strides = [1, 1]} : vector<16x32xf32> to vector<8x8xf32>
    %cst_41 = arith.constant dense<0.000000e+00> : vector<8x8xf32>
    %67 = tpu.matmul %65, %66, %cst_41 {dimension_numbers = #tpu.dot_dimension_numbers<[1], [1], [0], [0], [0, 0, 1, 0], [], []>} : vector<8x8xf32>, vector<8x8xf32>, vector<8x8xf32> -> vector<8x8xf32>
    %cst_42 = arith.constant dense<0xFF800000> : vector<8xf32>
    %68 = vector.multi_reduction <maximumf>, %67, %cst_42 [1] : vector<8x8xf32> to vector<8xf32>
    %69 = vector.shape_cast %68 : vector<8xf32> to vector<8x1xf32>
    %70 = vector.broadcast %69 : vector<8x1xf32> to vector<8x8xf32>
    %71 = arith.subf %67, %70 : vector<8x8xf32>
    %72 = math.exp %71 : vector<8x8xf32>
    %cst_43 = arith.constant dense<0.000000e+00> : vector<8xf32>
    %73 = vector.multi_reduction <add>, %72, %cst_43 [1] : vector<8x8xf32> to vector<8xf32>
    %74 = vector.shape_cast %73 : vector<8xf32> to vector<8x1xf32>
    %75 = vector.broadcast %74 : vector<8x1xf32> to vector<8x8xf32>
    %76 = arith.divf %72, %75 : vector<8x8xf32>
    %77 = vector.extract_strided_slice %64 {offsets = [0, 0], sizes = [8, 8], strides = [1, 1]} : vector<16x32xf32> to vector<8x8xf32>
    %cst_44 = arith.constant dense<0.000000e+00> : vector<8x8xf32>
    %78 = tpu.matmul %76, %77, %cst_44 {dimension_numbers = #tpu.dot_dimension_numbers<[1], [0], [0], [1], [0, 0, 1, 1], [], []>} : vector<8x8xf32>, vector<8x8xf32>, vector<8x8xf32> -> vector<8x8xf32>
    %79 = vector.extract_strided_slice %62 {offsets = [0, 8], sizes = [8, 8], strides = [1, 1]} : vector<16x32xf32> to vector<8x8xf32>
    %80 = vector.extract_strided_slice %63 {offsets = [0, 8], sizes = [8, 8], strides = [1, 1]} : vector<16x32xf32> to vector<8x8xf32>
    %cst_45 = arith.constant dense<0.000000e+00> : vector<8x8xf32>
    %81 = tpu.matmul %79, %80, %cst_45 {dimension_numbers = #tpu.dot_dimension_numbers<[1], [1], [0], [0], [0, 0, 1, 0], [], []>} : vector<8x8xf32>, vector<8x8xf32>, vector<8x8xf32> -> vector<8x8xf32>
    %cst_46 = arith.constant dense<0xFF800000> : vector<8xf32>
    %82 = vector.multi_reduction <maximumf>, %81, %cst_46 [1] : vector<8x8xf32> to vector<8xf32>
    %83 = vector.shape_cast %82 : vector<8xf32> to vector<8x1xf32>
    %84 = vector.broadcast %83 : vector<8x1xf32> to vector<8x8xf32>
    %85 = arith.subf %81, %84 : vector<8x8xf32>
    %86 = math.exp %85 : vector<8x8xf32>
    %cst_47 = arith.constant dense<0.000000e+00> : vector<8xf32>
    %87 = vector.multi_reduction <add>, %86, %cst_47 [1] : vector<8x8xf32> to vector<8xf32>
    %88 = vector.shape_cast %87 : vector<8xf32> to vector<8x1xf32>
    %89 = vector.broadcast %88 : vector<8x1xf32> to vector<8x8xf32>
    %90 = arith.divf %86, %89 : vector<8x8xf32>
    %91 = vector.extract_strided_slice %64 {offsets = [0, 8], sizes = [8, 8], strides = [1, 1]} : vector<16x32xf32> to vector<8x8xf32>
    %cst_48 = arith.constant dense<0.000000e+00> : vector<8x8xf32>
    %92 = tpu.matmul %90, %91, %cst_48 {dimension_numbers = #tpu.dot_dimension_numbers<[1], [0], [0], [1], [0, 0, 1, 1], [], []>} : vector<8x8xf32>, vector<8x8xf32>, vector<8x8xf32> -> vector<8x8xf32>
    %93 = vector.extract_strided_slice %62 {offsets = [0, 16], sizes = [8, 8], strides = [1, 1]} : vector<16x32xf32> to vector<8x8xf32>
    %94 = vector.extract_strided_slice %63 {offsets = [0, 16], sizes = [8, 8], strides = [1, 1]} : vector<16x32xf32> to vector<8x8xf32>
    %cst_49 = arith.constant dense<0.000000e+00> : vector<8x8xf32>
    %95 = tpu.matmul %93, %94, %cst_49 {dimension_numbers = #tpu.dot_dimension_numbers<[1], [1], [0], [0], [0, 0, 1, 0], [], []>} : vector<8x8xf32>, vector<8x8xf32>, vector<8x8xf32> -> vector<8x8xf32>
    %cst_50 = arith.constant dense<0xFF800000> : vector<8xf32>
    %96 = vector.multi_reduction <maximumf>, %95, %cst_50 [1] : vector<8x8xf32> to vector<8xf32>
    %97 = vector.shape_cast %96 : vector<8xf32> to vector<8x1xf32>
    %98 = vector.broadcast %97 : vector<8x1xf32> to vector<8x8xf32>
    %99 = arith.subf %95, %98 : vector<8x8xf32>
    %100 = math.exp %99 : vector<8x8xf32>
    %cst_51 = arith.constant dense<0.000000e+00> : vector<8xf32>
    %101 = vector.multi_reduction <add>, %100, %cst_51 [1] : vector<8x8xf32> to vector<8xf32>
    %102 = vector.shape_cast %101 : vector<8xf32> to vector<8x1xf32>
    %103 = vector.broadcast %102 : vector<8x1xf32> to vector<8x8xf32>
    %104 = arith.divf %100, %103 : vector<8x8xf32>
    %105 = vector.extract_strided_slice %64 {offsets = [0, 16], sizes = [8, 8], strides = [1, 1]} : vector<16x32xf32> to vector<8x8xf32>
    %cst_52 = arith.constant dense<0.000000e+00> : vector<8x8xf32>
    %106 = tpu.matmul %104, %105, %cst_52 {dimension_numbers = #tpu.dot_dimension_numbers<[1], [0], [0], [1], [0, 0, 1, 1], [], []>} : vector<8x8xf32>, vector<8x8xf32>, vector<8x8xf32> -> vector<8x8xf32>
    %107 = vector.extract_strided_slice %62 {offsets = [0, 24], sizes = [8, 8], strides = [1, 1]} : vector<16x32xf32> to vector<8x8xf32>
    %108 = vector.extract_strided_slice %63 {offsets = [0, 24], sizes = [8, 8], strides = [1, 1]} : vector<16x32xf32> to vector<8x8xf32>
    %cst_53 = arith.constant dense<0.000000e+00> : vector<8x8xf32>
    %109 = tpu.matmul %107, %108, %cst_53 {dimension_numbers = #tpu.dot_dimension_numbers<[1], [1], [0], [0], [0, 0, 1, 0], [], []>} : vector<8x8xf32>, vector<8x8xf32>, vector<8x8xf32> -> vector<8x8xf32>
    %cst_54 = arith.constant dense<0xFF800000> : vector<8xf32>
    %110 = vector.multi_reduction <maximumf>, %109, %cst_54 [1] : vector<8x8xf32> to vector<8xf32>
    %111 = vector.shape_cast %110 : vector<8xf32> to vector<8x1xf32>
    %112 = vector.broadcast %111 : vector<8x1xf32> to vector<8x8xf32>
    %113 = arith.subf %109, %112 : vector<8x8xf32>
    %114 = math.exp %113 : vector<8x8xf32>
    %cst_55 = arith.constant dense<0.000000e+00> : vector<8xf32>
    %115 = vector.multi_reduction <add>, %114, %cst_55 [1] : vector<8x8xf32> to vector<8xf32>
    %116 = vector.shape_cast %115 : vector<8xf32> to vector<8x1xf32>
    %117 = vector.broadcast %116 : vector<8x1xf32> to vector<8x8xf32>
    %118 = arith.divf %114, %117 : vector<8x8xf32>
    %119 = vector.extract_strided_slice %64 {offsets = [0, 24], sizes = [8, 8], strides = [1, 1]} : vector<16x32xf32> to vector<8x8xf32>
    %cst_56 = arith.constant dense<0.000000e+00> : vector<8x8xf32>
    %120 = tpu.matmul %118, %119, %cst_56 {dimension_numbers = #tpu.dot_dimension_numbers<[1], [0], [0], [1], [0, 0, 1, 1], [], []>} : vector<8x8xf32>, vector<8x8xf32>, vector<8x8xf32> -> vector<8x8xf32>
    %121 = tpu.concatenate %78, %92, %106, %120 in 1 : vector<8x8xf32>, vector<8x8xf32>, vector<8x8xf32>, vector<8x8xf32> -> vector<8x32xf32>
    %122 = vector.extract_strided_slice %62 {offsets = [8, 0], sizes = [8, 8], strides = [1, 1]} : vector<16x32xf32> to vector<8x8xf32>
    %123 = vector.extract_strided_slice %63 {offsets = [8, 0], sizes = [8, 8], strides = [1, 1]} : vector<16x32xf32> to vector<8x8xf32>
    %cst_57 = arith.constant dense<0.000000e+00> : vector<8x8xf32>
    %124 = tpu.matmul %122, %123, %cst_57 {dimension_numbers = #tpu.dot_dimension_numbers<[1], [1], [0], [0], [0, 0, 1, 0], [], []>} : vector<8x8xf32>, vector<8x8xf32>, vector<8x8xf32> -> vector<8x8xf32>
    %cst_58 = arith.constant dense<0xFF800000> : vector<8xf32>
    %125 = vector.multi_reduction <maximumf>, %124, %cst_58 [1] : vector<8x8xf32> to vector<8xf32>
    %126 = vector.shape_cast %125 : vector<8xf32> to vector<8x1xf32>
    %127 = vector.broadcast %126 : vector<8x1xf32> to vector<8x8xf32>
    %128 = arith.subf %124, %127 : vector<8x8xf32>
    %129 = math.exp %128 : vector<8x8xf32>
    %cst_59 = arith.constant dense<0.000000e+00> : vector<8xf32>
    %130 = vector.multi_reduction <add>, %129, %cst_59 [1] : vector<8x8xf32> to vector<8xf32>
    %131 = vector.shape_cast %130 : vector<8xf32> to vector<8x1xf32>
    %132 = vector.broadcast %131 : vector<8x1xf32> to vector<8x8xf32>
    %133 = arith.divf %129, %132 : vector<8x8xf32>
    %134 = vector.extract_strided_slice %64 {offsets = [8, 0], sizes = [8, 8], strides = [1, 1]} : vector<16x32xf32> to vector<8x8xf32>
    %cst_60 = arith.constant dense<0.000000e+00> : vector<8x8xf32>
    %135 = tpu.matmul %133, %134, %cst_60 {dimension_numbers = #tpu.dot_dimension_numbers<[1], [0], [0], [1], [0, 0, 1, 1], [], []>} : vector<8x8xf32>, vector<8x8xf32>, vector<8x8xf32> -> vector<8x8xf32>
    %136 = vector.extract_strided_slice %62 {offsets = [8, 8], sizes = [8, 8], strides = [1, 1]} : vector<16x32xf32> to vector<8x8xf32>
    %137 = vector.extract_strided_slice %63 {offsets = [8, 8], sizes = [8, 8], strides = [1, 1]} : vector<16x32xf32> to vector<8x8xf32>
    %cst_61 = arith.constant dense<0.000000e+00> : vector<8x8xf32>
    %138 = tpu.matmul %136, %137, %cst_61 {dimension_numbers = #tpu.dot_dimension_numbers<[1], [1], [0], [0], [0, 0, 1, 0], [], []>} : vector<8x8xf32>, vector<8x8xf32>, vector<8x8xf32> -> vector<8x8xf32>
    %cst_62 = arith.constant dense<0xFF800000> : vector<8xf32>
    %139 = vector.multi_reduction <maximumf>, %138, %cst_62 [1] : vector<8x8xf32> to vector<8xf32>
    %140 = vector.shape_cast %139 : vector<8xf32> to vector<8x1xf32>
    %141 = vector.broadcast %140 : vector<8x1xf32> to vector<8x8xf32>
    %142 = arith.subf %138, %141 : vector<8x8xf32>
    %143 = math.exp %142 : vector<8x8xf32>
    %cst_63 = arith.constant dense<0.000000e+00> : vector<8xf32>
    %144 = vector.multi_reduction <add>, %143, %cst_63 [1] : vector<8x8xf32> to vector<8xf32>
    %145 = vector.shape_cast %144 : vector<8xf32> to vector<8x1xf32>
    %146 = vector.broadcast %145 : vector<8x1xf32> to vector<8x8xf32>
    %147 = arith.divf %143, %146 : vector<8x8xf32>
    %148 = vector.extract_strided_slice %64 {offsets = [8, 8], sizes = [8, 8], strides = [1, 1]} : vector<16x32xf32> to vector<8x8xf32>
    %cst_64 = arith.constant dense<0.000000e+00> : vector<8x8xf32>
    %149 = tpu.matmul %147, %148, %cst_64 {dimension_numbers = #tpu.dot_dimension_numbers<[1], [0], [0], [1], [0, 0, 1, 1], [], []>} : vector<8x8xf32>, vector<8x8xf32>, vector<8x8xf32> -> vector<8x8xf32>
    %150 = vector.extract_strided_slice %62 {offsets = [8, 16], sizes = [8, 8], strides = [1, 1]} : vector<16x32xf32> to vector<8x8xf32>
    %151 = vector.extract_strided_slice %63 {offsets = [8, 16], sizes = [8, 8], strides = [1, 1]} : vector<16x32xf32> to vector<8x8xf32>
    %cst_65 = arith.constant dense<0.000000e+00> : vector<8x8xf32>
    %152 = tpu.matmul %150, %151, %cst_65 {dimension_numbers = #tpu.dot_dimension_numbers<[1], [1], [0], [0], [0, 0, 1, 0], [], []>} : vector<8x8xf32>, vector<8x8xf32>, vector<8x8xf32> -> vector<8x8xf32>
    %cst_66 = arith.constant dense<0xFF800000> : vector<8xf32>
    %153 = vector.multi_reduction <maximumf>, %152, %cst_66 [1] : vector<8x8xf32> to vector<8xf32>
    %154 = vector.shape_cast %153 : vector<8xf32> to vector<8x1xf32>
    %155 = vector.broadcast %154 : vector<8x1xf32> to vector<8x8xf32>
    %156 = arith.subf %152, %155 : vector<8x8xf32>
    %157 = math.exp %156 : vector<8x8xf32>
    %cst_67 = arith.constant dense<0.000000e+00> : vector<8xf32>
    %158 = vector.multi_reduction <add>, %157, %cst_67 [1] : vector<8x8xf32> to vector<8xf32>
    %159 = vector.shape_cast %158 : vector<8xf32> to vector<8x1xf32>
    %160 = vector.broadcast %159 : vector<8x1xf32> to vector<8x8xf32>
    %161 = arith.divf %157, %160 : vector<8x8xf32>
    %162 = vector.extract_strided_slice %64 {offsets = [8, 16], sizes = [8, 8], strides = [1, 1]} : vector<16x32xf32> to vector<8x8xf32>
    %cst_68 = arith.constant dense<0.000000e+00> : vector<8x8xf32>
    %163 = tpu.matmul %161, %162, %cst_68 {dimension_numbers = #tpu.dot_dimension_numbers<[1], [0], [0], [1], [0, 0, 1, 1], [], []>} : vector<8x8xf32>, vector<8x8xf32>, vector<8x8xf32> -> vector<8x8xf32>
    %164 = vector.extract_strided_slice %62 {offsets = [8, 24], sizes = [8, 8], strides = [1, 1]} : vector<16x32xf32> to vector<8x8xf32>
    %165 = vector.extract_strided_slice %63 {offsets = [8, 24], sizes = [8, 8], strides = [1, 1]} : vector<16x32xf32> to vector<8x8xf32>
    %cst_69 = arith.constant dense<0.000000e+00> : vector<8x8xf32>
    %166 = tpu.matmul %164, %165, %cst_69 {dimension_numbers = #tpu.dot_dimension_numbers<[1], [1], [0], [0], [0, 0, 1, 0], [], []>} : vector<8x8xf32>, vector<8x8xf32>, vector<8x8xf32> -> vector<8x8xf32>
    %cst_70 = arith.constant dense<0xFF800000> : vector<8xf32>
    %167 = vector.multi_reduction <maximumf>, %166, %cst_70 [1] : vector<8x8xf32> to vector<8xf32>
    %168 = vector.shape_cast %167 : vector<8xf32> to vector<8x1xf32>
    %169 = vector.broadcast %168 : vector<8x1xf32> to vector<8x8xf32>
    %170 = arith.subf %166, %169 : vector<8x8xf32>
    %171 = math.exp %170 : vector<8x8xf32>
    %cst_71 = arith.constant dense<0.000000e+00> : vector<8xf32>
    %172 = vector.multi_reduction <add>, %171, %cst_71 [1] : vector<8x8xf32> to vector<8xf32>
    %173 = vector.shape_cast %172 : vector<8xf32> to vector<8x1xf32>
    %174 = vector.broadcast %173 : vector<8x1xf32> to vector<8x8xf32>
    %175 = arith.divf %171, %174 : vector<8x8xf32>
    %176 = vector.extract_strided_slice %64 {offsets = [8, 24], sizes = [8, 8], strides = [1, 1]} : vector<16x32xf32> to vector<8x8xf32>
    %cst_72 = arith.constant dense<0.000000e+00> : vector<8x8xf32>
    %177 = tpu.matmul %175, %176, %cst_72 {dimension_numbers = #tpu.dot_dimension_numbers<[1], [0], [0], [1], [0, 0, 1, 1], [], []>} : vector<8x8xf32>, vector<8x8xf32>, vector<8x8xf32> -> vector<8x8xf32>
    %178 = tpu.concatenate %135, %149, %163, %177 in 1 : vector<8x8xf32>, vector<8x8xf32>, vector<8x8xf32>, vector<8x8xf32> -> vector<8x32xf32>
    %179 = tpu.concatenate %121, %178 in 0 : vector<8x32xf32>, vector<8x32xf32> -> vector<16x32xf32>
    %cst_73 = arith.constant dense<0.000000e+00> : vector<16x32xf32>
    %180 = tpu.matmul %179, %5, %cst_73 {dimension_numbers = #tpu.dot_dimension_numbers<[1], [0], [0], [1], [0, 0, 1, 1], [], []>} : vector<16x32xf32>, vector<32x32xf32>, vector<16x32xf32> -> vector<16x32xf32>
    %181 = vector.broadcast %6 : vector<1x32xf32> to vector<16x32xf32>
    %182 = arith.addf %180, %181 : vector<16x32xf32>
    %183 = arith.addf %17, %182 : vector<16x32xf32>
    %cst_74 = arith.constant dense<0.000000e+00> : vector<16xf32>
    %184 = vector.multi_reduction <add>, %183, %cst_74 [1] : vector<16x32xf32> to vector<16xf32>
    %185 = vector.shape_cast %184 : vector<16xf32> to vector<16x1xf32>
    %cst_75 = arith.constant 3.200000e+01 : f32
    %186 = vector.broadcast %cst_75 : f32 to vector<16x1xf32>
    %187 = arith.divf %185, %186 : vector<16x1xf32>
    %188 = vector.broadcast %187 : vector<16x1xf32> to vector<16x32xf32>
    %189 = arith.subf %183, %188 : vector<16x32xf32>
    %190 = arith.mulf %189, %189 : vector<16x32xf32>
    %cst_76 = arith.constant dense<0.000000e+00> : vector<16xf32>
    %191 = vector.multi_reduction <add>, %190, %cst_76 [1] : vector<16x32xf32> to vector<16xf32>
    %192 = vector.shape_cast %191 : vector<16xf32> to vector<16x1xf32>
    %cst_77 = arith.constant 3.200000e+01 : f32
    %193 = vector.broadcast %cst_77 : f32 to vector<16x1xf32>
    %194 = arith.divf %192, %193 : vector<16x1xf32>
    %195 = vector.broadcast %187 : vector<16x1xf32> to vector<16x32xf32>
    %196 = arith.subf %183, %195 : vector<16x32xf32>
    %cst_78 = arith.constant 9.99999974E-6 : f32
    %197 = vector.broadcast %cst_78 : f32 to vector<16x1xf32>
    %198 = arith.addf %194, %197 : vector<16x1xf32>
    %199 = math.rsqrt %198 : vector<16x1xf32>
    %200 = vector.broadcast %199 : vector<16x1xf32> to vector<16x32xf32>
    %201 = arith.mulf %196, %200 : vector<16x32xf32>
    %202 = vector.broadcast %7 : vector<1x32xf32> to vector<16x32xf32>
    %203 = arith.mulf %201, %202 : vector<16x32xf32>
    %204 = vector.broadcast %8 : vector<1x32xf32> to vector<16x32xf32>
    %205 = arith.addf %203, %204 : vector<16x32xf32>
    %cst_79 = arith.constant dense<0.000000e+00> : vector<16x64xf32>
    %206 = tpu.matmul %205, %9, %cst_79 {dimension_numbers = #tpu.dot_dimension_numbers<[1], [0], [0], [1], [0, 0, 1, 1], [], []>} : vector<16x32xf32>, vector<32x64xf32>, vector<16x64xf32> -> vector<16x64xf32>
    %207 = vector.broadcast %10 : vector<1x64xf32> to vector<16x64xf32>
    %208 = arith.addf %206, %207 : vector<16x64xf32>
    %cst_80 = arith.constant 0.000000e+00 : f32
    %209 = vector.broadcast %cst_80 : f32 to vector<16x64xf32>
    %210 = arith.maximumf %208, %209 : vector<16x64xf32>
    %cst_81 = arith.constant dense<0.000000e+00> : vector<16x32xf32>
    %211 = tpu.matmul %210, %11, %cst_81 {dimension_numbers = #tpu.dot_dimension_numbers<[1], [0], [0], [1], [0, 0, 1, 1], [], []>} : vector<16x64xf32>, vector<64x32xf32>, vector<16x32xf32> -> vector<16x32xf32>
    %212 = vector.broadcast %12 : vector<1x32xf32> to vector<16x32xf32>
    %213 = arith.addf %211, %212 : vector<16x32xf32>
    %214 = arith.addf %205, %213 : vector<16x32xf32>
    %cst_82 = arith.constant dense<0.000000e+00> : vector<16xf32>
    %215 = vector.multi_reduction <add>, %214, %cst_82 [1] : vector<16x32xf32> to vector<16xf32>
    %216 = vector.shape_cast %215 : vector<16xf32> to vector<16x1xf32>
    %cst_83 = arith.constant 3.200000e+01 : f32
    %217 = vector.broadcast %cst_83 : f32 to vector<16x1xf32>
    %218 = arith.divf %216, %217 : vector<16x1xf32>
    %219 = vector.broadcast %218 : vector<16x1xf32> to vector<16x32xf32>
    %220 = arith.subf %214, %219 : vector<16x32xf32>
    %221 = arith.mulf %220, %220 : vector<16x32xf32>
    %cst_84 = arith.constant dense<0.000000e+00> : vector<16xf32>
    %222 = vector.multi_reduction <add>, %221, %cst_84 [1] : vector<16x32xf32> to vector<16xf32>
    %223 = vector.shape_cast %222 : vector<16xf32> to vector<16x1xf32>
    %cst_85 = arith.constant 3.200000e+01 : f32
    %224 = vector.broadcast %cst_85 : f32 to vector<16x1xf32>
    %225 = arith.divf %223, %224 : vector<16x1xf32>
    %226 = vector.broadcast %218 : vector<16x1xf32> to vector<16x32xf32>
    %227 = arith.subf %214, %226 : vector<16x32xf32>
    %cst_86 = arith.constant 9.99999974E-6 : f32
    %228 = vector.broadcast %cst_86 : f32 to vector<16x1xf32>
    %229 = arith.addf %225, %228 : vector<16x1xf32>
    %230 = math.rsqrt %229 : vector<16x1xf32>
    %231 = vector.broadcast %230 : vector<16x1xf32> to vector<16x32xf32>
    %232 = arith.mulf %227, %231 : vector<16x32xf32>
    %233 = vector.broadcast %13 : vector<1x32xf32> to vector<16x32xf32>
    %234 = arith.mulf %232, %233 : vector<16x32xf32>
    %235 = vector.broadcast %14 : vector<1x32xf32> to vector<16x32xf32>
    %236 = arith.addf %234, %235 : vector<16x32xf32>
    %237 = vector.broadcast %61 : vector<16x1xf32> to vector<16x32xf32>
    %238 = arith.mulf %236, %237 : vector<16x32xf32>
    %cst_87 = arith.constant 1.000000e+00 : f32
    %239 = vector.broadcast %cst_87 : f32 to vector<16x1xf32>
    %240 = arith.subf %239, %61 : vector<16x1xf32>
    %241 = vector.broadcast %240 : vector<16x1xf32> to vector<16x32xf32>
    %242 = arith.mulf %21, %241 : vector<16x32xf32>
    %243 = arith.addf %238, %242 : vector<16x32xf32>
    %cst_88 = arith.constant dense<0.000000e+00> : vector<16x97xf32>
    %244 = tpu.matmul %236, %3, %cst_88 {dimension_numbers = #tpu.dot_dimension_numbers<[1], [0], [0], [1], [0, 0, 1, 1], [], []>} : vector<16x32xf32>, vector<32x97xf32>, vector<16x97xf32> -> vector<16x97xf32>
    %245 = vector.broadcast %4 : vector<1x97xf32> to vector<16x97xf32>
    %246 = arith.addf %244, %245 : vector<16x97xf32>
    %247 = vector.extract_strided_slice %246 {offsets = [0, 96], sizes = [16, 1], strides = [1, 1]} : vector<16x97xf32> to vector<16x1xf32>
    %cst_89 = arith.constant 0.000000e+00 : f32
    %248 = vector.broadcast %cst_89 : f32 to vector<16x1xf32>
    %249 = arith.subf %248, %247 : vector<16x1xf32>
    %250 = math.exp %249 : vector<16x1xf32>
    %cst_90 = arith.constant 1.000000e+00 : f32
    %251 = vector.broadcast %cst_90 : f32 to vector<16x1xf32>
    %252 = arith.addf %251, %250 : vector<16x1xf32>
    %cst_91 = arith.constant 1.000000e+00 : f32
    %253 = vector.broadcast %cst_91 : f32 to vector<16x1xf32>
    %254 = arith.divf %253, %252 : vector<16x1xf32>
    %cst_92 = arith.constant 1.000000e+00 : f32
    %255 = vector.broadcast %cst_92 : f32 to vector<16x1xf32>
    %256 = arith.cmpf olt, %56, %255 : vector<16x1xf32>
    %257 = arith.extui %256 : vector<16x1xi1> to vector<16x1xi32>
    %258 = arith.sitofp %257 : vector<16x1xi32> to vector<16x1xf32>
    %259 = arith.mulf %254, %258 : vector<16x1xf32>
    %260 = arith.addf %56, %259 : vector<16x1xf32>
    %cst_93 = arith.constant 0.899999976 : f32
    %261 = vector.broadcast %cst_93 : f32 to vector<16x1xf32>
    %262 = arith.cmpf ogt, %260, %261 : vector<16x1xf32>
    %263 = arith.extui %262 : vector<16x1xi1> to vector<16x1xi32>
    %264 = arith.sitofp %263 : vector<16x1xi32> to vector<16x1xf32>
    %265 = arith.mulf %264, %258 : vector<16x1xf32>
    %cst_94 = arith.constant 0.899999976 : f32
    %266 = vector.broadcast %cst_94 : f32 to vector<16x1xf32>
    %267 = arith.cmpf ole, %260, %266 : vector<16x1xf32>
    %268 = arith.extui %267 : vector<16x1xi1> to vector<16x1xi32>
    %269 = arith.sitofp %268 : vector<16x1xi32> to vector<16x1xf32>
    %270 = arith.mulf %269, %258 : vector<16x1xf32>
    %271 = arith.mulf %254, %270 : vector<16x1xf32>
    %272 = arith.addf %56, %271 : vector<16x1xf32>
    %cst_95 = arith.constant 1.000000e+00 : f32
    %273 = vector.broadcast %cst_95 : f32 to vector<16x1xf32>
    %274 = arith.subf %273, %272 : vector<16x1xf32>
    %275 = arith.mulf %265, %274 : vector<16x1xf32>
    %276 = arith.addf %54, %275 : vector<16x1xf32>
    %277 = arith.mulf %265, %276 : vector<16x1xf32>
    %278 = arith.addf %272, %277 : vector<16x1xf32>
    %279 = arith.addf %58, %270 : vector<16x1xf32>
    %280 = arith.addf %279, %265 : vector<16x1xf32>
    %281 = arith.mulf %254, %270 : vector<16x1xf32>
    %282 = arith.mulf %265, %276 : vector<16x1xf32>
    %283 = arith.addf %281, %282 : vector<16x1xf32>
    %284 = vector.extract_strided_slice %246 {offsets = [0, 0], sizes = [16, 32], strides = [1, 1]} : vector<16x97xf32> to vector<16x32xf32>
    %285 = vector.extract_strided_slice %246 {offsets = [0, 32], sizes = [16, 32], strides = [1, 1]} : vector<16x97xf32> to vector<16x32xf32>
    %286 = vector.extract_strided_slice %246 {offsets = [0, 64], sizes = [16, 32], strides = [1, 1]} : vector<16x97xf32> to vector<16x32xf32>
    %287 = vector.extract_strided_slice %284 {offsets = [0, 0], sizes = [8, 8], strides = [1, 1]} : vector<16x32xf32> to vector<8x8xf32>
    %288 = vector.extract_strided_slice %285 {offsets = [0, 0], sizes = [8, 8], strides = [1, 1]} : vector<16x32xf32> to vector<8x8xf32>
    %cst_96 = arith.constant dense<0.000000e+00> : vector<8x8xf32>
    %289 = tpu.matmul %287, %288, %cst_96 {dimension_numbers = #tpu.dot_dimension_numbers<[1], [1], [0], [0], [0, 0, 1, 0], [], []>} : vector<8x8xf32>, vector<8x8xf32>, vector<8x8xf32> -> vector<8x8xf32>
    %cst_97 = arith.constant dense<0xFF800000> : vector<8xf32>
    %290 = vector.multi_reduction <maximumf>, %289, %cst_97 [1] : vector<8x8xf32> to vector<8xf32>
    %291 = vector.shape_cast %290 : vector<8xf32> to vector<8x1xf32>
    %292 = vector.broadcast %291 : vector<8x1xf32> to vector<8x8xf32>
    %293 = arith.subf %289, %292 : vector<8x8xf32>
    %294 = math.exp %293 : vector<8x8xf32>
    %cst_98 = arith.constant dense<0.000000e+00> : vector<8xf32>
    %295 = vector.multi_reduction <add>, %294, %cst_98 [1] : vector<8x8xf32> to vector<8xf32>
    %296 = vector.shape_cast %295 : vector<8xf32> to vector<8x1xf32>
    %297 = vector.broadcast %296 : vector<8x1xf32> to vector<8x8xf32>
    %298 = arith.divf %294, %297 : vector<8x8xf32>
    %299 = vector.extract_strided_slice %286 {offsets = [0, 0], sizes = [8, 8], strides = [1, 1]} : vector<16x32xf32> to vector<8x8xf32>
    %cst_99 = arith.constant dense<0.000000e+00> : vector<8x8xf32>
    %300 = tpu.matmul %298, %299, %cst_99 {dimension_numbers = #tpu.dot_dimension_numbers<[1], [0], [0], [1], [0, 0, 1, 1], [], []>} : vector<8x8xf32>, vector<8x8xf32>, vector<8x8xf32> -> vector<8x8xf32>
    %301 = vector.extract_strided_slice %284 {offsets = [0, 8], sizes = [8, 8], strides = [1, 1]} : vector<16x32xf32> to vector<8x8xf32>
    %302 = vector.extract_strided_slice %285 {offsets = [0, 8], sizes = [8, 8], strides = [1, 1]} : vector<16x32xf32> to vector<8x8xf32>
    %cst_100 = arith.constant dense<0.000000e+00> : vector<8x8xf32>
    %303 = tpu.matmul %301, %302, %cst_100 {dimension_numbers = #tpu.dot_dimension_numbers<[1], [1], [0], [0], [0, 0, 1, 0], [], []>} : vector<8x8xf32>, vector<8x8xf32>, vector<8x8xf32> -> vector<8x8xf32>
    %cst_101 = arith.constant dense<0xFF800000> : vector<8xf32>
    %304 = vector.multi_reduction <maximumf>, %303, %cst_101 [1] : vector<8x8xf32> to vector<8xf32>
    %305 = vector.shape_cast %304 : vector<8xf32> to vector<8x1xf32>
    %306 = vector.broadcast %305 : vector<8x1xf32> to vector<8x8xf32>
    %307 = arith.subf %303, %306 : vector<8x8xf32>
    %308 = math.exp %307 : vector<8x8xf32>
    %cst_102 = arith.constant dense<0.000000e+00> : vector<8xf32>
    %309 = vector.multi_reduction <add>, %308, %cst_102 [1] : vector<8x8xf32> to vector<8xf32>
    %310 = vector.shape_cast %309 : vector<8xf32> to vector<8x1xf32>
    %311 = vector.broadcast %310 : vector<8x1xf32> to vector<8x8xf32>
    %312 = arith.divf %308, %311 : vector<8x8xf32>
    %313 = vector.extract_strided_slice %286 {offsets = [0, 8], sizes = [8, 8], strides = [1, 1]} : vector<16x32xf32> to vector<8x8xf32>
    %cst_103 = arith.constant dense<0.000000e+00> : vector<8x8xf32>
    %314 = tpu.matmul %312, %313, %cst_103 {dimension_numbers = #tpu.dot_dimension_numbers<[1], [0], [0], [1], [0, 0, 1, 1], [], []>} : vector<8x8xf32>, vector<8x8xf32>, vector<8x8xf32> -> vector<8x8xf32>
    %315 = vector.extract_strided_slice %284 {offsets = [0, 16], sizes = [8, 8], strides = [1, 1]} : vector<16x32xf32> to vector<8x8xf32>
    %316 = vector.extract_strided_slice %285 {offsets = [0, 16], sizes = [8, 8], strides = [1, 1]} : vector<16x32xf32> to vector<8x8xf32>
    %cst_104 = arith.constant dense<0.000000e+00> : vector<8x8xf32>
    %317 = tpu.matmul %315, %316, %cst_104 {dimension_numbers = #tpu.dot_dimension_numbers<[1], [1], [0], [0], [0, 0, 1, 0], [], []>} : vector<8x8xf32>, vector<8x8xf32>, vector<8x8xf32> -> vector<8x8xf32>
    %cst_105 = arith.constant dense<0xFF800000> : vector<8xf32>
    %318 = vector.multi_reduction <maximumf>, %317, %cst_105 [1] : vector<8x8xf32> to vector<8xf32>
    %319 = vector.shape_cast %318 : vector<8xf32> to vector<8x1xf32>
    %320 = vector.broadcast %319 : vector<8x1xf32> to vector<8x8xf32>
    %321 = arith.subf %317, %320 : vector<8x8xf32>
    %322 = math.exp %321 : vector<8x8xf32>
    %cst_106 = arith.constant dense<0.000000e+00> : vector<8xf32>
    %323 = vector.multi_reduction <add>, %322, %cst_106 [1] : vector<8x8xf32> to vector<8xf32>
    %324 = vector.shape_cast %323 : vector<8xf32> to vector<8x1xf32>
    %325 = vector.broadcast %324 : vector<8x1xf32> to vector<8x8xf32>
    %326 = arith.divf %322, %325 : vector<8x8xf32>
    %327 = vector.extract_strided_slice %286 {offsets = [0, 16], sizes = [8, 8], strides = [1, 1]} : vector<16x32xf32> to vector<8x8xf32>
    %cst_107 = arith.constant dense<0.000000e+00> : vector<8x8xf32>
    %328 = tpu.matmul %326, %327, %cst_107 {dimension_numbers = #tpu.dot_dimension_numbers<[1], [0], [0], [1], [0, 0, 1, 1], [], []>} : vector<8x8xf32>, vector<8x8xf32>, vector<8x8xf32> -> vector<8x8xf32>
    %329 = vector.extract_strided_slice %284 {offsets = [0, 24], sizes = [8, 8], strides = [1, 1]} : vector<16x32xf32> to vector<8x8xf32>
    %330 = vector.extract_strided_slice %285 {offsets = [0, 24], sizes = [8, 8], strides = [1, 1]} : vector<16x32xf32> to vector<8x8xf32>
    %cst_108 = arith.constant dense<0.000000e+00> : vector<8x8xf32>
    %331 = tpu.matmul %329, %330, %cst_108 {dimension_numbers = #tpu.dot_dimension_numbers<[1], [1], [0], [0], [0, 0, 1, 0], [], []>} : vector<8x8xf32>, vector<8x8xf32>, vector<8x8xf32> -> vector<8x8xf32>
    %cst_109 = arith.constant dense<0xFF800000> : vector<8xf32>
    %332 = vector.multi_reduction <maximumf>, %331, %cst_109 [1] : vector<8x8xf32> to vector<8xf32>
    %333 = vector.shape_cast %332 : vector<8xf32> to vector<8x1xf32>
    %334 = vector.broadcast %333 : vector<8x1xf32> to vector<8x8xf32>
    %335 = arith.subf %331, %334 : vector<8x8xf32>
    %336 = math.exp %335 : vector<8x8xf32>
    %cst_110 = arith.constant dense<0.000000e+00> : vector<8xf32>
    %337 = vector.multi_reduction <add>, %336, %cst_110 [1] : vector<8x8xf32> to vector<8xf32>
    %338 = vector.shape_cast %337 : vector<8xf32> to vector<8x1xf32>
    %339 = vector.broadcast %338 : vector<8x1xf32> to vector<8x8xf32>
    %340 = arith.divf %336, %339 : vector<8x8xf32>
    %341 = vector.extract_strided_slice %286 {offsets = [0, 24], sizes = [8, 8], strides = [1, 1]} : vector<16x32xf32> to vector<8x8xf32>
    %cst_111 = arith.constant dense<0.000000e+00> : vector<8x8xf32>
    %342 = tpu.matmul %340, %341, %cst_111 {dimension_numbers = #tpu.dot_dimension_numbers<[1], [0], [0], [1], [0, 0, 1, 1], [], []>} : vector<8x8xf32>, vector<8x8xf32>, vector<8x8xf32> -> vector<8x8xf32>
    %343 = tpu.concatenate %300, %314, %328, %342 in 1 : vector<8x8xf32>, vector<8x8xf32>, vector<8x8xf32>, vector<8x8xf32> -> vector<8x32xf32>
    %344 = vector.extract_strided_slice %284 {offsets = [8, 0], sizes = [8, 8], strides = [1, 1]} : vector<16x32xf32> to vector<8x8xf32>
    %345 = vector.extract_strided_slice %285 {offsets = [8, 0], sizes = [8, 8], strides = [1, 1]} : vector<16x32xf32> to vector<8x8xf32>
    %cst_112 = arith.constant dense<0.000000e+00> : vector<8x8xf32>
    %346 = tpu.matmul %344, %345, %cst_112 {dimension_numbers = #tpu.dot_dimension_numbers<[1], [1], [0], [0], [0, 0, 1, 0], [], []>} : vector<8x8xf32>, vector<8x8xf32>, vector<8x8xf32> -> vector<8x8xf32>
    %cst_113 = arith.constant dense<0xFF800000> : vector<8xf32>
    %347 = vector.multi_reduction <maximumf>, %346, %cst_113 [1] : vector<8x8xf32> to vector<8xf32>
    %348 = vector.shape_cast %347 : vector<8xf32> to vector<8x1xf32>
    %349 = vector.broadcast %348 : vector<8x1xf32> to vector<8x8xf32>
    %350 = arith.subf %346, %349 : vector<8x8xf32>
    %351 = math.exp %350 : vector<8x8xf32>
    %cst_114 = arith.constant dense<0.000000e+00> : vector<8xf32>
    %352 = vector.multi_reduction <add>, %351, %cst_114 [1] : vector<8x8xf32> to vector<8xf32>
    %353 = vector.shape_cast %352 : vector<8xf32> to vector<8x1xf32>
    %354 = vector.broadcast %353 : vector<8x1xf32> to vector<8x8xf32>
    %355 = arith.divf %351, %354 : vector<8x8xf32>
    %356 = vector.extract_strided_slice %286 {offsets = [8, 0], sizes = [8, 8], strides = [1, 1]} : vector<16x32xf32> to vector<8x8xf32>
    %cst_115 = arith.constant dense<0.000000e+00> : vector<8x8xf32>
    %357 = tpu.matmul %355, %356, %cst_115 {dimension_numbers = #tpu.dot_dimension_numbers<[1], [0], [0], [1], [0, 0, 1, 1], [], []>} : vector<8x8xf32>, vector<8x8xf32>, vector<8x8xf32> -> vector<8x8xf32>
    %358 = vector.extract_strided_slice %284 {offsets = [8, 8], sizes = [8, 8], strides = [1, 1]} : vector<16x32xf32> to vector<8x8xf32>
    %359 = vector.extract_strided_slice %285 {offsets = [8, 8], sizes = [8, 8], strides = [1, 1]} : vector<16x32xf32> to vector<8x8xf32>
    %cst_116 = arith.constant dense<0.000000e+00> : vector<8x8xf32>
    %360 = tpu.matmul %358, %359, %cst_116 {dimension_numbers = #tpu.dot_dimension_numbers<[1], [1], [0], [0], [0, 0, 1, 0], [], []>} : vector<8x8xf32>, vector<8x8xf32>, vector<8x8xf32> -> vector<8x8xf32>
    %cst_117 = arith.constant dense<0xFF800000> : vector<8xf32>
    %361 = vector.multi_reduction <maximumf>, %360, %cst_117 [1] : vector<8x8xf32> to vector<8xf32>
    %362 = vector.shape_cast %361 : vector<8xf32> to vector<8x1xf32>
    %363 = vector.broadcast %362 : vector<8x1xf32> to vector<8x8xf32>
    %364 = arith.subf %360, %363 : vector<8x8xf32>
    %365 = math.exp %364 : vector<8x8xf32>
    %cst_118 = arith.constant dense<0.000000e+00> : vector<8xf32>
    %366 = vector.multi_reduction <add>, %365, %cst_118 [1] : vector<8x8xf32> to vector<8xf32>
    %367 = vector.shape_cast %366 : vector<8xf32> to vector<8x1xf32>
    %368 = vector.broadcast %367 : vector<8x1xf32> to vector<8x8xf32>
    %369 = arith.divf %365, %368 : vector<8x8xf32>
    %370 = vector.extract_strided_slice %286 {offsets = [8, 8], sizes = [8, 8], strides = [1, 1]} : vector<16x32xf32> to vector<8x8xf32>
    %cst_119 = arith.constant dense<0.000000e+00> : vector<8x8xf32>
    %371 = tpu.matmul %369, %370, %cst_119 {dimension_numbers = #tpu.dot_dimension_numbers<[1], [0], [0], [1], [0, 0, 1, 1], [], []>} : vector<8x8xf32>, vector<8x8xf32>, vector<8x8xf32> -> vector<8x8xf32>
    %372 = vector.extract_strided_slice %284 {offsets = [8, 16], sizes = [8, 8], strides = [1, 1]} : vector<16x32xf32> to vector<8x8xf32>
    %373 = vector.extract_strided_slice %285 {offsets = [8, 16], sizes = [8, 8], strides = [1, 1]} : vector<16x32xf32> to vector<8x8xf32>
    %cst_120 = arith.constant dense<0.000000e+00> : vector<8x8xf32>
    %374 = tpu.matmul %372, %373, %cst_120 {dimension_numbers = #tpu.dot_dimension_numbers<[1], [1], [0], [0], [0, 0, 1, 0], [], []>} : vector<8x8xf32>, vector<8x8xf32>, vector<8x8xf32> -> vector<8x8xf32>
    %cst_121 = arith.constant dense<0xFF800000> : vector<8xf32>
    %375 = vector.multi_reduction <maximumf>, %374, %cst_121 [1] : vector<8x8xf32> to vector<8xf32>
    %376 = vector.shape_cast %375 : vector<8xf32> to vector<8x1xf32>
    %377 = vector.broadcast %376 : vector<8x1xf32> to vector<8x8xf32>
    %378 = arith.subf %374, %377 : vector<8x8xf32>
    %379 = math.exp %378 : vector<8x8xf32>
    %cst_122 = arith.constant dense<0.000000e+00> : vector<8xf32>
    %380 = vector.multi_reduction <add>, %379, %cst_122 [1] : vector<8x8xf32> to vector<8xf32>
    %381 = vector.shape_cast %380 : vector<8xf32> to vector<8x1xf32>
    %382 = vector.broadcast %381 : vector<8x1xf32> to vector<8x8xf32>
    %383 = arith.divf %379, %382 : vector<8x8xf32>
    %384 = vector.extract_strided_slice %286 {offsets = [8, 16], sizes = [8, 8], strides = [1, 1]} : vector<16x32xf32> to vector<8x8xf32>
    %cst_123 = arith.constant dense<0.000000e+00> : vector<8x8xf32>
    %385 = tpu.matmul %383, %384, %cst_123 {dimension_numbers = #tpu.dot_dimension_numbers<[1], [0], [0], [1], [0, 0, 1, 1], [], []>} : vector<8x8xf32>, vector<8x8xf32>, vector<8x8xf32> -> vector<8x8xf32>
    %386 = vector.extract_strided_slice %284 {offsets = [8, 24], sizes = [8, 8], strides = [1, 1]} : vector<16x32xf32> to vector<8x8xf32>
    %387 = vector.extract_strided_slice %285 {offsets = [8, 24], sizes = [8, 8], strides = [1, 1]} : vector<16x32xf32> to vector<8x8xf32>
    %cst_124 = arith.constant dense<0.000000e+00> : vector<8x8xf32>
    %388 = tpu.matmul %386, %387, %cst_124 {dimension_numbers = #tpu.dot_dimension_numbers<[1], [1], [0], [0], [0, 0, 1, 0], [], []>} : vector<8x8xf32>, vector<8x8xf32>, vector<8x8xf32> -> vector<8x8xf32>
    %cst_125 = arith.constant dense<0xFF800000> : vector<8xf32>
    %389 = vector.multi_reduction <maximumf>, %388, %cst_125 [1] : vector<8x8xf32> to vector<8xf32>
    %390 = vector.shape_cast %389 : vector<8xf32> to vector<8x1xf32>
    %391 = vector.broadcast %390 : vector<8x1xf32> to vector<8x8xf32>
    %392 = arith.subf %388, %391 : vector<8x8xf32>
    %393 = math.exp %392 : vector<8x8xf32>
    %cst_126 = arith.constant dense<0.000000e+00> : vector<8xf32>
    %394 = vector.multi_reduction <add>, %393, %cst_126 [1] : vector<8x8xf32> to vector<8xf32>
    %395 = vector.shape_cast %394 : vector<8xf32> to vector<8x1xf32>
    %396 = vector.broadcast %395 : vector<8x1xf32> to vector<8x8xf32>
    %397 = arith.divf %393, %396 : vector<8x8xf32>
    %398 = vector.extract_strided_slice %286 {offsets = [8, 24], sizes = [8, 8], strides = [1, 1]} : vector<16x32xf32> to vector<8x8xf32>
    %cst_127 = arith.constant dense<0.000000e+00> : vector<8x8xf32>
    %399 = tpu.matmul %397, %398, %cst_127 {dimension_numbers = #tpu.dot_dimension_numbers<[1], [0], [0], [1], [0, 0, 1, 1], [], []>} : vector<8x8xf32>, vector<8x8xf32>, vector<8x8xf32> -> vector<8x8xf32>
    %400 = tpu.concatenate %357, %371, %385, %399 in 1 : vector<8x8xf32>, vector<8x8xf32>, vector<8x8xf32>, vector<8x8xf32> -> vector<8x32xf32>
    %401 = tpu.concatenate %343, %400 in 0 : vector<8x32xf32>, vector<8x32xf32> -> vector<16x32xf32>
    %cst_128 = arith.constant dense<0.000000e+00> : vector<16x32xf32>
    %402 = tpu.matmul %401, %5, %cst_128 {dimension_numbers = #tpu.dot_dimension_numbers<[1], [0], [0], [1], [0, 0, 1, 1], [], []>} : vector<16x32xf32>, vector<32x32xf32>, vector<16x32xf32> -> vector<16x32xf32>
    %403 = vector.broadcast %6 : vector<1x32xf32> to vector<16x32xf32>
    %404 = arith.addf %402, %403 : vector<16x32xf32>
    %405 = arith.addf %236, %404 : vector<16x32xf32>
    %cst_129 = arith.constant dense<0.000000e+00> : vector<16xf32>
    %406 = vector.multi_reduction <add>, %405, %cst_129 [1] : vector<16x32xf32> to vector<16xf32>
    %407 = vector.shape_cast %406 : vector<16xf32> to vector<16x1xf32>
    %cst_130 = arith.constant 3.200000e+01 : f32
    %408 = vector.broadcast %cst_130 : f32 to vector<16x1xf32>
    %409 = arith.divf %407, %408 : vector<16x1xf32>
    %410 = vector.broadcast %409 : vector<16x1xf32> to vector<16x32xf32>
    %411 = arith.subf %405, %410 : vector<16x32xf32>
    %412 = arith.mulf %411, %411 : vector<16x32xf32>
    %cst_131 = arith.constant dense<0.000000e+00> : vector<16xf32>
    %413 = vector.multi_reduction <add>, %412, %cst_131 [1] : vector<16x32xf32> to vector<16xf32>
    %414 = vector.shape_cast %413 : vector<16xf32> to vector<16x1xf32>
    %cst_132 = arith.constant 3.200000e+01 : f32
    %415 = vector.broadcast %cst_132 : f32 to vector<16x1xf32>
    %416 = arith.divf %414, %415 : vector<16x1xf32>
    %417 = vector.broadcast %409 : vector<16x1xf32> to vector<16x32xf32>
    %418 = arith.subf %405, %417 : vector<16x32xf32>
    %cst_133 = arith.constant 9.99999974E-6 : f32
    %419 = vector.broadcast %cst_133 : f32 to vector<16x1xf32>
    %420 = arith.addf %416, %419 : vector<16x1xf32>
    %421 = math.rsqrt %420 : vector<16x1xf32>
    %422 = vector.broadcast %421 : vector<16x1xf32> to vector<16x32xf32>
    %423 = arith.mulf %418, %422 : vector<16x32xf32>
    %424 = vector.broadcast %7 : vector<1x32xf32> to vector<16x32xf32>
    %425 = arith.mulf %423, %424 : vector<16x32xf32>
    %426 = vector.broadcast %8 : vector<1x32xf32> to vector<16x32xf32>
    %427 = arith.addf %425, %426 : vector<16x32xf32>
    %cst_134 = arith.constant dense<0.000000e+00> : vector<16x64xf32>
    %428 = tpu.matmul %427, %9, %cst_134 {dimension_numbers = #tpu.dot_dimension_numbers<[1], [0], [0], [1], [0, 0, 1, 1], [], []>} : vector<16x32xf32>, vector<32x64xf32>, vector<16x64xf32> -> vector<16x64xf32>
    %429 = vector.broadcast %10 : vector<1x64xf32> to vector<16x64xf32>
    %430 = arith.addf %428, %429 : vector<16x64xf32>
    %cst_135 = arith.constant 0.000000e+00 : f32
    %431 = vector.broadcast %cst_135 : f32 to vector<16x64xf32>
    %432 = arith.maximumf %430, %431 : vector<16x64xf32>
    %cst_136 = arith.constant dense<0.000000e+00> : vector<16x32xf32>
    %433 = tpu.matmul %432, %11, %cst_136 {dimension_numbers = #tpu.dot_dimension_numbers<[1], [0], [0], [1], [0, 0, 1, 1], [], []>} : vector<16x64xf32>, vector<64x32xf32>, vector<16x32xf32> -> vector<16x32xf32>
    %434 = vector.broadcast %12 : vector<1x32xf32> to vector<16x32xf32>
    %435 = arith.addf %433, %434 : vector<16x32xf32>
    %436 = arith.addf %427, %435 : vector<16x32xf32>
    %cst_137 = arith.constant dense<0.000000e+00> : vector<16xf32>
    %437 = vector.multi_reduction <add>, %436, %cst_137 [1] : vector<16x32xf32> to vector<16xf32>
    %438 = vector.shape_cast %437 : vector<16xf32> to vector<16x1xf32>
    %cst_138 = arith.constant 3.200000e+01 : f32
    %439 = vector.broadcast %cst_138 : f32 to vector<16x1xf32>
    %440 = arith.divf %438, %439 : vector<16x1xf32>
    %441 = vector.broadcast %440 : vector<16x1xf32> to vector<16x32xf32>
    %442 = arith.subf %436, %441 : vector<16x32xf32>
    %443 = arith.mulf %442, %442 : vector<16x32xf32>
    %cst_139 = arith.constant dense<0.000000e+00> : vector<16xf32>
    %444 = vector.multi_reduction <add>, %443, %cst_139 [1] : vector<16x32xf32> to vector<16xf32>
    %445 = vector.shape_cast %444 : vector<16xf32> to vector<16x1xf32>
    %cst_140 = arith.constant 3.200000e+01 : f32
    %446 = vector.broadcast %cst_140 : f32 to vector<16x1xf32>
    %447 = arith.divf %445, %446 : vector<16x1xf32>
    %448 = vector.broadcast %440 : vector<16x1xf32> to vector<16x32xf32>
    %449 = arith.subf %436, %448 : vector<16x32xf32>
    %cst_141 = arith.constant 9.99999974E-6 : f32
    %450 = vector.broadcast %cst_141 : f32 to vector<16x1xf32>
    %451 = arith.addf %447, %450 : vector<16x1xf32>
    %452 = math.rsqrt %451 : vector<16x1xf32>
    %453 = vector.broadcast %452 : vector<16x1xf32> to vector<16x32xf32>
    %454 = arith.mulf %449, %453 : vector<16x32xf32>
    %455 = vector.broadcast %13 : vector<1x32xf32> to vector<16x32xf32>
    %456 = arith.mulf %454, %455 : vector<16x32xf32>
    %457 = vector.broadcast %14 : vector<1x32xf32> to vector<16x32xf32>
    %458 = arith.addf %456, %457 : vector<16x32xf32>
    %459 = vector.broadcast %283 : vector<16x1xf32> to vector<16x32xf32>
    %460 = arith.mulf %458, %459 : vector<16x32xf32>
    %cst_142 = arith.constant 1.000000e+00 : f32
    %461 = vector.broadcast %cst_142 : f32 to vector<16x1xf32>
    %462 = arith.subf %461, %283 : vector<16x1xf32>
    %463 = vector.broadcast %462 : vector<16x1xf32> to vector<16x32xf32>
    %464 = arith.mulf %243, %463 : vector<16x32xf32>
    %465 = arith.addf %460, %464 : vector<16x32xf32>
    %cst_143 = arith.constant dense<0.000000e+00> : vector<16x97xf32>
    %466 = tpu.matmul %458, %3, %cst_143 {dimension_numbers = #tpu.dot_dimension_numbers<[1], [0], [0], [1], [0, 0, 1, 1], [], []>} : vector<16x32xf32>, vector<32x97xf32>, vector<16x97xf32> -> vector<16x97xf32>
    %467 = vector.broadcast %4 : vector<1x97xf32> to vector<16x97xf32>
    %468 = arith.addf %466, %467 : vector<16x97xf32>
    %469 = vector.extract_strided_slice %468 {offsets = [0, 96], sizes = [16, 1], strides = [1, 1]} : vector<16x97xf32> to vector<16x1xf32>
    %cst_144 = arith.constant 0.000000e+00 : f32
    %470 = vector.broadcast %cst_144 : f32 to vector<16x1xf32>
    %471 = arith.subf %470, %469 : vector<16x1xf32>
    %472 = math.exp %471 : vector<16x1xf32>
    %cst_145 = arith.constant 1.000000e+00 : f32
    %473 = vector.broadcast %cst_145 : f32 to vector<16x1xf32>
    %474 = arith.addf %473, %472 : vector<16x1xf32>
    %cst_146 = arith.constant 1.000000e+00 : f32
    %475 = vector.broadcast %cst_146 : f32 to vector<16x1xf32>
    %476 = arith.divf %475, %474 : vector<16x1xf32>
    %cst_147 = arith.constant 1.000000e+00 : f32
    %477 = vector.broadcast %cst_147 : f32 to vector<16x1xf32>
    %478 = arith.cmpf olt, %278, %477 : vector<16x1xf32>
    %479 = arith.extui %478 : vector<16x1xi1> to vector<16x1xi32>
    %480 = arith.sitofp %479 : vector<16x1xi32> to vector<16x1xf32>
    %481 = arith.mulf %476, %480 : vector<16x1xf32>
    %482 = arith.addf %278, %481 : vector<16x1xf32>
    %cst_148 = arith.constant 0.899999976 : f32
    %483 = vector.broadcast %cst_148 : f32 to vector<16x1xf32>
    %484 = arith.cmpf ogt, %482, %483 : vector<16x1xf32>
    %485 = arith.extui %484 : vector<16x1xi1> to vector<16x1xi32>
    %486 = arith.sitofp %485 : vector<16x1xi32> to vector<16x1xf32>
    %487 = arith.mulf %486, %480 : vector<16x1xf32>
    %cst_149 = arith.constant 0.899999976 : f32
    %488 = vector.broadcast %cst_149 : f32 to vector<16x1xf32>
    %489 = arith.cmpf ole, %482, %488 : vector<16x1xf32>
    %490 = arith.extui %489 : vector<16x1xi1> to vector<16x1xi32>
    %491 = arith.sitofp %490 : vector<16x1xi32> to vector<16x1xf32>
    %492 = arith.mulf %491, %480 : vector<16x1xf32>
    %493 = arith.mulf %476, %492 : vector<16x1xf32>
    %494 = arith.addf %278, %493 : vector<16x1xf32>
    %cst_150 = arith.constant 1.000000e+00 : f32
    %495 = vector.broadcast %cst_150 : f32 to vector<16x1xf32>
    %496 = arith.subf %495, %494 : vector<16x1xf32>
    %497 = arith.mulf %487, %496 : vector<16x1xf32>
    %498 = arith.addf %276, %497 : vector<16x1xf32>
    %499 = arith.addf %280, %492 : vector<16x1xf32>
    %500 = arith.addf %499, %487 : vector<16x1xf32>
    %501 = arith.mulf %476, %492 : vector<16x1xf32>
    %502 = arith.mulf %487, %498 : vector<16x1xf32>
    %503 = arith.addf %501, %502 : vector<16x1xf32>
    %504 = vector.extract_strided_slice %468 {offsets = [0, 0], sizes = [16, 32], strides = [1, 1]} : vector<16x97xf32> to vector<16x32xf32>
    %505 = vector.extract_strided_slice %468 {offsets = [0, 32], sizes = [16, 32], strides = [1, 1]} : vector<16x97xf32> to vector<16x32xf32>
    %506 = vector.extract_strided_slice %468 {offsets = [0, 64], sizes = [16, 32], strides = [1, 1]} : vector<16x97xf32> to vector<16x32xf32>
    %507 = vector.extract_strided_slice %504 {offsets = [0, 0], sizes = [8, 8], strides = [1, 1]} : vector<16x32xf32> to vector<8x8xf32>
    %508 = vector.extract_strided_slice %505 {offsets = [0, 0], sizes = [8, 8], strides = [1, 1]} : vector<16x32xf32> to vector<8x8xf32>
    %cst_151 = arith.constant dense<0.000000e+00> : vector<8x8xf32>
    %509 = tpu.matmul %507, %508, %cst_151 {dimension_numbers = #tpu.dot_dimension_numbers<[1], [1], [0], [0], [0, 0, 1, 0], [], []>} : vector<8x8xf32>, vector<8x8xf32>, vector<8x8xf32> -> vector<8x8xf32>
    %cst_152 = arith.constant dense<0xFF800000> : vector<8xf32>
    %510 = vector.multi_reduction <maximumf>, %509, %cst_152 [1] : vector<8x8xf32> to vector<8xf32>
    %511 = vector.shape_cast %510 : vector<8xf32> to vector<8x1xf32>
    %512 = vector.broadcast %511 : vector<8x1xf32> to vector<8x8xf32>
    %513 = arith.subf %509, %512 : vector<8x8xf32>
    %514 = math.exp %513 : vector<8x8xf32>
    %cst_153 = arith.constant dense<0.000000e+00> : vector<8xf32>
    %515 = vector.multi_reduction <add>, %514, %cst_153 [1] : vector<8x8xf32> to vector<8xf32>
    %516 = vector.shape_cast %515 : vector<8xf32> to vector<8x1xf32>
    %517 = vector.broadcast %516 : vector<8x1xf32> to vector<8x8xf32>
    %518 = arith.divf %514, %517 : vector<8x8xf32>
    %519 = vector.extract_strided_slice %506 {offsets = [0, 0], sizes = [8, 8], strides = [1, 1]} : vector<16x32xf32> to vector<8x8xf32>
    %cst_154 = arith.constant dense<0.000000e+00> : vector<8x8xf32>
    %520 = tpu.matmul %518, %519, %cst_154 {dimension_numbers = #tpu.dot_dimension_numbers<[1], [0], [0], [1], [0, 0, 1, 1], [], []>} : vector<8x8xf32>, vector<8x8xf32>, vector<8x8xf32> -> vector<8x8xf32>
    %521 = vector.extract_strided_slice %504 {offsets = [0, 8], sizes = [8, 8], strides = [1, 1]} : vector<16x32xf32> to vector<8x8xf32>
    %522 = vector.extract_strided_slice %505 {offsets = [0, 8], sizes = [8, 8], strides = [1, 1]} : vector<16x32xf32> to vector<8x8xf32>
    %cst_155 = arith.constant dense<0.000000e+00> : vector<8x8xf32>
    %523 = tpu.matmul %521, %522, %cst_155 {dimension_numbers = #tpu.dot_dimension_numbers<[1], [1], [0], [0], [0, 0, 1, 0], [], []>} : vector<8x8xf32>, vector<8x8xf32>, vector<8x8xf32> -> vector<8x8xf32>
    %cst_156 = arith.constant dense<0xFF800000> : vector<8xf32>
    %524 = vector.multi_reduction <maximumf>, %523, %cst_156 [1] : vector<8x8xf32> to vector<8xf32>
    %525 = vector.shape_cast %524 : vector<8xf32> to vector<8x1xf32>
    %526 = vector.broadcast %525 : vector<8x1xf32> to vector<8x8xf32>
    %527 = arith.subf %523, %526 : vector<8x8xf32>
    %528 = math.exp %527 : vector<8x8xf32>
    %cst_157 = arith.constant dense<0.000000e+00> : vector<8xf32>
    %529 = vector.multi_reduction <add>, %528, %cst_157 [1] : vector<8x8xf32> to vector<8xf32>
    %530 = vector.shape_cast %529 : vector<8xf32> to vector<8x1xf32>
    %531 = vector.broadcast %530 : vector<8x1xf32> to vector<8x8xf32>
    %532 = arith.divf %528, %531 : vector<8x8xf32>
    %533 = vector.extract_strided_slice %506 {offsets = [0, 8], sizes = [8, 8], strides = [1, 1]} : vector<16x32xf32> to vector<8x8xf32>
    %cst_158 = arith.constant dense<0.000000e+00> : vector<8x8xf32>
    %534 = tpu.matmul %532, %533, %cst_158 {dimension_numbers = #tpu.dot_dimension_numbers<[1], [0], [0], [1], [0, 0, 1, 1], [], []>} : vector<8x8xf32>, vector<8x8xf32>, vector<8x8xf32> -> vector<8x8xf32>
    %535 = vector.extract_strided_slice %504 {offsets = [0, 16], sizes = [8, 8], strides = [1, 1]} : vector<16x32xf32> to vector<8x8xf32>
    %536 = vector.extract_strided_slice %505 {offsets = [0, 16], sizes = [8, 8], strides = [1, 1]} : vector<16x32xf32> to vector<8x8xf32>
    %cst_159 = arith.constant dense<0.000000e+00> : vector<8x8xf32>
    %537 = tpu.matmul %535, %536, %cst_159 {dimension_numbers = #tpu.dot_dimension_numbers<[1], [1], [0], [0], [0, 0, 1, 0], [], []>} : vector<8x8xf32>, vector<8x8xf32>, vector<8x8xf32> -> vector<8x8xf32>
    %cst_160 = arith.constant dense<0xFF800000> : vector<8xf32>
    %538 = vector.multi_reduction <maximumf>, %537, %cst_160 [1] : vector<8x8xf32> to vector<8xf32>
    %539 = vector.shape_cast %538 : vector<8xf32> to vector<8x1xf32>
    %540 = vector.broadcast %539 : vector<8x1xf32> to vector<8x8xf32>
    %541 = arith.subf %537, %540 : vector<8x8xf32>
    %542 = math.exp %541 : vector<8x8xf32>
    %cst_161 = arith.constant dense<0.000000e+00> : vector<8xf32>
    %543 = vector.multi_reduction <add>, %542, %cst_161 [1] : vector<8x8xf32> to vector<8xf32>
    %544 = vector.shape_cast %543 : vector<8xf32> to vector<8x1xf32>
    %545 = vector.broadcast %544 : vector<8x1xf32> to vector<8x8xf32>
    %546 = arith.divf %542, %545 : vector<8x8xf32>
    %547 = vector.extract_strided_slice %506 {offsets = [0, 16], sizes = [8, 8], strides = [1, 1]} : vector<16x32xf32> to vector<8x8xf32>
    %cst_162 = arith.constant dense<0.000000e+00> : vector<8x8xf32>
    %548 = tpu.matmul %546, %547, %cst_162 {dimension_numbers = #tpu.dot_dimension_numbers<[1], [0], [0], [1], [0, 0, 1, 1], [], []>} : vector<8x8xf32>, vector<8x8xf32>, vector<8x8xf32> -> vector<8x8xf32>
    %549 = vector.extract_strided_slice %504 {offsets = [0, 24], sizes = [8, 8], strides = [1, 1]} : vector<16x32xf32> to vector<8x8xf32>
    %550 = vector.extract_strided_slice %505 {offsets = [0, 24], sizes = [8, 8], strides = [1, 1]} : vector<16x32xf32> to vector<8x8xf32>
    %cst_163 = arith.constant dense<0.000000e+00> : vector<8x8xf32>
    %551 = tpu.matmul %549, %550, %cst_163 {dimension_numbers = #tpu.dot_dimension_numbers<[1], [1], [0], [0], [0, 0, 1, 0], [], []>} : vector<8x8xf32>, vector<8x8xf32>, vector<8x8xf32> -> vector<8x8xf32>
    %cst_164 = arith.constant dense<0xFF800000> : vector<8xf32>
    %552 = vector.multi_reduction <maximumf>, %551, %cst_164 [1] : vector<8x8xf32> to vector<8xf32>
    %553 = vector.shape_cast %552 : vector<8xf32> to vector<8x1xf32>
    %554 = vector.broadcast %553 : vector<8x1xf32> to vector<8x8xf32>
    %555 = arith.subf %551, %554 : vector<8x8xf32>
    %556 = math.exp %555 : vector<8x8xf32>
    %cst_165 = arith.constant dense<0.000000e+00> : vector<8xf32>
    %557 = vector.multi_reduction <add>, %556, %cst_165 [1] : vector<8x8xf32> to vector<8xf32>
    %558 = vector.shape_cast %557 : vector<8xf32> to vector<8x1xf32>
    %559 = vector.broadcast %558 : vector<8x1xf32> to vector<8x8xf32>
    %560 = arith.divf %556, %559 : vector<8x8xf32>
    %561 = vector.extract_strided_slice %506 {offsets = [0, 24], sizes = [8, 8], strides = [1, 1]} : vector<16x32xf32> to vector<8x8xf32>
    %cst_166 = arith.constant dense<0.000000e+00> : vector<8x8xf32>
    %562 = tpu.matmul %560, %561, %cst_166 {dimension_numbers = #tpu.dot_dimension_numbers<[1], [0], [0], [1], [0, 0, 1, 1], [], []>} : vector<8x8xf32>, vector<8x8xf32>, vector<8x8xf32> -> vector<8x8xf32>
    %563 = tpu.concatenate %520, %534, %548, %562 in 1 : vector<8x8xf32>, vector<8x8xf32>, vector<8x8xf32>, vector<8x8xf32> -> vector<8x32xf32>
    %564 = vector.extract_strided_slice %504 {offsets = [8, 0], sizes = [8, 8], strides = [1, 1]} : vector<16x32xf32> to vector<8x8xf32>
    %565 = vector.extract_strided_slice %505 {offsets = [8, 0], sizes = [8, 8], strides = [1, 1]} : vector<16x32xf32> to vector<8x8xf32>
    %cst_167 = arith.constant dense<0.000000e+00> : vector<8x8xf32>
    %566 = tpu.matmul %564, %565, %cst_167 {dimension_numbers = #tpu.dot_dimension_numbers<[1], [1], [0], [0], [0, 0, 1, 0], [], []>} : vector<8x8xf32>, vector<8x8xf32>, vector<8x8xf32> -> vector<8x8xf32>
    %cst_168 = arith.constant dense<0xFF800000> : vector<8xf32>
    %567 = vector.multi_reduction <maximumf>, %566, %cst_168 [1] : vector<8x8xf32> to vector<8xf32>
    %568 = vector.shape_cast %567 : vector<8xf32> to vector<8x1xf32>
    %569 = vector.broadcast %568 : vector<8x1xf32> to vector<8x8xf32>
    %570 = arith.subf %566, %569 : vector<8x8xf32>
    %571 = math.exp %570 : vector<8x8xf32>
    %cst_169 = arith.constant dense<0.000000e+00> : vector<8xf32>
    %572 = vector.multi_reduction <add>, %571, %cst_169 [1] : vector<8x8xf32> to vector<8xf32>
    %573 = vector.shape_cast %572 : vector<8xf32> to vector<8x1xf32>
    %574 = vector.broadcast %573 : vector<8x1xf32> to vector<8x8xf32>
    %575 = arith.divf %571, %574 : vector<8x8xf32>
    %576 = vector.extract_strided_slice %506 {offsets = [8, 0], sizes = [8, 8], strides = [1, 1]} : vector<16x32xf32> to vector<8x8xf32>
    %cst_170 = arith.constant dense<0.000000e+00> : vector<8x8xf32>
    %577 = tpu.matmul %575, %576, %cst_170 {dimension_numbers = #tpu.dot_dimension_numbers<[1], [0], [0], [1], [0, 0, 1, 1], [], []>} : vector<8x8xf32>, vector<8x8xf32>, vector<8x8xf32> -> vector<8x8xf32>
    %578 = vector.extract_strided_slice %504 {offsets = [8, 8], sizes = [8, 8], strides = [1, 1]} : vector<16x32xf32> to vector<8x8xf32>
    %579 = vector.extract_strided_slice %505 {offsets = [8, 8], sizes = [8, 8], strides = [1, 1]} : vector<16x32xf32> to vector<8x8xf32>
    %cst_171 = arith.constant dense<0.000000e+00> : vector<8x8xf32>
    %580 = tpu.matmul %578, %579, %cst_171 {dimension_numbers = #tpu.dot_dimension_numbers<[1], [1], [0], [0], [0, 0, 1, 0], [], []>} : vector<8x8xf32>, vector<8x8xf32>, vector<8x8xf32> -> vector<8x8xf32>
    %cst_172 = arith.constant dense<0xFF800000> : vector<8xf32>
    %581 = vector.multi_reduction <maximumf>, %580, %cst_172 [1] : vector<8x8xf32> to vector<8xf32>
    %582 = vector.shape_cast %581 : vector<8xf32> to vector<8x1xf32>
    %583 = vector.broadcast %582 : vector<8x1xf32> to vector<8x8xf32>
    %584 = arith.subf %580, %583 : vector<8x8xf32>
    %585 = math.exp %584 : vector<8x8xf32>
    %cst_173 = arith.constant dense<0.000000e+00> : vector<8xf32>
    %586 = vector.multi_reduction <add>, %585, %cst_173 [1] : vector<8x8xf32> to vector<8xf32>
    %587 = vector.shape_cast %586 : vector<8xf32> to vector<8x1xf32>
    %588 = vector.broadcast %587 : vector<8x1xf32> to vector<8x8xf32>
    %589 = arith.divf %585, %588 : vector<8x8xf32>
    %590 = vector.extract_strided_slice %506 {offsets = [8, 8], sizes = [8, 8], strides = [1, 1]} : vector<16x32xf32> to vector<8x8xf32>
    %cst_174 = arith.constant dense<0.000000e+00> : vector<8x8xf32>
    %591 = tpu.matmul %589, %590, %cst_174 {dimension_numbers = #tpu.dot_dimension_numbers<[1], [0], [0], [1], [0, 0, 1, 1], [], []>} : vector<8x8xf32>, vector<8x8xf32>, vector<8x8xf32> -> vector<8x8xf32>
    %592 = vector.extract_strided_slice %504 {offsets = [8, 16], sizes = [8, 8], strides = [1, 1]} : vector<16x32xf32> to vector<8x8xf32>
    %593 = vector.extract_strided_slice %505 {offsets = [8, 16], sizes = [8, 8], strides = [1, 1]} : vector<16x32xf32> to vector<8x8xf32>
    %cst_175 = arith.constant dense<0.000000e+00> : vector<8x8xf32>
    %594 = tpu.matmul %592, %593, %cst_175 {dimension_numbers = #tpu.dot_dimension_numbers<[1], [1], [0], [0], [0, 0, 1, 0], [], []>} : vector<8x8xf32>, vector<8x8xf32>, vector<8x8xf32> -> vector<8x8xf32>
    %cst_176 = arith.constant dense<0xFF800000> : vector<8xf32>
    %595 = vector.multi_reduction <maximumf>, %594, %cst_176 [1] : vector<8x8xf32> to vector<8xf32>
    %596 = vector.shape_cast %595 : vector<8xf32> to vector<8x1xf32>
    %597 = vector.broadcast %596 : vector<8x1xf32> to vector<8x8xf32>
    %598 = arith.subf %594, %597 : vector<8x8xf32>
    %599 = math.exp %598 : vector<8x8xf32>
    %cst_177 = arith.constant dense<0.000000e+00> : vector<8xf32>
    %600 = vector.multi_reduction <add>, %599, %cst_177 [1] : vector<8x8xf32> to vector<8xf32>
    %601 = vector.shape_cast %600 : vector<8xf32> to vector<8x1xf32>
    %602 = vector.broadcast %601 : vector<8x1xf32> to vector<8x8xf32>
    %603 = arith.divf %599, %602 : vector<8x8xf32>
    %604 = vector.extract_strided_slice %506 {offsets = [8, 16], sizes = [8, 8], strides = [1, 1]} : vector<16x32xf32> to vector<8x8xf32>
    %cst_178 = arith.constant dense<0.000000e+00> : vector<8x8xf32>
    %605 = tpu.matmul %603, %604, %cst_178 {dimension_numbers = #tpu.dot_dimension_numbers<[1], [0], [0], [1], [0, 0, 1, 1], [], []>} : vector<8x8xf32>, vector<8x8xf32>, vector<8x8xf32> -> vector<8x8xf32>
    %606 = vector.extract_strided_slice %504 {offsets = [8, 24], sizes = [8, 8], strides = [1, 1]} : vector<16x32xf32> to vector<8x8xf32>
    %607 = vector.extract_strided_slice %505 {offsets = [8, 24], sizes = [8, 8], strides = [1, 1]} : vector<16x32xf32> to vector<8x8xf32>
    %cst_179 = arith.constant dense<0.000000e+00> : vector<8x8xf32>
    %608 = tpu.matmul %606, %607, %cst_179 {dimension_numbers = #tpu.dot_dimension_numbers<[1], [1], [0], [0], [0, 0, 1, 0], [], []>} : vector<8x8xf32>, vector<8x8xf32>, vector<8x8xf32> -> vector<8x8xf32>
    %cst_180 = arith.constant dense<0xFF800000> : vector<8xf32>
    %609 = vector.multi_reduction <maximumf>, %608, %cst_180 [1] : vector<8x8xf32> to vector<8xf32>
    %610 = vector.shape_cast %609 : vector<8xf32> to vector<8x1xf32>
    %611 = vector.broadcast %610 : vector<8x1xf32> to vector<8x8xf32>
    %612 = arith.subf %608, %611 : vector<8x8xf32>
    %613 = math.exp %612 : vector<8x8xf32>
    %cst_181 = arith.constant dense<0.000000e+00> : vector<8xf32>
    %614 = vector.multi_reduction <add>, %613, %cst_181 [1] : vector<8x8xf32> to vector<8xf32>
    %615 = vector.shape_cast %614 : vector<8xf32> to vector<8x1xf32>
    %616 = vector.broadcast %615 : vector<8x1xf32> to vector<8x8xf32>
    %617 = arith.divf %613, %616 : vector<8x8xf32>
    %618 = vector.extract_strided_slice %506 {offsets = [8, 24], sizes = [8, 8], strides = [1, 1]} : vector<16x32xf32> to vector<8x8xf32>
    %cst_182 = arith.constant dense<0.000000e+00> : vector<8x8xf32>
    %619 = tpu.matmul %617, %618, %cst_182 {dimension_numbers = #tpu.dot_dimension_numbers<[1], [0], [0], [1], [0, 0, 1, 1], [], []>} : vector<8x8xf32>, vector<8x8xf32>, vector<8x8xf32> -> vector<8x8xf32>
    %620 = tpu.concatenate %577, %591, %605, %619 in 1 : vector<8x8xf32>, vector<8x8xf32>, vector<8x8xf32>, vector<8x8xf32> -> vector<8x32xf32>
    %621 = tpu.concatenate %563, %620 in 0 : vector<8x32xf32>, vector<8x32xf32> -> vector<16x32xf32>
    %cst_183 = arith.constant dense<0.000000e+00> : vector<16x32xf32>
    %622 = tpu.matmul %621, %5, %cst_183 {dimension_numbers = #tpu.dot_dimension_numbers<[1], [0], [0], [1], [0, 0, 1, 1], [], []>} : vector<16x32xf32>, vector<32x32xf32>, vector<16x32xf32> -> vector<16x32xf32>
    %623 = vector.broadcast %6 : vector<1x32xf32> to vector<16x32xf32>
    %624 = arith.addf %622, %623 : vector<16x32xf32>
    %625 = arith.addf %458, %624 : vector<16x32xf32>
    %cst_184 = arith.constant dense<0.000000e+00> : vector<16xf32>
    %626 = vector.multi_reduction <add>, %625, %cst_184 [1] : vector<16x32xf32> to vector<16xf32>
    %627 = vector.shape_cast %626 : vector<16xf32> to vector<16x1xf32>
    %cst_185 = arith.constant 3.200000e+01 : f32
    %628 = vector.broadcast %cst_185 : f32 to vector<16x1xf32>
    %629 = arith.divf %627, %628 : vector<16x1xf32>
    %630 = vector.broadcast %629 : vector<16x1xf32> to vector<16x32xf32>
    %631 = arith.subf %625, %630 : vector<16x32xf32>
    %632 = arith.mulf %631, %631 : vector<16x32xf32>
    %cst_186 = arith.constant dense<0.000000e+00> : vector<16xf32>
    %633 = vector.multi_reduction <add>, %632, %cst_186 [1] : vector<16x32xf32> to vector<16xf32>
    %634 = vector.shape_cast %633 : vector<16xf32> to vector<16x1xf32>
    %cst_187 = arith.constant 3.200000e+01 : f32
    %635 = vector.broadcast %cst_187 : f32 to vector<16x1xf32>
    %636 = arith.divf %634, %635 : vector<16x1xf32>
    %637 = vector.broadcast %629 : vector<16x1xf32> to vector<16x32xf32>
    %638 = arith.subf %625, %637 : vector<16x32xf32>
    %cst_188 = arith.constant 9.99999974E-6 : f32
    %639 = vector.broadcast %cst_188 : f32 to vector<16x1xf32>
    %640 = arith.addf %636, %639 : vector<16x1xf32>
    %641 = math.rsqrt %640 : vector<16x1xf32>
    %642 = vector.broadcast %641 : vector<16x1xf32> to vector<16x32xf32>
    %643 = arith.mulf %638, %642 : vector<16x32xf32>
    %644 = vector.broadcast %7 : vector<1x32xf32> to vector<16x32xf32>
    %645 = arith.mulf %643, %644 : vector<16x32xf32>
    %646 = vector.broadcast %8 : vector<1x32xf32> to vector<16x32xf32>
    %647 = arith.addf %645, %646 : vector<16x32xf32>
    %cst_189 = arith.constant dense<0.000000e+00> : vector<16x64xf32>
    %648 = tpu.matmul %647, %9, %cst_189 {dimension_numbers = #tpu.dot_dimension_numbers<[1], [0], [0], [1], [0, 0, 1, 1], [], []>} : vector<16x32xf32>, vector<32x64xf32>, vector<16x64xf32> -> vector<16x64xf32>
    %649 = vector.broadcast %10 : vector<1x64xf32> to vector<16x64xf32>
    %650 = arith.addf %648, %649 : vector<16x64xf32>
    %cst_190 = arith.constant 0.000000e+00 : f32
    %651 = vector.broadcast %cst_190 : f32 to vector<16x64xf32>
    %652 = arith.maximumf %650, %651 : vector<16x64xf32>
    %cst_191 = arith.constant dense<0.000000e+00> : vector<16x32xf32>
    %653 = tpu.matmul %652, %11, %cst_191 {dimension_numbers = #tpu.dot_dimension_numbers<[1], [0], [0], [1], [0, 0, 1, 1], [], []>} : vector<16x64xf32>, vector<64x32xf32>, vector<16x32xf32> -> vector<16x32xf32>
    %654 = vector.broadcast %12 : vector<1x32xf32> to vector<16x32xf32>
    %655 = arith.addf %653, %654 : vector<16x32xf32>
    %656 = arith.addf %647, %655 : vector<16x32xf32>
    %cst_192 = arith.constant dense<0.000000e+00> : vector<16xf32>
    %657 = vector.multi_reduction <add>, %656, %cst_192 [1] : vector<16x32xf32> to vector<16xf32>
    %658 = vector.shape_cast %657 : vector<16xf32> to vector<16x1xf32>
    %cst_193 = arith.constant 3.200000e+01 : f32
    %659 = vector.broadcast %cst_193 : f32 to vector<16x1xf32>
    %660 = arith.divf %658, %659 : vector<16x1xf32>
    %661 = vector.broadcast %660 : vector<16x1xf32> to vector<16x32xf32>
    %662 = arith.subf %656, %661 : vector<16x32xf32>
    %663 = arith.mulf %662, %662 : vector<16x32xf32>
    %cst_194 = arith.constant dense<0.000000e+00> : vector<16xf32>
    %664 = vector.multi_reduction <add>, %663, %cst_194 [1] : vector<16x32xf32> to vector<16xf32>
    %665 = vector.shape_cast %664 : vector<16xf32> to vector<16x1xf32>
    %cst_195 = arith.constant 3.200000e+01 : f32
    %666 = vector.broadcast %cst_195 : f32 to vector<16x1xf32>
    %667 = arith.divf %665, %666 : vector<16x1xf32>
    %668 = vector.broadcast %660 : vector<16x1xf32> to vector<16x32xf32>
    %669 = arith.subf %656, %668 : vector<16x32xf32>
    %cst_196 = arith.constant 9.99999974E-6 : f32
    %670 = vector.broadcast %cst_196 : f32 to vector<16x1xf32>
    %671 = arith.addf %667, %670 : vector<16x1xf32>
    %672 = math.rsqrt %671 : vector<16x1xf32>
    %673 = vector.broadcast %672 : vector<16x1xf32> to vector<16x32xf32>
    %674 = arith.mulf %669, %673 : vector<16x32xf32>
    %675 = vector.broadcast %13 : vector<1x32xf32> to vector<16x32xf32>
    %676 = arith.mulf %674, %675 : vector<16x32xf32>
    %677 = vector.broadcast %14 : vector<1x32xf32> to vector<16x32xf32>
    %678 = arith.addf %676, %677 : vector<16x32xf32>
    %679 = vector.broadcast %503 : vector<16x1xf32> to vector<16x32xf32>
    %680 = arith.mulf %678, %679 : vector<16x32xf32>
    %cst_197 = arith.constant 1.000000e+00 : f32
    %681 = vector.broadcast %cst_197 : f32 to vector<16x1xf32>
    %682 = arith.subf %681, %503 : vector<16x1xf32>
    %683 = vector.broadcast %682 : vector<16x1xf32> to vector<16x32xf32>
    %684 = arith.mulf %465, %683 : vector<16x32xf32>
    %685 = arith.addf %680, %684 : vector<16x32xf32>
    %c0_198 = arith.constant 0 : index
    %c0_199 = arith.constant 0 : index
    %686 = vector.load %arg16[%c0_198, %c0_199] : memref<16x32xf32, #tpu.memory_space<vmem>>, vector<16x32xf32>
    tpu.vector_store %arg16[%c0_198, %c0_199], %685 {strides = array<i32>} : memref<16x32xf32, #tpu.memory_space<vmem>>, vector<16x32xf32>,
    %687 = tpu.concatenate %498, %500 in 1 : vector<16x1xf32>, vector<16x1xf32> -> vector<16x2xf32>
    %c0_200 = arith.constant 0 : index
    %c0_201 = arith.constant 0 : index
    %688 = vector.load %arg17[%c0_200, %c0_201] : memref<16x2xf32, #tpu.memory_space<vmem>>, vector<16x2xf32>
    tpu.vector_store %arg17[%c0_200, %c0_201], %687 {strides = array<i32>} : memref<16x2xf32, #tpu.memory_space<vmem>>, vector<16x2xf32>,
    return
  }
  func.func @transform_0(%arg0: i32) -> (i32, i32) {
    %c0_i32 = arith.constant 0 : i32
    %c0_i32_0 = arith.constant 0 : i32
    return %arg0, %c0_i32 : i32, i32
  }
  func.func @transform_1(%arg0: i32) -> (i32, i32) {
    %c0_i32 = arith.constant 0 : i32
    %c0_i32_0 = arith.constant 0 : i32
    %c0_i32_1 = arith.constant 0 : i32
    return %c0_i32, %c0_i32_0 : i32, i32
  }
  func.func @transform_2(%arg0: i32) -> (i32, i32) {
    %c0_i32 = arith.constant 0 : i32
    %c0_i32_0 = arith.constant 0 : i32
    %c0_i32_1 = arith.constant 0 : i32
    return %c0_i32, %c0_i32_0 : i32, i32
  }
  func.func @transform_3(%arg0: i32) -> (i32, i32) {
    %c0_i32 = arith.constant 0 : i32
    %c0_i32_0 = arith.constant 0 : i32
    %c0_i32_1 = arith.constant 0 : i32
    return %c0_i32, %c0_i32_0 : i32, i32
  }
  func.func @transform_4(%arg0: i32) -> (i32, i32) {
    %c0_i32 = arith.constant 0 : i32
    %c0_i32_0 = arith.constant 0 : i32
    %c0_i32_1 = arith.constant 0 : i32
    return %c0_i32, %c0_i32_0 : i32, i32
  }
  func.func @transform_5(%arg0: i32) -> (i32, i32) {
    %c0_i32 = arith.constant 0 : i32
    %c0_i32_0 = arith.constant 0 : i32
    %c0_i32_1 = arith.constant 0 : i32
    return %c0_i32, %c0_i32_0 : i32, i32
  }
  func.func @transform_6(%arg0: i32) -> (i32, i32) {
    %c0_i32 = arith.constant 0 : i32
    %c0_i32_0 = arith.constant 0 : i32
    %c0_i32_1 = arith.constant 0 : i32
    return %c0_i32, %c0_i32_0 : i32, i32
  }
  func.func @transform_7(%arg0: i32) -> (i32, i32) {
    %c0_i32 = arith.constant 0 : i32
    %c0_i32_0 = arith.constant 0 : i32
    %c0_i32_1 = arith.constant 0 : i32
    return %c0_i32, %c0_i32_0 : i32, i32
  }
  func.func @transform_8(%arg0: i32) -> (i32, i32) {
    %c0_i32 = arith.constant 0 : i32
    %c0_i32_0 = arith.constant 0 : i32
    %c0_i32_1 = arith.constant 0 : i32
    return %c0_i32, %c0_i32_0 : i32, i32
  }
  func.func @transform_9(%arg0: i32) -> (i32, i32) {
    %c0_i32 = arith.constant 0 : i32
    %c0_i32_0 = arith.constant 0 : i32
    %c0_i32_1 = arith.constant 0 : i32
    return %c0_i32, %c0_i32_0 : i32, i32
  }
  func.func @transform_10(%arg0: i32) -> (i32, i32) {
    %c0_i32 = arith.constant 0 : i32
    %c0_i32_0 = arith.constant 0 : i32
    %c0_i32_1 = arith.constant 0 : i32
    return %c0_i32, %c0_i32_0 : i32, i32
  }
  func.func @transform_11(%arg0: i32) -> (i32, i32) {
    %c0_i32 = arith.constant 0 : i32
    %c0_i32_0 = arith.constant 0 : i32
    %c0_i32_1 = arith.constant 0 : i32
    return %c0_i32, %c0_i32_0 : i32, i32
  }
  func.func @transform_12(%arg0: i32) -> (i32, i32) {
    %c0_i32 = arith.constant 0 : i32
    %c0_i32_0 = arith.constant 0 : i32
    %c0_i32_1 = arith.constant 0 : i32
    return %c0_i32, %c0_i32_0 : i32, i32
  }
  func.func @transform_13(%arg0: i32) -> (i32, i32) {
    %c0_i32 = arith.constant 0 : i32
    %c0_i32_0 = arith.constant 0 : i32
    %c0_i32_1 = arith.constant 0 : i32
    return %c0_i32, %c0_i32_0 : i32, i32
  }
  func.func @transform_14(%arg0: i32) -> (i32, i32) {
    %c0_i32 = arith.constant 0 : i32
    %c0_i32_0 = arith.constant 0 : i32
    %c0_i32_1 = arith.constant 0 : i32
    return %c0_i32, %c0_i32_0 : i32, i32
  }
  func.func @transform_15(%arg0: i32) -> (i32, i32) {
    %c0_i32 = arith.constant 0 : i32
    %c0_i32_0 = arith.constant 0 : i32
    return %arg0, %c0_i32 : i32, i32
  }
  func.func @transform_16(%arg0: i32) -> (i32, i32) {
    %c0_i32 = arith.constant 0 : i32
    %c0_i32_0 = arith.constant 0 : i32
    return %arg0, %c0_i32 : i32, i32
  }
}

</mosaic_0001>

<bundles_post_ra>
// kernel: tpu_custom_call.1
= control target key start
LH: loop header
LB: loop body
LE: loop exit
PB: predicated region body
PF: predicated region fallthrough
CT: control target
= control target key end

     0   :  { %s4771_s0 = inlined_call_operand.hbm [shape: f32[16,13], index: 0, kind: input, shape index: {}]   ;;  %s4772_s1 = inlined_call_operand.hbm [shape: f32[13,32], index: 1, kind: input, shape index: {}]   ;;  %s4773_s2 = inlined_call_operand.vmem [shape: f32[1,32], index: 2, kind: input, shape index: {}]   ;;  %s4774_s3 = inlined_call_operand.vmem [shape: f32[32,97], index: 3, kind: input, shape index: {}]   ;;  %s4775_s4 = inlined_call_operand.vmem [shape: f32[1,97], index: 4, kind: input, shape index: {}]   ;;  %s4776_s5 = inlined_call_operand.vmem [shape: f32[32,32], index: 5, kind: input, shape index: {}]   ;;  %s4777_s6 = inlined_call_operand.vmem [shape: f32[1,32], index: 6, kind: input, shape index: {}]   ;;  %s4778_s7 = inlined_call_operand.vmem [shape: f32[1,32], index: 7, kind: input, shape index: {}]   ;;  %s4779_s8 = inlined_call_operand.vmem [shape: f32[1,32], index: 8, kind: input, shape index: {}]   ;;  %s4780_s9 = inlined_call_operand.vmem [shape: f32[32,64], index: 9, kind: input, shape index: {}]   ;;  %s4781_s10 = inlined_call_operand.vmem [shape: f32[1,64], index: 10, kind: input, shape index: {}]   ;;  %s4782_s11 = inlined_call_operand.vmem [shape: f32[64,32], index: 11, kind: input, shape index: {}]   ;;  %s4783_s12 = inlined_call_operand.vmem [shape: f32[1,32], index: 12, kind: input, shape index: {}]   ;;  %s4784_s13 = inlined_call_operand.vmem [shape: f32[1,32], index: 13, kind: input, shape index: {}]   ;;  %s4785_s14 = inlined_call_operand.vmem [shape: f32[1,32], index: 14, kind: input, shape index: {}]   ;;  %s4786_s15 = inlined_call_operand.hbm [shape: f32[16,32], index: 15, kind: output, shape index: {0}]   ;;  %s4787_s16 = inlined_call_operand.vmem [shape: f32[16,2], index: 16, kind: output, shape index: {1}]  }
   0x1   :  { %4811 = sst [smem:[#allocation11_spill]] %s4771_s0 }
   0x2   :  { %22 = vsyncpa [#allocation3], 0 }
   0x3   :  { %23 = vsyncpa [#allocation6], 0 }
   0x4   :  { %24 = vsyncpa [#allocation4], 0  ;;  %s4812_s23 = sld [smem:[#allocation11_spill]]  ;;  %s3594_s25 = smov [#allocation2]  }
   0x5   :  { %s31_s26 = sshll.u32 %s3594_s25, 4  ;;  %s42_s29 = sshll.u32 %s4772_s1, 4  ;;  %s32_s26 = int_to_ptr.vmem [resolvable:$true] %s31_s26  ;;  %s43_s29 = int_to_ptr.hbm [resolvable:$true] %s42_s29 }
   0x6   :  { %s4788_s30 = smov 128   ;;  %s4791_s0 = smov 8  }
   0x7   :  { %s3597_s17 = smov [#allocation5]  }
   0x8   :  { %s44_s18 = sshll.u32 %s3597_s17, 4  ;;  %s45_s18 = int_to_ptr.vmem [resolvable:$true] %s44_s18 }
   0x9   :  { %50 = dma.hbm_to_vmem [thread:$0]  %s43_s29, 256, %s45_s18, [#allocation6], %s4788_s30, %s4788_s30, %s4791_s0  }
   0xa   :  { %s29_s24 = sshll.u32 %s4812_s23, 4  ;;  %s30_s24 = int_to_ptr.hbm [resolvable:$true] %s29_s24 }
   0xb   :  { %37 = dma.hbm_to_vmem [thread:$0]  %s30_s24, 256, %s32_s26, [#allocation3], %s4788_s30, %s4788_s30, %s4791_s0  }
   0xc   :  { %3588 = dma.done.wait [#allocation3], 256  }
   0xd   :  { %3589 = vsyncadd [#allocation3], 4294967040 }
   0xe   :  { %3590 = dma.done.wait [#allocation6], 256  }
   0xf   :  { %3591 = vsyncadd [#allocation6], 4294967040  ;;  %vm128_vm0 = vcmask 1044480   ;;  %v88_v0 = vld [vmem:[#allocation5 + $0x8] sm:$0x1f]  ;;  %v87_v1 = vld [vmem:[#allocation5] sm:$0xff] }
  0x10   :  { %v85_v2 = vld [vmem:[#allocation2] sm:$0xff]  ;;  %3180 = vmatpush.msk.msra.mxu0 %vm128_vm0, %v88_v0  ;;  %vm121_vm1 = vcmask 105472   ;;  %v3717_v3 = vld [vmem:[%s4774_s3 + $0x18] sm:$0xff]  ;;  %v3722_v4 = vld [vmem:[%s4774_s3 + $0x10] sm:$0xff]  ;;  %vm158_vm2 = vcmask 261120   ;;  %s4803_s17 = smov 120  }
  0x11   :  { %177 = vmatpush.msra.mxu1 %v3717_v3  ;;  %v3730_v5 = vld [vmem:[%s4774_s3 + $0x8] sm:$0xff]  ;;  %v3736_v6 = vld [vmem:[%s4774_s3] sm:$0xff]  ;;  %s4809_s18 = smov 88   ;;  %v3601_v28 = vmov 0.0   ;;  %vm272_vm9 = vcmask 64512   ;;  %s4805_s1 = smov 72  }
  0x12   :  { %147 = vmatpush.msra.mxu0 %v87_v1  ;;  %v3321_v7 = vld [vmem:[%s4773_s2] ss:$0 sm:$0xff]  ;;  %v86_v10 = vld [vmem:[#allocation2 + $0x8] sm:$0xff]  ;;  %s3599_s2 = smov 96   ;;  %s4801_s19 = smov 64  }
  0x13   :  { %3181 = vmatmul.msk.f32.vlgmr.msra.gmra.mxu0 %vm121_vm1, %v85_v2  ;;  %178 = vmatpush.msra.mxu1 %v3722_v4  ;;  %v3322_v11 = vld [vmem:[%s4775_s4] ss:$0 sm:$0xff]  ;;  %s4793_s20 = smov 56   ;;  %s4807_s21 = smov 80  }
  0x14   :  { %s4789_s22 = smov 104   ;;  %s4799_s23 = smov 112  }
  0x15   :  { %179 = vmatpush.msra.mxu1 %v3730_v5  ;;  %s4795_s24 = smov 40   ;;  %s4797_s25 = smov 48  }
  0x16   :  { %s3610_s26 = smov 16   ;;  %s3611_s27 = smov 24  }
  0x17   :  { %180 = vmatpush.msra.mxu1 %v3736_v6  ;;  %s4813_s28 = smov 48   ;;  %s4814_s29 = smov 104  }
  0x18   :  { %s4815_s30 = smov 40  }
  0x1b   :  { %3182 = vmatmul.msk.f32.gmra.mxu0 %vm121_vm1, %v86_v10 }
  0x90   :  { %v149_v8 = vpop.f32.mrf.mxu0 }
  0x91   :  { %v3742_v9 = vadd.f32 %v3321_v7, %v149_v8 }
  0x93   :  { %3183 = vmatmul.msk.f32.vlgmr.msra.gmra.mxu1 %vm158_vm2, %v3742_v9 }
  0x98   :  { %v152_v32 = vpop.f32.mrf.mxu0 }
  0x99   :  { %v3773_v33 = vadd.f32 %v3321_v7, %v152_v32 }
  0x9b   :  { %3184 = vmatmul.msk.f32.gmra.mxu1 %vm158_vm2, %v3773_v33 }
 0x110   :  { %v182_v12 = vpop.f32.mrf.mxu1 }
 0x111   :  { %v3750_v13 = vadd.f32 %v3322_v11, %v182_v12 }
 0x113   :  { %347 = vrot.lane.b32.xlu1 %v3750_v13, %s4803_s17  ;;  %270 = vrot.lane.b32.xlu0 %v3750_v13, %s3599_s2  ;;  %v188_v14 = vsub.f32 0.0, %v3750_v13 }
 0x115   :  { %v190_v15 = vmul.f32 1.442695, %v188_v14 }
 0x117   :  { %3330 = vpow2.f32 %v190_v15 }
 0x118   :  { %v185_v41 = vpop.f32.mrf.mxu1 }
 0x119   :  { %v3792_v42 = vadd.f32 %v3322_v11, %v185_v41 }
 0x11b   :  { %349 = vrot.lane.b32.xlu0 %v3750_v13, %s4809_s18  ;;  %v189_v43 = vsub.f32 0.0, %v3792_v42 }
 0x11d   :  { %v3331_v16 = vpop.eup %3330  ;;  %v192_v44 = vmul.f32 1.442695, %v189_v43 }
 0x11e   :  { %v194_v17 = vadd.f32 1.0, %v3331_v16 }
 0x120   :  { %3332 = vrcp.f32 %v194_v17  ;;  %v207_v21 = vand.u32 2147483648, %v194_v17  ;;  %v205_v23 = vand.u32 2147483647, %v194_v17  ;;  %vm201_vm4 = vweird.f32 %v194_v17 }
 0x121   :  { %3334 = vpow2.f32 %v192_v44 }
 0x122   :  { %v208_v25 = vor.u32 1.1754944e-38, %v207_v21  ;;  %vm206_vm6 = vcmp.eq.f32.partialorder %v205_v23, 8.507059e+37 }
 0x126   :  { %v3333_v18 = vpop.eup %3332 }
 0x127   :  { %v197_v19 = vmul.f32 %v3333_v18, %v194_v17  ;;  %vm202_vm3 = vweird.f32 %v3333_v18  ;;  %v3335_v45 = vpop.eup %3334 }
 0x128   :  { %vm203_vm5 = vmor %vm201_vm4, %vm202_vm3  ;;  %v195_v46 = vadd.f32 1.0, %v3335_v45 }
 0x129   :  { %v198_v20 = vsub.f32 1.0, %v197_v19 }
 0x12a   :  { %3336 = vrcp.f32 %v195_v46  ;;  %v222_v51 = vand.u32 2147483648, %v195_v46  ;;  %vm216_vm10 = vweird.f32 %v195_v46  ;;  %v220_v53 = vand.u32 2147483647, %v195_v46 }
 0x12b   :  { %v199_v22 = vmul.f32 %v3333_v18, %v198_v20 }
 0x12c   :  { %v223_v54 = vor.u32 1.1754944e-38, %v222_v51  ;;  %vm221_vm13 = vcmp.eq.f32.partialorder %v220_v53, 8.507059e+37 }
 0x12d   :  { %v200_v24 = vadd.f32 %v3333_v18, %v199_v22 }
 0x12f   :  { %v204_v26 = vsel %vm203_vm5, %v3333_v18, %v200_v24 }
 0x130   :  { %v3759_v27 = vsel %vm206_vm6, %v208_v25, %v204_v26  ;;  %v3337_v47 = vpop.eup %3336 }
 0x131   :  { %vm233_vm7 = vcmp.gt.f32.partialorder %v3759_v27, 0.9  ;;  %vm241_vm8 = vcmp.le.f32.partialorder %v3759_v27, 0.9  ;;  %v212_v48 = vmul.f32 %v3337_v47, %v195_v46  ;;  %vm217_vm11 = vweird.f32 %v3337_v47 }
 0x132   :  { %v3764_v29 = vsel %vm233_vm7, 1.0, %v3601_v28  ;;  %v3767_v30 = vsel %vm241_vm8, 1.0, %v3601_v28  ;;  %vm218_vm12 = vmor %vm216_vm10, %vm217_vm11 }
 0x133   :  { %v3771_v31 = vadd.f32 %v3767_v30, %v3764_v29  ;;  %v213_v49 = vsub.f32 1.0, %v212_v48 }
 0x135   :  { %v214_v50 = vmul.f32 %v3337_v47, %v213_v49 }
 0x137   :  { %v215_v52 = vadd.f32 %v3337_v47, %v214_v50 }
 0x139   :  { %v219_v55 = vsel %vm218_vm12, %v3337_v47, %v215_v52 }
 0x13a   :  { %v3795_v56 = vsel %vm221_vm13, %v223_v54, %v219_v55 }
 0x13b   :  { %vm234_vm14 = vcmp.gt.f32.partialorder %v3795_v56, 0.9  ;;  %vm242_vm15 = vcmp.le.f32.partialorder %v3795_v56, 0.9 }
 0x13c   :  { %v3800_v57 = vsel %vm234_vm14, 1.0, %v3601_v28  ;;  %v3803_v58 = vsel %vm242_vm15, 1.0, %v3601_v28 }
 0x13d   :  { %v3807_v59 = vadd.f32 %v3803_v58, %v3800_v57 }
 0x185   :  { %v271_v34 = vpop.permute.xlu0 %270  ;;  %v348_v36 = vpop.permute.xlu1 %347 }
 0x186   :  { %3189 = vmatpush.xpose.msk.msra.mxu2 %vm272_vm9, %v271_v34 }
 0x189   :  { %3190 = vmatmul.msk.f32.vlgmr.msra.gmra.mxu2 %vm272_vm9, %v3750_v13 }
 0x18d   :  { %v350_v35 = vpop.permute.xlu0 %349 }
 0x18e   :  { %3192 = vmatpush.xpose.msk.msrb.mxu0 %vm272_vm9, %v350_v35 }
 0x191   :  { %3193 = vmatmul.msk.f32.vlgmr.msrb.gmra.mxu0 %vm272_vm9, %v348_v36 }
 0x20c   :  { %v294_v37 = vpop.f32.mrf.mxu2 }
 0x20d   :  { %v297_v38 = vsel %vm272_vm9, %v294_v37, -inf }
 0x20e   :  { %298 = vmax.xlane.f32.xlu1 %v297_v38  ;;  %v372_v39 = vpop.f32.mrf.mxu0 }
 0x20f   :  { %v375_v40 = vsel %vm272_vm9, %v372_v39, -inf }
 0x210   :  { %376 = vmax.xlane.f32.xlu2 %v375_v40 }
 0x227   :  { %505 = vrot.lane.b32.xlu1 %v3750_v13, %s4805_s1 }
 0x228   :  { %321 = vrot.lane.b32.xlu2 %v3750_v13, %s4801_s19 }
 0x230   :  { %399 = vrot.lane.b32.xlu2 %v3750_v13, %s4793_s20 }
 0x238   :  { %427 = vrot.lane.b32.xlu2 %v3750_v13, %s4807_s21 }
 0x281   :  { %v299_v60 = vpop.xlane.xlu1 %298 }
 0x282   :  { %v300_v61 = vsub.f32 %v294_v37, %v299_v60 }
 0x283   :  { %v377_v62 = vpop.xlane.xlu2 %376 }
 0x284   :  { %v301_v63 = vmul.f32 1.442695, %v300_v61  ;;  %v378_v0 = vsub.f32 %v372_v39, %v377_v62 }
 0x286   :  { %3338 = vpow2.f32 %v301_v63  ;;  %v379_v1 = vmul.f32 1.442695, %v378_v0 }
 0x288   :  { %3340 = vpow2.f32 %v379_v1 }
 0x28b   :  { %v322_v2 = vpop.permute.xlu2 %321 }
 0x28c   :  { %v3339_v7 = vpop.eup %3338  ;;  %342 = vmatpush.msra.mxu3 %v322_v2 }
 0x28d   :  { %v303_v8 = vsel %vm272_vm9, %v3339_v7, 0.0 }
 0x28e   :  { %v3341_v10 = vpop.eup %3340  ;;  %304 = vadd.xlane.f32.xlu2 %v303_v8 }
 0x28f   :  { %v381_v11 = vsel %vm272_vm9, %v3341_v10, 0.0 }
 0x290   :  { %382 = vadd.xlane.f32.xlu0 %v381_v11 }
 0x293   :  { %v400_v12 = vpop.permute.xlu2 %399 }
 0x294   :  { %420 = vmatpush.msrb.mxu2 %v400_v12 }
 0x299   :  { %v506_v14 = vpop.permute.xlu1 %505 }
 0x29a   :  { %3198 = vmatpush.xpose.msk.msra.mxu2 %vm272_vm9, %v506_v14 }
 0x29b   :  { %v428_v15 = vpop.permute.xlu2 %427 }
 0x29c   :  { %3195 = vmatpush.xpose.msk.msrb.mxu3 %vm272_vm9, %v428_v15 }
 0x2a4   :  { %503 = vrot.lane.b32.xlu0 %v3750_v13, %s4789_s22 }
 0x2a6   :  { %425 = vrot.lane.b32.xlu2 %v3750_v13, %s4799_s23 }
 0x301   :  { %v305_v16 = vpop.xlane.xlu2 %304 }
 0x302   :  { %3342 = vrcp.f32 %v305_v16  ;;  %v317_v23 = vand.u32 2147483648, %v305_v16  ;;  %v315_v26 = vand.u32 2147483647, %v305_v16  ;;  %vm311_vm1 = vweird.f32 %v305_v16 }
 0x303   :  { %v383_v17 = vpop.xlane.xlu0 %382 }
 0x304   :  { %3344 = vrcp.f32 %v383_v17  ;;  %v395_v32 = vand.u32 2147483648, %v383_v17  ;;  %v393_v36 = vand.u32 2147483647, %v383_v17  ;;  %v318_v37 = vor.u32 1.1754944e-38, %v317_v23 }
 0x305   :  { %vm389_vm5 = vweird.f32 %v383_v17  ;;  %vm316_vm6 = vcmp.eq.f32.partialorder %v315_v26, 8.507059e+37 }
 0x306   :  { %v396_v40 = vor.u32 1.1754944e-38, %v395_v32  ;;  %vm394_vm8 = vcmp.eq.f32.partialorder %v393_v36, 8.507059e+37 }
 0x308   :  { %v3343_v18 = vpop.eup %3342 }
 0x309   :  { %v307_v19 = vmul.f32 %v3343_v18, %v305_v16  ;;  %vm312_vm0 = vweird.f32 %v3343_v18  ;;  %v426_v47 = vpop.permute.xlu2 %425 }
 0x30a   :  { %v3345_v20 = vpop.eup %3344  ;;  %vm313_vm4 = vmor %vm311_vm1, %vm312_vm0 }
 0x30b   :  { %v308_v21 = vsub.f32 1.0, %v307_v19  ;;  %v385_v22 = vmul.f32 %v3345_v20, %v383_v17  ;;  %vm390_vm3 = vweird.f32 %v3345_v20 }
 0x30c   :  { %vm391_vm7 = vmor %vm389_vm5, %vm390_vm3  ;;  %vm594_vm3 = vcmask 130048  }
 0x30d   :  { %v386_v24 = vsub.f32 1.0, %v385_v22  ;;  %v309_v25 = vmul.f32 %v3343_v18, %v308_v21 }
 0x30f   :  { %v387_v34 = vmul.f32 %v3345_v20, %v386_v24  ;;  %v310_v35 = vadd.f32 %v3343_v18, %v309_v25 }
 0x311   :  { %v314_v38 = vsel %vm313_vm4, %v3343_v18, %v310_v35  ;;  %v388_v39 = vadd.f32 %v3345_v20, %v387_v34  ;;  %vm596_vm4 = vcmask 195584  }
 0x312   :  { %v319_v41 = vsel %vm316_vm6, %v318_v37, %v314_v38 }
 0x313   :  { %v320_v43 = vmul.f32 %v3339_v7, %v319_v41  ;;  %v392_v44 = vsel %vm391_vm7, %v3345_v20, %v388_v39 }
 0x314   :  { %v397_v45 = vsel %vm394_vm8, %v396_v40, %v392_v44 }
 0x315   :  { %3191 = vmatmul.msk.f32.vlgmr.msra.gmra.mxu3 %vm272_vm9, %v320_v43  ;;  %v398_v46 = vmul.f32 %v3341_v10, %v397_v45 }
 0x316   :  { %v504_v48 = vpop.permute.xlu0 %503 }
 0x317   :  { %3194 = vmatmul.msk.f32.vlgmr.msrb.gmra.mxu2 %vm272_vm9, %v398_v46 }
 0x31d   :  { %3196 = vmatmul.msk.f32.vlgmr.msrb.gmra.mxu3 %vm272_vm9, %v426_v47 }
 0x31f   :  { %3199 = vmatmul.msk.f32.vlgmr.msra.gmra.mxu2 %vm272_vm9, %v504_v48 }
 0x398   :  { %v3821_v49 = vpop.f32.mrf.mxu3 }
 0x39a   :  { %v422_v50 = vpop.f32.mrf.mxu2 }
 0x3a0   :  { %v450_v51 = vpop.f32.mrf.mxu3 }
 0x3a1   :  { %v453_v52 = vsel %vm272_vm9, %v450_v51, -inf }
 0x3a2   :  { %v528_v53 = vpop.f32.mrf.mxu2  ;;  %454 = vmax.xlane.f32.xlu2 %v453_v52 }
 0x3a3   :  { %v531_v54 = vsel %vm272_vm9, %v528_v53, -inf }
 0x3a4   :  { %532 = vmax.xlane.f32.xlu1 %v531_v54 }
 0x3bd   :  { %555 = vrot.lane.b32.xlu1 %v3750_v13, %s4795_s24 }
 0x3c5   :  { %755 = vrot.lane.b32.xlu1 %v3792_v42, %s4807_s21 }
 0x3cd   :  { %582 = vrot.lane.b32.xlu1 %v422_v50, %s4791_s0 }
 0x415   :  { %v455_v55 = vpop.xlane.xlu2 %454 }
 0x416   :  { %v456_v60 = vsub.f32 %v450_v51, %v455_v55  ;;  %v98_v55 = vld [vmem:[%s4776_s5 + $0x18] sm:$0xff] }
 0x417   :  { %v533_v61 = vpop.xlane.xlu1 %532 }
 0x418   :  { %v457_v62 = vmul.f32 1.442695, %v456_v60  ;;  %v534_v63 = vsub.f32 %v528_v53, %v533_v61  ;;  %v97_v60 = vld [vmem:[%s4776_s5 + $0x10] sm:$0xff] }
 0x41a   :  { %3346 = vpow2.f32 %v457_v62  ;;  %v535_v0 = vmul.f32 1.442695, %v534_v63 }
 0x41c   :  { %3348 = vpow2.f32 %v535_v0 }
 0x420   :  { %v3347_v1 = vpop.eup %3346 }
 0x421   :  { %v459_v2 = vsel %vm272_vm9, %v3347_v1, 0.0 }
 0x422   :  { %v3349_v7 = vpop.eup %3348  ;;  %460 = vadd.xlane.f32.xlu0 %v459_v2 }
 0x423   :  { %v537_v8 = vsel %vm272_vm9, %v3349_v7, 0.0 }
 0x424   :  { %538 = vadd.xlane.f32.xlu2 %v537_v8  ;;  %v95_v8 = vld [vmem:[%s4776_s5] sm:$0xff] }
 0x42f   :  { %v556_v10 = vpop.permute.xlu1 %555 }
 0x430   :  { %576 = vmatpush.msrb.mxu1 %v556_v10 }
 0x436   :  { %599 = vrot.lane.b32.xlu0 %v3792_v42, %s3599_s2 }
 0x437   :  { %v756_v44 = vpop.permute.xlu1 %755 }
 0x43c   :  { %477 = vrot.lane.b32.xlu2 %v3750_v13, %s4797_s25 }
 0x43e   :  { %675 = vrot.lane.b32.xlu0 %v3792_v42, %s4803_s17 }
 0x43f   :  { %v583_v10 = vpop.permute.xlu1 %582 }
 0x444   :  { %677 = vrot.lane.b32.xlu2 %v3792_v42, %s4809_s18 }
 0x446   :  { %833 = vrot.lane.b32.xlu0 %v3792_v42, %s4805_s1 }
 0x44c   :  { %753 = vrot.lane.b32.xlu2 %v3792_v42, %s4799_s23 }
 0x454   :  { %831 = vrot.lane.b32.xlu2 %v3792_v42, %s4789_s22  ;;  %s4816_s22 = smov 56  }
 0x495   :  { %v461_v11 = vpop.xlane.xlu0 %460 }
 0x496   :  { %3350 = vrcp.f32 %v461_v11  ;;  %v473_v19 = vand.u32 2147483648, %v461_v11  ;;  %v471_v21 = vand.u32 2147483647, %v461_v11  ;;  %vm467_vm11 = vweird.f32 %v461_v11 }
 0x497   :  { %v539_v12 = vpop.xlane.xlu2 %538 }
 0x498   :  { %3352 = vrcp.f32 %v539_v12  ;;  %v551_v23 = vand.u32 2147483648, %v539_v12  ;;  %v549_v26 = vand.u32 2147483647, %v539_v12  ;;  %v474_v32 = vor.u32 1.1754944e-38, %v473_v19 }
 0x499   :  { %vm472_vm14 = vcmp.eq.f32.partialorder %v471_v21, 8.507059e+37  ;;  %vm545_vm15 = vweird.f32 %v539_v12 }
 0x49a   :  { %v552_v36 = vor.u32 1.1754944e-38, %v551_v23  ;;  %vm550_vm1 = vcmp.eq.f32.partialorder %v549_v26, 8.507059e+37 }
 0x49c   :  { %v3351_v13 = vpop.eup %3350 }
 0x49d   :  { %v463_v14 = vmul.f32 %v3351_v13, %v461_v11  ;;  %vm468_vm10 = vweird.f32 %v3351_v13  ;;  %v593_v11 = vsel %vm272_vm9, %v3821_v49, %v583_v10 }
 0x49e   :  { %v3353_v15 = vpop.eup %3352  ;;  %vm469_vm13 = vmor %vm467_vm11, %vm468_vm10 }
 0x49f   :  { %v464_v16 = vsub.f32 1.0, %v463_v14  ;;  %v541_v17 = vmul.f32 %v3353_v15, %v539_v12  ;;  %v478_v18 = vpop.permute.xlu2 %477  ;;  %vm546_vm12 = vweird.f32 %v3353_v15 }
 0x4a0   :  { %498 = vmatpush.msra.mxu0 %v478_v18  ;;  %vm547_vm0 = vmor %vm545_vm15, %vm546_vm12 }
 0x4a1   :  { %v465_v20 = vmul.f32 %v3351_v13, %v464_v16  ;;  %v542_v22 = vsub.f32 1.0, %v541_v17 }
 0x4a3   :  { %v466_v24 = vadd.f32 %v3351_v13, %v465_v20  ;;  %v543_v25 = vmul.f32 %v3353_v15, %v542_v22 }
 0x4a5   :  { %v470_v34 = vsel %vm469_vm13, %v3351_v13, %v466_v24  ;;  %v544_v35 = vadd.f32 %v3353_v15, %v543_v25 }
 0x4a6   :  { %v475_v37 = vsel %vm472_vm14, %v474_v32, %v470_v34 }
 0x4a7   :  { %v678_v38 = vpop.permute.xlu2 %677  ;;  %v476_v39 = vmul.f32 %v3347_v1, %v475_v37  ;;  %v548_v40 = vsel %vm547_vm0, %v3353_v15, %v544_v35 }
 0x4a8   :  { %v600_v41 = vpop.permute.xlu0 %599  ;;  %3204 = vmatpush.xpose.msk.msrb.mxu2 %vm272_vm9, %v678_v38  ;;  %v553_v43 = vsel %vm550_vm1, %v552_v36, %v548_v40  ;;  %v3894_v38 = vld [vmem:[%s4777_s6] ss:$0 sm:$0xff] }
 0x4a9   :  { %3197 = vmatmul.msk.f32.vlgmr.msra.gmra.mxu0 %vm272_vm9, %v476_v39  ;;  %3201 = vmatpush.xpose.msk.msra.mxu3 %vm272_vm9, %v600_v41  ;;  %v554_v45 = vmul.f32 %v3349_v7, %v553_v43  ;;  %v96_v7 = vld [vmem:[%s4776_s5 + $0x8] sm:$0xff] }
 0x4ab   :  { %3200 = vmatmul.msk.f32.vlgmr.msrb.gmra.mxu1 %vm272_vm9, %v554_v45 }
 0x4ac   :  { %3202 = vmatmul.msk.f32.vlgmr.msra.gmra.mxu3 %vm272_vm9, %v3792_v42 }
 0x4ad   :  { %3207 = vmatpush.xpose.msk.msrb.mxu3 %vm272_vm9, %v756_v44 }
 0x4af   :  { %v754_v47 = vpop.permute.xlu2 %753 }
 0x4b0   :  { %v676_v46 = vpop.permute.xlu0 %675 }
 0x4b1   :  { %3205 = vmatmul.msk.f32.vlgmr.msrb.gmra.mxu2 %vm272_vm9, %v676_v46  ;;  %945 = vmatpush.msra.mxu3 %v98_v55 }
 0x4b3   :  { %946 = vmatpush.msra.mxu3 %v97_v60 }
 0x4b4   :  { %3208 = vmatmul.msk.f32.vlgmr.msrb.gmra.mxu3 %vm272_vm9, %v754_v47 }
 0x4b5   :  { %947 = vmatpush.msra.mxu3 %v96_v7 }
 0x4b7   :  { %v832_v50 = vpop.permute.xlu2 %831  ;;  %948 = vmatpush.msra.mxu3 %v95_v8 }
 0x4b8   :  { %v834_v48 = vpop.permute.xlu0 %833 }
 0x4b9   :  { %3210 = vmatpush.xpose.msk.msra.mxu2 %vm272_vm9, %v834_v48 }
 0x4bc   :  { %3211 = vmatmul.msk.f32.vlgmr.msra.gmra.mxu2 %vm272_vm9, %v832_v50 }
 0x526   :  { %v500_v51 = vpop.f32.mrf.mxu0 }
 0x527   :  { %586 = vrot.lane.b32.xlu0 %v500_v51, %s3610_s26 }
 0x528   :  { %v578_v52 = vpop.f32.mrf.mxu1 }
 0x529   :  { %590 = vrot.lane.b32.xlu1 %v578_v52, %s3611_s27 }
 0x52f   :  { %v622_v53 = vpop.f32.mrf.mxu3 }
 0x530   :  { %v625_v54 = vsel %vm272_vm9, %v622_v53, -inf }
 0x531   :  { %626 = vmax.xlane.f32.xlu2 %v625_v54 }
 0x534   :  { %v700_v61 = vpop.f32.mrf.mxu2 }
 0x535   :  { %v703_v1 = vsel %vm272_vm9, %v700_v61, -inf }
 0x537   :  { %v778_v0 = vpop.f32.mrf.mxu3 }
 0x538   :  { %v781_v2 = vsel %vm272_vm9, %v778_v0, -inf }
 0x53f   :  { %v856_v62 = vpop.f32.mrf.mxu2 }
 0x540   :  { %v859_v63 = vsel %vm272_vm9, %v856_v62, -inf }
 0x541   :  { %860 = vmax.xlane.f32.xlu2 %v859_v63 }
 0x551   :  { %704 = vmax.xlane.f32.xlu0 %v703_v1 }
 0x553   :  { %782 = vmax.xlane.f32.xlu1 %v781_v2  ;;  %v3612_v2 = vmov 32.0  }
 0x599   :  { %v587_v12 = vpop.permute.xlu0 %586 }
 0x59a   :  { %v595_v13 = vsel %vm594_vm3, %v593_v11, %v587_v12 }
 0x59b   :  { %v591_v14 = vpop.permute.xlu1 %590 }
 0x59c   :  { %v597_v15 = vsel %vm596_vm4, %v595_v13, %v591_v14 }
 0x59d   :  { %3213 = vmatmul.msk.f32.vlgmr.msra.gmra.mxu3 %vm158_vm2, %v597_v15 }
 0x5a4   :  { %v627_v16 = vpop.xlane.xlu2 %626 }
 0x5a5   :  { %v628_v17 = vsub.f32 %v622_v53, %v627_v16 }
 0x5a7   :  { %v629_v18 = vmul.f32 1.442695, %v628_v17 }
 0x5a9   :  { %3354 = vpow2.f32 %v629_v18 }
 0x5af   :  { %v3880_v19 = vpop.eup %3354 }
 0x5b0   :  { %v631_v20 = vsel %vm272_vm9, %v3880_v19, 0.0 }
 0x5b1   :  { %632 = vadd.xlane.f32.xlu1 %v631_v20 }
 0x5b4   :  { %v861_v49 = vpop.xlane.xlu2 %860 }
 0x5b5   :  { %v862_v21 = vsub.f32 %v856_v62, %v861_v49 }
 0x5b7   :  { %v863_v22 = vmul.f32 1.442695, %v862_v21 }
 0x5b9   :  { %3356 = vpow2.f32 %v863_v22 }
 0x5bf   :  { %v3884_v23 = vpop.eup %3356 }
 0x5c0   :  { %v865_v24 = vsel %vm272_vm9, %v3884_v23, 0.0 }
 0x5c1   :  { %866 = vadd.xlane.f32.xlu1 %v865_v24 }
 0x5c4   :  { %v705_v25 = vpop.xlane.xlu0 %704 }
 0x5c5   :  { %v706_v26 = vsub.f32 %v700_v61, %v705_v25 }
 0x5c6   :  { %v783_v36 = vpop.xlane.xlu1 %782 }
 0x5c7   :  { %v707_v32 = vmul.f32 1.442695, %v706_v26  ;;  %v784_v37 = vsub.f32 %v778_v0, %v783_v36 }
 0x5c9   :  { %3358 = vpow2.f32 %v707_v32  ;;  %v785_v40 = vmul.f32 1.442695, %v784_v37 }
 0x5cb   :  { %3360 = vpow2.f32 %v785_v40 }
 0x5cf   :  { %v3359_v34 = vpop.eup %3358 }
 0x5d0   :  { %v709_v35 = vsel %vm272_vm9, %v3359_v34, 0.0 }
 0x5d1   :  { %710 = vadd.xlane.f32.xlu2 %v709_v35  ;;  %v3899_v45 = vpop.eup %3360 }
 0x5d2   :  { %v787_v46 = vsel %vm272_vm9, %v3899_v45, 0.0 }
 0x5da   :  { %727 = vrot.lane.b32.xlu1 %v3792_v42, %s4793_s20  ;;  %s4822_s20 = smov 64  }
 0x620   :  { %v950_v39 = vpop.f32.mrf.mxu3 }
 0x621   :  { %v951_v41 = vadd.f32 %v3894_v38, %v950_v39 }
 0x623   :  { %v956_v43 = vadd.f32 %v951_v41, %v3742_v9 }
 0x624   :  { %v633_v47 = vpop.xlane.xlu1 %632 }
 0x625   :  { %v958_v44 = vsel %vm158_vm2, %v956_v43, 0.0  ;;  %vm639_vm12 = vweird.f32 %v633_v47  ;;  %v643_v35 = vand.u32 2147483647, %v633_v47 }
 0x626   :  { %959 = vadd.xlane.f32.xlu0 %v958_v44 }
 0x627   :  { %vm644_vm14 = vcmp.eq.f32.partialorder %v643_v35, 8.507059e+37  ;;  %v3984_v35 = vld [vmem:[%s4782_s11 + $0x20] sm:$0xff] }
 0x62e   :  { %788 = vadd.xlane.f32.xlu0 %v787_v46 }
 0x634   :  { %v3905_v48 = vpop.xlane.xlu1 %866 }
 0x635   :  { %v879_v44 = vand.u32 2147483648, %v3905_v48  ;;  %vm873_vm0 = vweird.f32 %v3905_v48  ;;  %v877_v46 = vand.u32 2147483647, %v3905_v48 }
 0x642   :  { %649 = vrot.lane.b32.xlu0 %v3792_v42, %s4801_s19 }
 0x644   :  { %v711_v50 = vpop.xlane.xlu2 %710 }
 0x645   :  { %3362 = vrcp.f32 %v711_v50  ;;  %v723_v54 = vand.u32 2147483648, %v711_v50  ;;  %v721_v60 = vand.u32 2147483647, %v711_v50  ;;  %vm717_vm6 = vweird.f32 %v711_v50 }
 0x646   :  { %3364 = vrcp.f32 %v3612_v2 }
 0x647   :  { %v724_v62 = vor.u32 1.1754944e-38, %v723_v54  ;;  %vm722_vm8 = vcmp.eq.f32.partialorder %v721_v60, 8.507059e+37  ;;  %3366 = vrcp.f32 %v633_v47 }
 0x648   :  { %3368 = vrcp.f32 %v3905_v48 }
 0x64a   :  { %883 = vrot.lane.b32.xlu0 %v3792_v42, %s4795_s24  ;;  %s4823_s24 = smov 112  }
 0x64b   :  { %v3363_v51 = vpop.eup %3362 }
 0x64c   :  { %v713_v9 = vmul.f32 %v3363_v51, %v711_v50  ;;  %v728_v52 = vpop.permute.xlu1 %727  ;;  %vm718_vm5 = vweird.f32 %v3363_v51  ;;  %v3365_v7 = vpop.eup %3364 }
 0x64d   :  { %748 = vmatpush.msra.mxu1 %v728_v52  ;;  %vm719_vm7 = vmor %vm717_vm6, %vm718_vm5  ;;  %v965_v8 = vmul.f32 32.0, %v3365_v7  ;;  %vm969_vm10 = vweird.f32 %v3365_v7  ;;  %v3367_v16 = vpop.eup %3366  ;;  %vm878_vm5 = vcmp.eq.f32.partialorder %v877_v46, 8.507059e+37 }
 0x64e   :  { %v714_v53 = vsub.f32 1.0, %v713_v9  ;;  %v635_v18 = vmul.f32 %v3367_v16, %v633_v47  ;;  %v3369_v22 = vpop.eup %3368  ;;  %vm640_vm11 = vweird.f32 %v3367_v16  ;;  %v880_v9 = vor.u32 1.1754944e-38, %v879_v44  ;;  %v4016_v44 = vld [vmem:[%s4781_s10] ss:$0 sm:$0xff] }
 0x64f   :  { %v966_v10 = vsub.f32 1.0, %v965_v8  ;;  %v869_v25 = vmul.f32 %v3369_v22, %v3905_v48  ;;  %vm641_vm13 = vmor %vm639_vm12, %vm640_vm11  ;;  %vm874_vm15 = vweird.f32 %v3369_v22  ;;  %v104_v8 = vld [vmem:[%s4780_s9 + $0x10] sm:$0xff] }
 0x650   :  { %v715_v55 = vmul.f32 %v3363_v51, %v714_v53  ;;  %v636_v21 = vsub.f32 1.0, %v635_v18  ;;  %vm875_vm1 = vmor %vm873_vm0, %vm874_vm15 }
 0x651   :  { %v967_v11 = vmul.f32 %v3365_v7, %v966_v10  ;;  %v870_v32 = vsub.f32 1.0, %v869_v25 }
 0x652   :  { %v716_v61 = vadd.f32 %v3363_v51, %v715_v55  ;;  %v637_v24 = vmul.f32 %v3367_v16, %v636_v21 }
 0x653   :  { %v968_v12 = vadd.f32 %v3365_v7, %v967_v11  ;;  %v871_v39 = vmul.f32 %v3369_v22, %v870_v32  ;;  %v3967_v32 = vld [vmem:[%s4782_s11 + $0x38] sm:$0xff] }
 0x654   :  { %v720_v63 = vsel %vm719_vm7, %v3363_v51, %v716_v61  ;;  %v638_v26 = vadd.f32 %v3367_v16, %v637_v24  ;;  %1071 = vmatpush.msrb.mxu2 %v3967_v32 }
 0x655   :  { %v725_v0 = vsel %vm722_vm8, %v724_v62, %v720_v63  ;;  %v3910_v13 = vsel %vm969_vm10, %v3365_v7, %v968_v12  ;;  %v105_v7 = vld [vmem:[%s4780_s9 + $0x18] sm:$0xff]  ;;  %v103_v12 = vld [vmem:[%s4780_s9 + $0x8] sm:$0xff] }
 0x656   :  { %v726_v1 = vmul.f32 %v3359_v34, %v725_v0  ;;  %v645_v34 = vand.u32 2147483648, %v633_v47  ;;  %v642_v37 = vsel %vm641_vm13, %v3367_v16, %v638_v26 }
 0x658   :  { %3206 = vmatmul.msk.f32.vlgmr.msra.gmra.mxu1 %vm272_vm9, %v726_v1  ;;  %v646_v40 = vor.u32 1.1754944e-38, %v645_v34  ;;  %v3978_v34 = vld [vmem:[%s4782_s11 + $0x28] sm:$0xff] }
 0x65a   :  { %v647_v41 = vsel %vm644_vm14, %v646_v40, %v642_v37  ;;  %v3997_v37 = vld [vmem:[%s4782_s11 + $0x10] sm:$0xff]  ;;  %v4009_v40 = vld [vmem:[%s4782_s11] sm:$0xff]  ;;  %vm1056_vm14 = vcmask 523264  }
 0x65b   :  { %v648_v51 = vmul.f32 %v3880_v19, %v647_v41 }
 0x699   :  { %v960_v14 = vpop.xlane.xlu0 %959 }
 0x69a   :  { %v971_v15 = vmul.f32 %v3910_v13, %v960_v14  ;;  %v102_v14 = vld [vmem:[%s4780_s9] sm:$0xff] }
 0x69c   :  { %v3913_v17 = vsub.f32 %v956_v43, %v971_v15  ;;  %v872_v43 = vadd.f32 %v3369_v22, %v871_v39  ;;  %v4003_v39 = vld [vmem:[%s4782_s11 + $0x8] sm:$0xff] }
 0x69e   :  { %v975_v20 = vmul.f32 %v3913_v17, %v3913_v17  ;;  %v876_v47 = vsel %vm875_vm1, %v3369_v22, %v872_v43  ;;  %v3958_v22 = vld [vmem:[%s4779_s8] ss:$0 sm:$0xff] }
 0x69f   :  { %v881_v52 = vsel %vm878_vm5, %v880_v9, %v876_v47 }
 0x6a0   :  { %v977_v49 = vsel %vm158_vm2, %v975_v20, 0.0  ;;  %v882_v54 = vmul.f32 %v3884_v23, %v881_v52  ;;  %v3952_v20 = vld [vmem:[%s4778_s7] ss:$0 sm:$0xff] }
 0x6a1   :  { %978 = vadd.xlane.f32.xlu2 %v977_v49  ;;  %v789_v36 = vpop.xlane.xlu0 %788 }
 0x6a2   :  { %3370 = vrcp.f32 %v789_v36  ;;  %v801_v61 = vand.u32 2147483648, %v789_v36  ;;  %vm795_vm7 = vweird.f32 %v789_v36  ;;  %v799_v62 = vand.u32 2147483647, %v789_v36 }
 0x6a4   :  { %v802_v63 = vor.u32 1.1754944e-38, %v801_v61  ;;  %vm800_vm10 = vcmp.eq.f32.partialorder %v799_v62, 8.507059e+37 }
 0x6a8   :  { %v3371_v48 = vpop.eup %3370 }
 0x6a9   :  { %vm796_vm6 = vweird.f32 %v3371_v48 }
 0x6aa   :  { %vm797_vm8 = vmor %vm795_vm7, %vm796_vm6 }
 0x6b4   :  { %v650_v50 = vpop.permute.xlu0 %649 }
 0x6b5   :  { %670 = vmatpush.msrb.mxu0 %v650_v50 }
 0x6b6   :  { %3203 = vmatmul.msk.f32.vlgmr.msrb.gmra.mxu0 %vm272_vm9, %v648_v51 }
 0x6b9   :  { %805 = vrot.lane.b32.xlu2 %v3792_v42, %s4797_s25  ;;  %v791_v42 = vmul.f32 %v3371_v48, %v789_v36  ;;  %v3990_v36 = vld [vmem:[%s4782_s11 + $0x18] sm:$0xff] }
 0x6bb   :  { %v792_v55 = vsub.f32 1.0, %v791_v42 }
 0x6bc   :  { %v884_v53 = vpop.permute.xlu0 %883 }
 0x6bd   :  { %904 = vmatpush.msrb.mxu1 %v884_v53  ;;  %v793_v60 = vmul.f32 %v3371_v48, %v792_v55 }
 0x6be   :  { %3212 = vmatmul.msk.f32.vlgmr.msrb.gmra.mxu1 %vm272_vm9, %v882_v54 }
 0x6bf   :  { %1188 = vmatpush.msra.mxu1 %v3717_v3  ;;  %v794_v23 = vadd.f32 %v3371_v48, %v793_v60 }
 0x6c1   :  { %1189 = vmatpush.msra.mxu1 %v3722_v4 }
 0x6c3   :  { %1190 = vmatpush.msra.mxu1 %v3730_v5  ;;  %v798_v5 = vsel %vm797_vm8, %v3371_v48, %v794_v23  ;;  %v4027_v48 = vld [vmem:[%s4783_s12] ss:$0 sm:$0xff] }
 0x6c4   :  { %v803_v0 = vsel %vm800_vm10, %v802_v63, %v798_v5 }
 0x6c5   :  { %1191 = vmatpush.msra.mxu1 %v3736_v6  ;;  %v804_v2 = vmul.f32 %v3899_v45, %v803_v0 }
 0x6d5   :  { %v750_v19 = vpop.f32.mrf.mxu1 }
 0x6d6   :  { %910 = vrot.lane.b32.xlu1 %v750_v19, %s4791_s0  ;;  %s4821_s0 = smov 120  }
 0x714   :  { %v979_v3 = vpop.xlane.xlu2 %978 }
 0x715   :  { %v983_v4 = vmul.f32 %v979_v3, %v3910_v13 }
 0x717   :  { %v985_v6 = vadd.f32 1e-05, %v983_v4 }
 0x719   :  { %3372 = vrsqrt.f32 %v985_v6  ;;  %vm993_vm12 = vweird.f32 %v985_v6 }
 0x71c   :  { %v806_v1 = vpop.permute.xlu2 %805 }
 0x71d   :  { %826 = vmatpush.msra.mxu0 %v806_v1 }
 0x71e   :  { %3209 = vmatmul.msk.f32.vlgmr.msra.gmra.mxu0 %vm272_vm9, %v804_v2 }
 0x71f   :  { %v3373_v10 = vpop.eup %3372  ;;  %1040 = vmatpush.msrb.mxu0 %v105_v7 }
 0x720   :  { %v988_v11 = vmul.f32 %v3373_v10, %v985_v6  ;;  %vm994_vm11 = vweird.f32 %v3373_v10 }
 0x721   :  { %1041 = vmatpush.msrb.mxu0 %v104_v8  ;;  %vm995_vm13 = vmor %vm993_vm12, %vm994_vm11 }
 0x722   :  { %v989_v45 = vmul.f32 %v3373_v10, %v988_v11 }
 0x723   :  { %1042 = vmatpush.msrb.mxu0 %v103_v12 }
 0x724   :  { %v990_v15 = vmul.f32 0.5, %v989_v45 }
 0x725   :  { %1043 = vmatpush.msrb.mxu0 %v102_v14 }
 0x726   :  { %v991_v16 = vsub.f32 1.5, %v990_v15 }
 0x728   :  { %v992_v18 = vmul.f32 %v3373_v10, %v991_v16 }
 0x72a   :  { %v996_v49 = vsel %vm995_vm13, %v3373_v10, %v992_v18 }
 0x72b   :  { %v1007_v21 = vmul.f32 %v996_v49, %v3913_v17  ;;  %v3972_v17 = vld [vmem:[%s4782_s11 + $0x30] sm:$0xff] }
 0x72c   :  { %1072 = vmatpush.msrb.mxu2 %v3972_v17 }
 0x72d   :  { %v1012_v24 = vmul.f32 %v3952_v20, %v1007_v21  ;;  %v4042_v21 = vld [vmem:[%s4784_s13] ss:$0 sm:$0xff] }
 0x72e   :  { %1073 = vmatpush.msrb.mxu2 %v3978_v34 }
 0x72f   :  { %v1017_v25 = vadd.f32 %v3958_v22, %v1012_v24 }
 0x730   :  { %1074 = vmatpush.msrb.mxu2 %v3984_v35 }
 0x731   :  { %3215 = vmatmul.msk.f32.vlgmr.msrb.gmra.mxu0 %vm158_vm2, %v1017_v25 }
 0x732   :  { %1075 = vmatpush.msrb.mxu2 %v3990_v36 }
 0x733   :  { %v672_v41 = vpop.f32.mrf.mxu0 }
 0x734   :  { %1076 = vmatpush.msrb.mxu2 %v3997_v37 }
 0x736   :  { %1077 = vmatpush.msrb.mxu2 %v4003_v39 }
 0x738   :  { %1078 = vmatpush.msrb.mxu2 %v4009_v40 }
 0x73b   :  { %v906_v26 = vpop.f32.mrf.mxu1 }
 0x73c   :  { %918 = vrot.lane.b32.xlu2 %v906_v26, %s3611_s27  ;;  %v4047_v26 = vld [vmem:[%s4785_s14] ss:$0 sm:$0xff] }
 0x748   :  { %v911_v47 = vpop.permute.xlu1 %910 }
 0x749   :  { %v921_v9 = vsel %vm272_vm9, %v672_v41, %v911_v47 }
 0x796   :  { %v919_v53 = vpop.permute.xlu2 %918 }
 0x79b   :  { %v828_v43 = vpop.f32.mrf.mxu0 }
 0x79c   :  { %914 = vrot.lane.b32.xlu0 %v828_v43, %s3610_s26 }
 0x7ae   :  { %v1045_v46 = vpop.f32.mrf.mxu0 }
 0x7af   :  { %v1046_v50 = vadd.f32 %v4016_v44, %v1045_v46 }
 0x7b1   :  { %v1051_v51 = vmax.f32 %v1046_v50, 0.0 }
 0x7b3   :  { %3217 = vmatmul.msk.f32.vlgmr.msrb.gmra.mxu2 %vm1056_vm14, %v1051_v51 }
 0x80e   :  { %v915_v52 = vpop.permute.xlu0 %914 }
 0x80f   :  { %v922_v54 = vsel %vm594_vm3, %v921_v9, %v915_v52 }
 0x810   :  { %v923_v19 = vsel %vm596_vm4, %v922_v54, %v919_v53 }
 0x811   :  { %3214 = vmatmul.msk.f32.gmra.mxu3 %vm158_vm2, %v923_v19 }
 0x836   :  { %v1080_v42 = vpop.f32.mrf.mxu2 }
 0x837   :  { %v1081_v55 = vadd.f32 %v4027_v48, %v1080_v42 }
 0x839   :  { %v1086_v60 = vadd.f32 %v1081_v55, %v1017_v25 }
 0x83b   :  { %v1088_v23 = vsel %vm158_vm2, %v1086_v60, 0.0 }
 0x83c   :  { %1089 = vadd.xlane.f32.xlu1 %v1088_v23 }
 0x894   :  { %v953_v61 = vpop.f32.mrf.mxu3 }
 0x895   :  { %v954_v62 = vadd.f32 %v3894_v38, %v953_v61 }
 0x897   :  { %v957_v3 = vadd.f32 %v954_v62, %v3773_v33  ;;  %v4062_v62 = vld [vmem:[%s4775_s4] ss:$0 sm:$0xff] }
 0x899   :  { %v961_v4 = vsel %vm158_vm2, %v957_v3, 0.0 }
 0x89a   :  { %962 = vadd.xlane.f32.xlu0 %v961_v4 }
 0x8af   :  { %v1090_v5 = vpop.xlane.xlu1 %1089 }
 0x8b0   :  { %v1094_v63 = vmul.f32 %v1090_v5, %v3910_v13 }
 0x8b2   :  { %v1096_v6 = vsub.f32 %v1086_v60, %v1094_v63 }
 0x8b4   :  { %v1098_v0 = vmul.f32 %v1096_v6, %v1096_v6 }
 0x8b6   :  { %v1100_v1 = vsel %vm158_vm2, %v1098_v0, 0.0 }
 0x8b7   :  { %1101 = vadd.xlane.f32.xlu2 %v1100_v1 }
 0x90d   :  { %v963_v2 = vpop.xlane.xlu0 %962 }
 0x90e   :  { %v972_v7 = vmul.f32 %v3910_v13, %v963_v2 }
 0x910   :  { %v974_v8 = vsub.f32 %v957_v3, %v972_v7 }
 0x912   :  { %v976_v10 = vmul.f32 %v974_v8, %v974_v8 }
 0x914   :  { %v980_v38 = vsel %vm158_vm2, %v976_v10, 0.0 }
 0x915   :  { %981 = vadd.xlane.f32.xlu1 %v980_v38 }
 0x92a   :  { %v1102_v33 = vpop.xlane.xlu2 %1101 }
 0x92b   :  { %v1106_v11 = vmul.f32 %v1102_v33, %v3910_v13 }
 0x92d   :  { %v1108_v12 = vadd.f32 1e-05, %v1106_v11 }
 0x92f   :  { %3374 = vrsqrt.f32 %v1108_v12  ;;  %vm1116_vm0 = vweird.f32 %v1108_v12 }
 0x935   :  { %v3375_v45 = vpop.eup %3374 }
 0x936   :  { %v1111_v14 = vmul.f32 %v3375_v45, %v1108_v12  ;;  %vm1117_vm15 = vweird.f32 %v3375_v45 }
 0x937   :  { %vm1118_vm1 = vmor %vm1116_vm0, %vm1117_vm15 }
 0x938   :  { %v1112_v15 = vmul.f32 %v3375_v45, %v1111_v14 }
 0x93a   :  { %v1113_v16 = vmul.f32 0.5, %v1112_v15 }
 0x93c   :  { %v1114_v18 = vsub.f32 1.5, %v1113_v16 }
 0x93e   :  { %v1115_v49 = vmul.f32 %v3375_v45, %v1114_v18 }
 0x940   :  { %v1119_v24 = vsel %vm1118_vm1, %v3375_v45, %v1115_v49 }
 0x941   :  { %v1130_v25 = vmul.f32 %v1119_v24, %v1096_v6 }
 0x943   :  { %v1135_v41 = vmul.f32 %v4042_v21, %v1130_v25 }
 0x945   :  { %v4051_v43 = vadd.f32 %v4047_v26, %v1135_v41 }
 0x947   :  { %3219 = vmatmul.msk.f32.vlgmr.msra.gmra.mxu1 %vm158_vm2, %v4051_v43 }
 0x988   :  { %v982_v46 = vpop.xlane.xlu1 %981 }
 0x989   :  { %v984_v50 = vmul.f32 %v982_v46, %v3910_v13 }
 0x98b   :  { %v986_v51 = vadd.f32 1e-05, %v984_v50 }
 0x98d   :  { %3376 = vrsqrt.f32 %v986_v51  ;;  %vm1003_vm6 = vweird.f32 %v986_v51 }
 0x993   :  { %v3377_v47 = vpop.eup %3376 }
 0x994   :  { %v998_v9 = vmul.f32 %v3377_v47, %v986_v51  ;;  %vm1004_vm5 = vweird.f32 %v3377_v47 }
 0x995   :  { %vm1005_vm7 = vmor %vm1003_vm6, %vm1004_vm5 }
 0x996   :  { %v999_v52 = vmul.f32 %v3377_v47, %v998_v9 }
 0x998   :  { %v1000_v53 = vmul.f32 0.5, %v999_v52 }
 0x99a   :  { %v1001_v54 = vsub.f32 1.5, %v1000_v53 }
 0x99c   :  { %v1002_v19 = vmul.f32 %v3377_v47, %v1001_v54 }
 0x99e   :  { %v1006_v42 = vsel %vm1005_vm7, %v3377_v47, %v1002_v19 }
 0x99f   :  { %v1008_v55 = vmul.f32 %v1006_v42, %v974_v8 }
 0x9a1   :  { %v1013_v60 = vmul.f32 %v3952_v20, %v1008_v55  ;;  %v249_v20 = vmul.f32 %v3767_v30, %v3759_v27 }
 0x9a3   :  { %v1018_v23 = vadd.f32 %v3958_v22, %v1013_v60  ;;  %v253_v63 = vsub.f32 1.0, %v249_v20 }
 0x9a5   :  { %3216 = vmatmul.msk.f32.gmra.mxu0 %vm158_vm2, %v1018_v23  ;;  %v4075_v0 = vmul.f32 %v3764_v29, %v253_v63 }
 0x9a7   :  { %v259_v1 = vmul.f32 %v3764_v29, %v4075_v0 }
 0x9a9   :  { %v4081_v8 = vadd.f32 %v259_v1, %v249_v20 }
 0x9ab   :  { %vm1237_vm10 = vcmp.lt.f32.partialorder %v4081_v8, 1.0 }
 0x9ac   :  { %v3221_v45 = vsel %vm1237_vm10, 1.0, %v3601_v28 }
 0x9c4   :  { %v1193_v61 = vpop.f32.mrf.mxu1 }
 0x9c5   :  { %v4065_v3 = vadd.f32 %v4062_v62, %v1193_v61 }
 0x9c7   :  { %1284 = vrot.lane.b32.xlu2 %v4065_v3, %s3599_s2  ;;  %v1199_v4 = vsub.f32 0.0, %v4065_v3 }
 0x9c9   :  { %v1201_v5 = vmul.f32 1.442695, %v1199_v4 }
 0x9cb   :  { %3378 = vpow2.f32 %v1201_v5 }
 0x9cf   :  { %1360 = vrot.lane.b32.xlu2 %v4065_v3, %s4803_s17 }
 0x9d1   :  { %v3379_v22 = vpop.eup %3378 }
 0x9d2   :  { %v1205_v6 = vadd.f32 1.0, %v3379_v22 }
 0x9d4   :  { %3380 = vrcp.f32 %v1205_v6  ;;  %v1218_v30 = vand.u32 2147483648, %v1205_v6  ;;  %v1216_v38 = vand.u32 2147483647, %v1205_v6  ;;  %vm1212_vm11 = vweird.f32 %v1205_v6 }
 0x9d6   :  { %v1219_v11 = vor.u32 1.1754944e-38, %v1218_v30  ;;  %vm1217_vm13 = vcmp.eq.f32.partialorder %v1216_v38, 8.507059e+37 }
 0x9d7   :  { %1440 = vrot.lane.b32.xlu2 %v4065_v3, %s4807_s21 }
 0x9da   :  { %v3381_v2 = vpop.eup %3380 }
 0x9db   :  { %v1208_v7 = vmul.f32 %v3381_v2, %v1205_v6  ;;  %vm1213_vm8 = vweird.f32 %v3381_v2 }
 0x9dc   :  { %vm1214_vm12 = vmor %vm1212_vm11, %vm1213_vm8 }
 0x9dd   :  { %v1209_v27 = vsub.f32 1.0, %v1208_v7 }
 0x9df   :  { %1438 = vrot.lane.b32.xlu2 %v4065_v3, %s4799_s23  ;;  %v1210_v10 = vmul.f32 %v3381_v2, %v1209_v27 }
 0x9e1   :  { %v1211_v33 = vadd.f32 %v3381_v2, %v1210_v10 }
 0x9e3   :  { %v1215_v12 = vsel %vm1214_vm12, %v3381_v2, %v1211_v33 }
 0x9e4   :  { %v4086_v29 = vsel %vm1217_vm13, %v1219_v11, %v1215_v12 }
 0x9e5   :  { %v1243_v14 = vmul.f32 %v3221_v45, %v4086_v29 }
 0x9e7   :  { %v1245_v15 = vadd.f32 %v1243_v14, %v4081_v8 }
 0x9e9   :  { %vm1247_vm15 = vcmp.gt.f32.partialorder %v1245_v15, 0.9  ;;  %vm1255_vm0 = vcmp.le.f32.partialorder %v1245_v15, 0.9 }
 0x9ea   :  { %v3223_v16 = vsel %vm1247_vm15, 1.0, %v3601_v28  ;;  %v3225_v18 = vsel %vm1255_vm0, 1.0, %v3601_v28 }
 0x9eb   :  { %v4093_v49 = vmul.f32 %v3225_v18, %v3221_v45  ;;  %v4095_v24 = vmul.f32 %v3223_v16, %v3221_v45 }
 0x9ed   :  { %v1277_v25 = vadd.f32 %v4093_v49, %v3771_v31 }
 0x9ef   :  { %v4100_v41 = vadd.f32 %v1277_v25, %v4095_v24 }
 0xa21   :  { %v1285_v46 = vpop.permute.xlu2 %1284 }
 0xa22   :  { %v1048_v50 = vpop.f32.mrf.mxu0  ;;  %3227 = vmatpush.xpose.msk.msrb.mxu3 %vm272_vm9, %v1285_v46 }
 0xa23   :  { %v1049_v51 = vadd.f32 %v4016_v44, %v1048_v50 }
 0xa25   :  { %v1052_v47 = vmax.f32 %v1049_v51, 0.0  ;;  %3228 = vmatmul.msk.f32.vlgmr.msrb.gmra.mxu3 %vm272_vm9, %v4065_v3 }
 0xa27   :  { %3218 = vmatmul.msk.f32.gmra.mxu2 %vm1056_vm14, %v1052_v47 }
 0xa29   :  { %v1361_v38 = vpop.permute.xlu2 %1360 }
 0xa31   :  { %v1441_v47 = vpop.permute.xlu2 %1440 }
 0xaa8   :  { %v1307_v9 = vpop.f32.mrf.mxu3 }
 0xaa9   :  { %v1310_v52 = vsel %vm272_vm9, %v1307_v9, -inf }
 0xaaa   :  { %v1083_v53 = vpop.f32.mrf.mxu2  ;;  %1311 = vmax.xlane.f32.xlu1 %v1310_v52 }
 0xaab   :  { %v1084_v31 = vadd.f32 %v4027_v48, %v1083_v53 }
 0xaad   :  { %v1087_v54 = vadd.f32 %v1084_v31, %v1018_v23 }
 0xaaf   :  { %v1091_v19 = vsel %vm158_vm2, %v1087_v54, 0.0 }
 0xab0   :  { %1092 = vadd.xlane.f32.xlu0 %v1091_v19 }
 0xb1d   :  { %v1312_v42 = vpop.xlane.xlu1 %1311 }
 0xb1e   :  { %v1313_v55 = vsub.f32 %v1307_v9, %v1312_v42 }
 0xb20   :  { %v1314_v44 = vmul.f32 1.442695, %v1313_v55 }
 0xb22   :  { %3382 = vpow2.f32 %v1314_v44  ;;  %v1439_v44 = vpop.permute.xlu2 %1438 }
 0xb23   :  { %v1093_v60 = vpop.xlane.xlu0 %1092 }
 0xb24   :  { %v1095_v61 = vmul.f32 %v1093_v60, %v3910_v13 }
 0xb26   :  { %v1097_v4 = vsub.f32 %v1087_v54, %v1095_v61 }
 0xb28   :  { %v3383_v5 = vpop.eup %3382  ;;  %v1099_v20 = vmul.f32 %v1097_v4, %v1097_v4 }
 0xb29   :  { %v1316_v22 = vsel %vm272_vm9, %v3383_v5, 0.0 }
 0xb2a   :  { %1317 = vadd.xlane.f32.xlu1 %v1316_v22  ;;  %v1103_v63 = vsel %vm158_vm2, %v1099_v20, 0.0 }
 0xb2b   :  { %1104 = vadd.xlane.f32.xlu0 %v1103_v63 }
 0xb3f   :  { %1362 = vrot.lane.b32.xlu0 %v4065_v3, %s4809_s18 }
 0xb43   :  { %1334 = vrot.lane.b32.xlu1 %v4065_v3, %s4801_s19 }
 0xb47   :  { %1518 = vrot.lane.b32.xlu0 %v4065_v3, %s4805_s1 }
 0xb4b   :  { %1490 = vrot.lane.b32.xlu1 %v4065_v3, %s4813_s28 }
 0xb4f   :  { %1516 = vrot.lane.b32.xlu0 %v4065_v3, %s4814_s29 }
 0xb9d   :  { %v1318_v48 = vpop.xlane.xlu1 %1317 }
 0xb9e   :  { %3384 = vrcp.f32 %v1318_v48  ;;  %v1105_v23 = vpop.xlane.xlu0 %1104  ;;  %v1330_v12 = vand.u32 2147483648, %v1318_v48  ;;  %vm1324_vm5 = vweird.f32 %v1318_v48  ;;  %v1328_v14 = vand.u32 2147483647, %v1318_v48 }
 0xb9f   :  { %v1107_v6 = vmul.f32 %v1105_v23, %v3910_v13  ;;  %v250_v23 = vmul.f32 %v3803_v58, %v3795_v56 }
 0xba0   :  { %v1331_v18 = vor.u32 1.1754944e-38, %v1330_v12  ;;  %vm1329_vm8 = vcmp.eq.f32.partialorder %v1328_v14, 8.507059e+37 }
 0xba1   :  { %v1109_v1 = vadd.f32 1e-05, %v1107_v6 }
 0xba3   :  { %3386 = vrsqrt.f32 %v1109_v1  ;;  %vm1126_vm10 = vweird.f32 %v1109_v1 }
 0xba4   :  { %v3385_v2 = vpop.eup %3384 }
 0xba5   :  { %v1320_v7 = vmul.f32 %v3385_v2, %v1318_v48  ;;  %vm1325_vm1 = vweird.f32 %v3385_v2 }
 0xba6   :  { %vm1326_vm6 = vmor %vm1324_vm5, %vm1325_vm1 }
 0xba7   :  { %v1321_v27 = vsub.f32 1.0, %v1320_v7 }
 0xba9   :  { %v3387_v30 = vpop.eup %3386  ;;  %v1322_v10 = vmul.f32 %v3385_v2, %v1321_v27 }
 0xbaa   :  { %v1121_v33 = vmul.f32 %v3387_v30, %v1109_v1  ;;  %vm1127_vm7 = vweird.f32 %v3387_v30  ;;  %v254_v1 = vsub.f32 1.0, %v250_v23 }
 0xbab   :  { %v1323_v11 = vadd.f32 %v3385_v2, %v1322_v10  ;;  %vm1128_vm11 = vmor %vm1126_vm10, %vm1127_vm7 }
 0xbac   :  { %v1122_v45 = vmul.f32 %v3387_v30, %v1121_v33  ;;  %v4149_v27 = vmul.f32 %v3800_v57, %v254_v1 }
 0xbad   :  { %v1327_v16 = vsel %vm1326_vm6, %v3385_v2, %v1323_v11 }
 0xbae   :  { %v1123_v15 = vmul.f32 0.5, %v1122_v45  ;;  %v1332_v50 = vsel %vm1329_vm8, %v1331_v18, %v1327_v16 }
 0xbaf   :  { %v1333_v53 = vmul.f32 %v3383_v5, %v1332_v50 }
 0xbb0   :  { %v1124_v25 = vsub.f32 1.5, %v1123_v15 }
 0xbb1   :  { %v1363_v46 = vpop.permute.xlu0 %1362 }
 0xbb2   :  { %v1125_v51 = vmul.f32 %v3387_v30, %v1124_v25  ;;  %3230 = vmatpush.xpose.msk.msrb.mxu1 %vm272_vm9, %v1363_v46 }
 0xbb4   :  { %v1129_v9 = vsel %vm1128_vm11, %v3387_v30, %v1125_v51  ;;  %v260_v30 = vmul.f32 %v3800_v57, %v4149_v27 }
 0xbb5   :  { %v1335_v52 = vpop.permute.xlu1 %1334  ;;  %v1131_v31 = vmul.f32 %v1129_v9, %v1097_v4 }
 0xbb6   :  { %1355 = vmatpush.msra.mxu0 %v1335_v52  ;;  %v4153_v33 = vadd.f32 %v260_v30, %v250_v23 }
 0xbb7   :  { %3229 = vmatmul.msk.f32.vlgmr.msra.gmra.mxu0 %vm272_vm9, %v1333_v53  ;;  %v1136_v54 = vmul.f32 %v4042_v21, %v1131_v31 }
 0xbb8   :  { %3233 = vmatpush.xpose.msk.msrb.mxu0 %vm272_vm9, %v1441_v47  ;;  %vm1238_vm15 = vcmp.lt.f32.partialorder %v4153_v33, 1.0 }
 0xbb9   :  { %v1519_v19 = vpop.permute.xlu0 %1518  ;;  %v4129_v42 = vadd.f32 %v4047_v26, %v1136_v54  ;;  %v3222_v16 = vsel %vm1238_vm15, 1.0, %v3601_v28 }
 0xbba   :  { %3236 = vmatpush.xpose.msk.msra.mxu1 %vm272_vm9, %v1519_v19 }
 0xbbb   :  { %3220 = vmatmul.msk.f32.gmra.mxu1 %vm158_vm2, %v4129_v42 }
 0xbbd   :  { %v1491_v55 = vpop.permute.xlu1 %1490 }
 0xbbe   :  { %1511 = vmatpush.msra.mxu2 %v1491_v55 }
 0xbbf   :  { %3234 = vmatmul.msk.f32.vlgmr.msrb.gmra.mxu0 %vm272_vm9, %v1439_v44 }
 0xbc1   :  { %v1517_v60 = vpop.permute.xlu0 %1516 }
 0xbc3   :  { %3231 = vmatmul.msk.f32.vlgmr.msrb.gmra.mxu1 %vm272_vm9, %v1361_v38 }
 0xbcb   :  { %3237 = vmatmul.msk.f32.vlgmr.msra.gmra.mxu1 %vm272_vm9, %v1517_v60 }
 0xc34   :  { %v4137_v21 = vpop.f32.mrf.mxu0 }
 0xc38   :  { %v1196_v61 = vpop.f32.mrf.mxu1 }
 0xc39   :  { %v4140_v26 = vadd.f32 %v4062_v62, %v1196_v61 }
 0xc3b   :  { %v1200_v4 = vsub.f32 0.0, %v4140_v26 }
 0xc3c   :  { %v1463_v5 = vpop.f32.mrf.mxu0 }
 0xc3d   :  { %v1466_v20 = vsel %vm272_vm9, %v1463_v5, -inf  ;;  %v1203_v22 = vmul.f32 1.442695, %v1200_v4 }
 0xc3e   :  { %1467 = vmax.xlane.f32.xlu1 %v1466_v20 }
 0xc3f   :  { %3388 = vpow2.f32 %v1203_v22 }
 0xc40   :  { %v1385_v63 = vpop.f32.mrf.mxu1 }
 0xc41   :  { %v1388_v48 = vsel %vm272_vm9, %v1385_v63, -inf }
 0xc42   :  { %1389 = vmax.xlane.f32.xlu2 %v1388_v48 }
 0xc45   :  { %v3389_v6 = vpop.eup %3388 }
 0xc46   :  { %v1206_v2 = vadd.f32 1.0, %v3389_v6 }
 0xc48   :  { %v1541_v62 = vpop.f32.mrf.mxu1  ;;  %3390 = vrcp.f32 %v1206_v2  ;;  %v1233_v58 = vand.u32 2147483648, %v1206_v2  ;;  %v1231_v12 = vand.u32 2147483647, %v1206_v2  ;;  %vm1227_vm13 = vweird.f32 %v1206_v2 }
 0xc49   :  { %v1544_v7 = vsel %vm272_vm9, %v1541_v62, -inf }
 0xc4a   :  { %1545 = vmax.xlane.f32.xlu0 %v1544_v7  ;;  %v1234_v14 = vor.u32 1.1754944e-38, %v1233_v58  ;;  %vm1232_vm1 = vcmp.eq.f32.partialorder %v1231_v12, 8.507059e+37 }
 0xc4e   :  { %v3391_v10 = vpop.eup %3390 }
 0xc4f   :  { %v1223_v38 = vmul.f32 %v3391_v10, %v1206_v2  ;;  %vm1228_vm12 = vweird.f32 %v3391_v10 }
 0xc50   :  { %vm1229_vm0 = vmor %vm1227_vm13, %vm1228_vm12 }
 0xc51   :  { %v1224_v56 = vsub.f32 1.0, %v1223_v38 }
 0xc53   :  { %v1225_v11 = vmul.f32 %v3391_v10, %v1224_v56 }
 0xc55   :  { %v1226_v45 = vadd.f32 %v3391_v10, %v1225_v11 }
 0xc57   :  { %1686 = vrot.lane.b32.xlu1 %v4140_v26, %s4803_s17  ;;  %v1230_v15 = vsel %vm1229_vm0, %v3391_v10, %v1226_v45 }
 0xc58   :  { %v4158_v57 = vsel %vm1232_vm1, %v1234_v14, %v1230_v15 }
 0xc59   :  { %v1244_v18 = vmul.f32 %v3222_v16, %v4158_v57 }
 0xc5b   :  { %v1246_v25 = vadd.f32 %v1244_v18, %v4153_v33 }
 0xc5d   :  { %vm1248_vm5 = vcmp.gt.f32.partialorder %v1246_v25, 0.9  ;;  %vm1256_vm6 = vcmp.le.f32.partialorder %v1246_v25, 0.9 }
 0xc5e   :  { %1568 = vrot.lane.b32.xlu0 %v4065_v3, %s4815_s30  ;;  %v3224_v46 = vsel %vm1248_vm5, 1.0, %v3601_v28  ;;  %v3226_v50 = vsel %vm1256_vm6, 1.0, %v3601_v28 }
 0xc5f   :  { %v4167_v51 = vmul.f32 %v3226_v50, %v3222_v16  ;;  %v4169_v47 = vmul.f32 %v3224_v46, %v3222_v16 }
 0xc61   :  { %v1278_v9 = vadd.f32 %v4167_v51, %v3807_v59 }
 0xc63   :  { %v4174_v52 = vadd.f32 %v1278_v9, %v4169_v47 }
 0xc66   :  { %1688 = vrot.lane.b32.xlu0 %v4140_v26, %s4809_s18 }
 0xcb1   :  { %v1468_v53 = vpop.xlane.xlu1 %1467 }
 0xcb2   :  { %v1469_v31 = vsub.f32 %v1463_v5, %v1468_v53 }
 0xcb4   :  { %v1470_v54 = vmul.f32 1.442695, %v1469_v31 }
 0xcb5   :  { %v1390_v19 = vpop.xlane.xlu2 %1389 }
 0xcb6   :  { %3392 = vpow2.f32 %v1470_v54  ;;  %v1391_v55 = vsub.f32 %v1385_v63, %v1390_v19 }
 0xcb8   :  { %v1392_v44 = vmul.f32 1.442695, %v1391_v55 }
 0xcba   :  { %3394 = vpow2.f32 %v1392_v44 }
 0xcbc   :  { %v3393_v60 = vpop.eup %3392 }
 0xcbd   :  { %v1546_v61 = vpop.xlane.xlu0 %1545  ;;  %v1472_v4 = vsel %vm272_vm9, %v3393_v60, 0.0 }
 0xcbe   :  { %v1547_v20 = vsub.f32 %v1541_v62, %v1546_v61  ;;  %1473 = vadd.xlane.f32.xlu1 %v1472_v4 }
 0xcc0   :  { %v4179_v59 = vpop.eup %3394  ;;  %v1548_v22 = vmul.f32 1.442695, %v1547_v20 }
 0xcc1   :  { %v1394_v48 = vsel %vm272_vm9, %v4179_v59, 0.0 }
 0xcc2   :  { %3396 = vpow2.f32 %v1548_v22  ;;  %1395 = vadd.xlane.f32.xlu2 %v1394_v48 }
 0xcc8   :  { %v4183_v5 = vpop.eup %3396 }
 0xcc9   :  { %v1550_v63 = vsel %vm272_vm9, %v4183_v5, 0.0  ;;  %v1687_v1 = vpop.permute.xlu1 %1686 }
 0xcca   :  { %1551 = vadd.xlane.f32.xlu0 %v1550_v63 }
 0xcd0   :  { %v1569_v23 = vpop.permute.xlu0 %1568 }
 0xcd7   :  { %1764 = vrot.lane.b32.xlu1 %v4140_v26, %s4799_s23 }
 0xcd8   :  { %v1689_v6 = vpop.permute.xlu0 %1688 }
 0xcd9   :  { %3242 = vmatpush.xpose.msk.msrb.mxu1 %vm272_vm9, %v1689_v6 }
 0xcda   :  { %1412 = vrot.lane.b32.xlu2 %v4065_v3, %s4816_s22 }
 0xcdc   :  { %3243 = vmatmul.msk.f32.vlgmr.msrb.gmra.mxu1 %vm272_vm9, %v1687_v1 }
 0xcde   :  { %1844 = vrot.lane.b32.xlu0 %v4140_v26, %s4805_s1  ;;  %s4819_s1 = smov 80  }
 0xce2   :  { %1610 = vrot.lane.b32.xlu2 %v4140_v26, %s3599_s2 }
 0xcea   :  { %1766 = vrot.lane.b32.xlu2 %v4140_v26, %s4807_s21  ;;  %s4820_s21 = smov 72  }
 0xcf2   :  { %1842 = vrot.lane.b32.xlu2 %v4140_v26, %s4814_s29 }
 0xd31   :  { %v1474_v2 = vpop.xlane.xlu1 %1473 }
 0xd32   :  { %3398 = vrcp.f32 %v1474_v2  ;;  %v1484_v38 = vand.u32 2147483647, %v1474_v2  ;;  %v1486_v56 = vand.u32 2147483648, %v1474_v2  ;;  %vm1480_vm8 = vweird.f32 %v1474_v2 }
 0xd34   :  { %vm1485_vm11 = vcmp.eq.f32.partialorder %v1484_v38, 8.507059e+37  ;;  %v1487_v16 = vor.u32 1.1754944e-38, %v1486_v56  ;;  %v4236_v56 = vld [vmem:[%s4776_s5] sm:$0xff] }
 0xd35   :  { %v1396_v62 = vpop.xlane.xlu2 %1395 }
 0xd36   :  { %3400 = vrcp.f32 %v1396_v62  ;;  %v1408_v18 = vand.u32 2147483648, %v1396_v62  ;;  %v1406_v50 = vand.u32 2147483647, %v1396_v62  ;;  %vm1402_vm13 = vweird.f32 %v1396_v62 }
 0xd38   :  { %v3399_v3 = vpop.eup %3398  ;;  %v1409_v19 = vor.u32 1.1754944e-38, %v1408_v18  ;;  %vm1407_vm0 = vcmp.eq.f32.partialorder %v1406_v50, 8.507059e+37 }
 0xd39   :  { %v1476_v7 = vmul.f32 %v3399_v3, %v1474_v2  ;;  %vm1481_vm7 = vweird.f32 %v3399_v3 }
 0xd3a   :  { %vm1482_vm10 = vmor %vm1480_vm8, %vm1481_vm7 }
 0xd3b   :  { %v1477_v30 = vsub.f32 1.0, %v1476_v7 }
 0xd3c   :  { %v3401_v10 = vpop.eup %3400 }
 0xd3d   :  { %v1478_v58 = vmul.f32 %v3399_v3, %v1477_v30  ;;  %v1398_v11 = vmul.f32 %v3401_v10, %v1396_v62  ;;  %v1552_v12 = vpop.xlane.xlu0 %1551  ;;  %v1413_v45 = vpop.permute.xlu2 %1412  ;;  %vm1403_vm12 = vweird.f32 %v3401_v10 }
 0xd3e   :  { %3402 = vrcp.f32 %v1552_v12  ;;  %1433 = vmatpush.msra.mxu3 %v1413_v45  ;;  %vm1404_vm15 = vmor %vm1402_vm13, %vm1403_vm12  ;;  %v1564_v48 = vand.u32 2147483648, %v1552_v12  ;;  %vm1558_vm5 = vweird.f32 %v1552_v12 }
 0xd3f   :  { %v1479_v14 = vadd.f32 %v3399_v3, %v1478_v58  ;;  %v1399_v15 = vsub.f32 1.0, %v1398_v11 }
 0xd40   :  { %1589 = vmatpush.msrb.mxu3 %v1569_v23  ;;  %v1562_v23 = vand.u32 2147483647, %v1552_v12  ;;  %v1565_v6 = vor.u32 1.1754944e-38, %v1564_v48 }
 0xd41   :  { %v1483_v25 = vsel %vm1482_vm10, %v3399_v3, %v1479_v14  ;;  %v1400_v46 = vmul.f32 %v3401_v10, %v1399_v15  ;;  %v4212_v3 = vld [vmem:[%s4776_s5 + $0x18] sm:$0xff] }
 0xd42   :  { %v1488_v9 = vsel %vm1485_vm11, %v1487_v16, %v1483_v25  ;;  %vm1563_vm7 = vcmp.eq.f32.partialorder %v1562_v23, 8.507059e+37 }
 0xd43   :  { %v1401_v53 = vadd.f32 %v3401_v10, %v1400_v46  ;;  %v1489_v31 = vmul.f32 %v3393_v60, %v1488_v9 }
 0xd44   :  { %v3403_v54 = vpop.eup %3402 }
 0xd45   :  { %v1405_v55 = vsel %vm1404_vm15, %v3401_v10, %v1401_v53  ;;  %v1554_v44 = vmul.f32 %v3403_v54, %v1552_v12  ;;  %3235 = vmatmul.msk.f32.vlgmr.msra.gmra.mxu2 %vm272_vm9, %v1489_v31  ;;  %v1611_v61 = vpop.permute.xlu2 %1610  ;;  %vm1559_vm1 = vweird.f32 %v3403_v54  ;;  %v4221_v10 = vld [vmem:[%s4776_s5 + $0x10] sm:$0xff] }
 0xd46   :  { %v1410_v4 = vsel %vm1407_vm0, %v1409_v19, %v1405_v55  ;;  %3239 = vmatpush.xpose.msk.msra.mxu0 %vm272_vm9, %v1611_v61  ;;  %vm1560_vm6 = vmor %vm1558_vm5, %vm1559_vm1 }
 0xd47   :  { %v1555_v20 = vsub.f32 1.0, %v1554_v44  ;;  %v1411_v22 = vmul.f32 %v4179_v59, %v1410_v4 }
 0xd49   :  { %v1556_v63 = vmul.f32 %v3403_v54, %v1555_v20  ;;  %3232 = vmatmul.msk.f32.vlgmr.msra.gmra.mxu3 %vm272_vm9, %v1411_v22  ;;  %3240 = vmatmul.msk.f32.vlgmr.msra.gmra.mxu0 %vm272_vm9, %v4140_v26  ;;  %v1765_v7 = vpop.permute.xlu1 %1764 }
 0xd4b   :  { %v1557_v60 = vadd.f32 %v3403_v54, %v1556_v63 }
 0xd4d   :  { %v1561_v1 = vsel %vm1560_vm6, %v3403_v54, %v1557_v60  ;;  %v1767_v2 = vpop.permute.xlu2 %1766 }
 0xd4e   :  { %v1566_v62 = vsel %vm1563_vm7, %v1565_v6, %v1561_v1  ;;  %3245 = vmatpush.xpose.msk.msrb.mxu0 %vm272_vm9, %v1767_v2 }
 0xd4f   :  { %v1567_v59 = vmul.f32 %v4183_v5, %v1566_v62  ;;  %v4228_v5 = vld [vmem:[%s4776_s5 + $0x8] sm:$0xff]  ;;  %s4817_s5 = smov 8   ;;  %v4281_v62 = vld [vmem:[%s4777_s6] ss:$0 sm:$0xff] }
 0xd50   :  { %v1845_v30 = vpop.permute.xlu0 %1844 }
 0xd51   :  { %3238 = vmatmul.msk.f32.vlgmr.msrb.gmra.mxu3 %vm272_vm9, %v1567_v59  ;;  %3246 = vmatmul.msk.f32.vlgmr.msrb.gmra.mxu0 %vm272_vm9, %v1765_v7 }
 0xd52   :  { %1953 = vmatpush.msra.mxu0 %v4212_v3  ;;  %3248 = vmatpush.xpose.msk.msra.mxu1 %vm272_vm9, %v1845_v30 }
 0xd54   :  { %1954 = vmatpush.msra.mxu0 %v4221_v10 }
 0xd55   :  { %v1843_v38 = vpop.permute.xlu2 %1842 }
 0xd56   :  { %2059 = vmatpush.msrb.mxu1 %v3967_v32  ;;  %1955 = vmatpush.msra.mxu0 %v4228_v5 }
 0xd57   :  { %3249 = vmatmul.msk.f32.vlgmr.msra.gmra.mxu1 %vm272_vm9, %v1843_v38 }
 0xd58   :  { %2060 = vmatpush.msrb.mxu1 %v3972_v17  ;;  %1956 = vmatpush.msra.mxu0 %v4236_v56 }
 0xd5a   :  { %2061 = vmatpush.msrb.mxu1 %v3978_v34  ;;  %v1711_v34 = vpop.f32.mrf.mxu1 }
 0xd5c   :  { %2062 = vmatpush.msrb.mxu1 %v3984_v35  ;;  %v1714_v35 = vsel %vm272_vm9, %v1711_v34, -inf }
 0xd5e   :  { %2063 = vmatpush.msrb.mxu1 %v3990_v36 }
 0xd60   :  { %2064 = vmatpush.msrb.mxu1 %v3997_v37 }
 0xd62   :  { %2065 = vmatpush.msrb.mxu1 %v4003_v39 }
 0xd64   :  { %2066 = vmatpush.msrb.mxu1 %v4009_v40 }
 0xdc6   :  { %v1633_v11 = vpop.f32.mrf.mxu0 }
 0xdc7   :  { %v1636_v36 = vsel %vm272_vm9, %v1633_v11, -inf }
 0xdc8   :  { %v1513_v32 = vpop.f32.mrf.mxu2 }
 0xdc9   :  { %1599 = vrot.lane.b32.xlu1 %v1513_v32, %s3610_s26 }
 0xdcc   :  { %v1435_v17 = vpop.f32.mrf.mxu3 }
 0xdcd   :  { %1595 = vrot.lane.b32.xlu0 %v1435_v17, %s4817_s5 }
 0xdce   :  { %v1789_v37 = vpop.f32.mrf.mxu0 }
 0xdcf   :  { %v1792_v40 = vsel %vm272_vm9, %v1789_v37, -inf }
 0xdd4   :  { %v1591_v58 = vpop.f32.mrf.mxu3  ;;  %v1867_v39 = vpop.f32.mrf.mxu1 }
 0xdd5   :  { %1603 = vrot.lane.b32.xlu2 %v1591_v58, %s3611_s27  ;;  %v1870_v12 = vsel %vm272_vm9, %v1867_v39, -inf }
 0xdf3   :  { %1715 = vmax.xlane.f32.xlu1 %v1714_v35 }
 0xdf7   :  { %1637 = vmax.xlane.f32.xlu0 %v1636_v36 }
 0xdfe   :  { %1793 = vmax.xlane.f32.xlu2 %v1792_v40 }
 0xdff   :  { %1871 = vmax.xlane.f32.xlu0 %v1870_v12 }
 0xe2f   :  { %v1604_v16 = vpop.permute.xlu2 %1603 }
 0xe3b   :  { %v1600_v14 = vpop.permute.xlu1 %1599 }
 0xe3f   :  { %v1596_v45 = vpop.permute.xlu0 %1595 }
 0xe40   :  { %v1606_v15 = vsel %vm272_vm9, %v4137_v21, %v1596_v45 }
 0xe41   :  { %v1607_v18 = vsel %vm594_vm3, %v1606_v15, %v1600_v14 }
 0xe42   :  { %v1608_v25 = vsel %vm596_vm4, %v1607_v18, %v1604_v16 }
 0xe43   :  { %3251 = vmatmul.msk.f32.vlgmr.msra.gmra.mxu0 %vm158_vm2, %v1608_v25 }
 0xe66   :  { %v1716_v46 = vpop.xlane.xlu1 %1715 }
 0xe67   :  { %v1717_v50 = vsub.f32 %v1711_v34, %v1716_v46 }
 0xe69   :  { %v1718_v9 = vmul.f32 1.442695, %v1717_v50 }
 0xe6a   :  { %v1638_v53 = vpop.xlane.xlu0 %1637 }
 0xe6b   :  { %3404 = vpow2.f32 %v1718_v9  ;;  %v1639_v31 = vsub.f32 %v1633_v11, %v1638_v53 }
 0xe6d   :  { %v1640_v54 = vmul.f32 1.442695, %v1639_v31 }
 0xe6f   :  { %3406 = vpow2.f32 %v1640_v54 }
 0xe71   :  { %v4257_v19 = vpop.eup %3404  ;;  %v1794_v55 = vpop.xlane.xlu2 %1793 }
 0xe72   :  { %v1795_v44 = vsub.f32 %v1789_v37, %v1794_v55  ;;  %v1872_v21 = vpop.xlane.xlu0 %1871  ;;  %v1720_v61 = vsel %vm272_vm9, %v4257_v19, 0.0 }
 0xe73   :  { %v1873_v4 = vsub.f32 %v1867_v39, %v1872_v21  ;;  %1721 = vadd.xlane.f32.xlu2 %v1720_v61 }
 0xe74   :  { %v1796_v20 = vmul.f32 1.442695, %v1795_v44 }
 0xe75   :  { %v3407_v22 = vpop.eup %3406  ;;  %v1874_v48 = vmul.f32 1.442695, %v1873_v4 }
 0xe76   :  { %3408 = vpow2.f32 %v1796_v20  ;;  %v1642_v63 = vsel %vm272_vm9, %v3407_v22, 0.0 }
 0xe77   :  { %3410 = vpow2.f32 %v1874_v48  ;;  %1643 = vadd.xlane.f32.xlu1 %v1642_v63 }
 0xe7c   :  { %v4262_v23 = vpop.eup %3408 }
 0xe7d   :  { %v4264_v60 = vpop.eup %3410  ;;  %v1798_v6 = vsel %vm272_vm9, %v4262_v23, 0.0 }
 0xe7e   :  { %1799 = vadd.xlane.f32.xlu0 %v1798_v6  ;;  %v1876_v1 = vsel %vm272_vm9, %v4264_v60, 0.0 }
 0xe7f   :  { %1877 = vadd.xlane.f32.xlu1 %v1876_v1 }
 0xe8b   :  { %1660 = vrot.lane.b32.xlu2 %v4140_v26, %s4801_s19  ;;  %s4824_s19 = smov 128  }
 0xe92   :  { %1738 = vrot.lane.b32.xlu0 %v4140_v26, %s4816_s22 }
 0xe98   :  { %1816 = vrot.lane.b32.xlu1 %v4140_v26, %s4813_s28 }
 0xe9a   :  { %1894 = vrot.lane.b32.xlu0 %v4140_v26, %s4815_s30 }
 0xec0   :  { %v1958_v2 = vpop.f32.mrf.mxu0 }
 0xec1   :  { %v1959_v59 = vadd.f32 %v4281_v62, %v1958_v2 }
 0xec3   :  { %v4285_v7 = vadd.f32 %v1959_v59, %v4051_v43 }
 0xec5   :  { %v1966_v30 = vsel %vm158_vm2, %v4285_v7, 0.0 }
 0xec6   :  { %1967 = vadd.xlane.f32.xlu2 %v1966_v30 }
 0xee6   :  { %v1722_v38 = vpop.xlane.xlu2 %1721 }
 0xee7   :  { %3412 = vrcp.f32 %v1722_v38  ;;  %v1734_v31 = vand.u32 2147483648, %v1722_v38  ;;  %vm1728_vm15 = vweird.f32 %v1722_v38  ;;  %v1732_v44 = vand.u32 2147483647, %v1722_v38 }
 0xee9   :  { %v1735_v63 = vor.u32 1.1754944e-38, %v1734_v31  ;;  %vm1733_vm1 = vcmp.eq.f32.partialorder %v1732_v44, 8.507059e+37 }
 0xeea   :  { %v1644_v32 = vpop.xlane.xlu1 %1643 }
 0xeeb   :  { %3414 = vrcp.f32 %v1644_v32  ;;  %v1654_v40 = vand.u32 2147483647, %v1644_v32  ;;  %v1656_v12 = vand.u32 2147483648, %v1644_v32  ;;  %vm1650_vm10 = vweird.f32 %v1644_v32 }
 0xeed   :  { %v3413_v26 = vpop.eup %3412  ;;  %vm1655_vm12 = vcmp.eq.f32.partialorder %v1654_v40, 8.507059e+37  ;;  %v1657_v25 = vor.u32 1.1754944e-38, %v1656_v12 }
 0xeee   :  { %v1724_v17 = vmul.f32 %v3413_v26, %v1722_v38  ;;  %v1661_v58 = vpop.permute.xlu2 %1660  ;;  %vm1729_vm13 = vweird.f32 %v3413_v26 }
 0xeef   :  { %1681 = vmatpush.msrb.mxu2 %v1661_v58  ;;  %vm1730_vm0 = vmor %vm1728_vm15, %vm1729_vm13 }
 0xef0   :  { %v1725_v35 = vsub.f32 1.0, %v1724_v17 }
 0xef1   :  { %v3415_v34 = vpop.eup %3414  ;;  %v1800_v11 = vpop.xlane.xlu0 %1799 }
 0xef2   :  { %v1646_v36 = vmul.f32 %v3415_v34, %v1644_v32  ;;  %3416 = vrcp.f32 %v1800_v11  ;;  %v1878_v37 = vpop.xlane.xlu1 %1877  ;;  %v1726_v45 = vmul.f32 %v3413_v26, %v1725_v35  ;;  %vm1651_vm8 = vweird.f32 %v3415_v34 }
 0xef3   :  { %3418 = vrcp.f32 %v1878_v37  ;;  %vm1652_vm11 = vmor %vm1650_vm10, %vm1651_vm8  ;;  %v1812_v2 = vand.u32 2147483648, %v1800_v11  ;;  %vm1806_vm6 = vweird.f32 %v1800_v11  ;;  %v1810_v59 = vand.u32 2147483647, %v1800_v11 }
 0xef4   :  { %v1647_v39 = vsub.f32 1.0, %v1646_v36  ;;  %v1727_v50 = vadd.f32 %v3413_v26, %v1726_v45  ;;  %v1890_v38 = vand.u32 2147483648, %v1878_v37  ;;  %vm1884_vm10 = vweird.f32 %v1878_v37  ;;  %v3483_v45 = vld [vmem:[%s4780_s9 + $0x10] sm:$0xff] }
 0xef5   :  { %v1813_v58 = vor.u32 1.1754944e-38, %v1812_v2 }
 0xef6   :  { %v1648_v14 = vmul.f32 %v3415_v34, %v1647_v39  ;;  %v1731_v20 = vsel %vm1730_vm0, %v3413_v26, %v1727_v50  ;;  %v1891_v36 = vor.u32 1.1754944e-38, %v1890_v38 }
 0xef7   :  { %v1736_v1 = vsel %vm1733_vm1, %v1735_v63, %v1731_v20 }
 0xef8   :  { %v3417_v15 = vpop.eup %3416  ;;  %v1649_v16 = vadd.f32 %v3415_v34, %v1648_v14  ;;  %v1737_v26 = vmul.f32 %v4257_v19, %v1736_v1  ;;  %v3486_v14 = vld [vmem:[%s4774_s3 + $0x10] sm:$0xff] }
 0xef9   :  { %v3419_v18 = vpop.eup %3418  ;;  %v1802_v46 = vmul.f32 %v3417_v15, %v1800_v11  ;;  %vm1807_vm5 = vweird.f32 %v3417_v15 }
 0xefa   :  { %v1653_v9 = vsel %vm1652_vm11, %v3415_v34, %v1649_v16  ;;  %v1880_v53 = vmul.f32 %v3419_v18, %v1878_v37  ;;  %vm1885_vm7 = vweird.f32 %v3419_v18  ;;  %vm1808_vm8 = vmor %vm1806_vm6, %vm1807_vm5  ;;  %v3488_v16 = vld [vmem:[%s4774_s3 + $0x8] sm:$0xff] }
 0xefb   :  { %v1658_v54 = vsel %vm1655_vm12, %v1657_v25, %v1653_v9  ;;  %v1803_v55 = vsub.f32 1.0, %v1802_v46  ;;  %vm1886_vm11 = vmor %vm1884_vm10, %vm1885_vm7  ;;  %vm1811_vm12 = vcmp.eq.f32.partialorder %v1810_v59, 8.507059e+37 }
 0xefc   :  { %v1881_v21 = vsub.f32 1.0, %v1880_v53  ;;  %v1659_v61 = vmul.f32 %v3407_v22, %v1658_v54  ;;  %v1888_v22 = vand.u32 2147483647, %v1878_v37  ;;  %v3482_v37 = vld [vmem:[%s4780_s9 + $0x18] sm:$0xff] }
 0xefd   :  { %v1804_v4 = vmul.f32 %v3417_v15, %v1803_v55 }
 0xefe   :  { %v1882_v48 = vmul.f32 %v3419_v18, %v1881_v21  ;;  %3241 = vmatmul.msk.f32.vlgmr.msrb.gmra.mxu2 %vm272_vm9, %v1659_v61  ;;  %vm1889_vm13 = vcmp.eq.f32.partialorder %v1888_v22, 8.507059e+37 }
 0xeff   :  { %v1805_v6 = vadd.f32 %v3417_v15, %v1804_v4 }
 0xf00   :  { %v1883_v30 = vadd.f32 %v3419_v18, %v1882_v48 }
 0xf01   :  { %v1809_v32 = vsel %vm1808_vm8, %v3417_v15, %v1805_v6  ;;  %v3487_v15 = vld [vmem:[%s4780_s9] sm:$0xff] }
 0xf02   :  { %v1887_v34 = vsel %vm1886_vm11, %v3419_v18, %v1883_v30  ;;  %v1814_v35 = vsel %vm1811_vm12, %v1813_v58, %v1809_v32  ;;  %v3489_v18 = vld [vmem:[%s4774_s3] sm:$0xff] }
 0xf03   :  { %v1892_v11 = vsel %vm1889_vm13, %v1891_v36, %v1887_v34  ;;  %v1815_v40 = vmul.f32 %v4262_v23, %v1814_v35  ;;  %v3484_v23 = vld [vmem:[%s4774_s3 + $0x18] sm:$0xff]  ;;  %v3490_v30 = vld [vmem:[%s4778_s7] ss:$0 sm:$0xff] }
 0xf04   :  { %v1739_v17 = vpop.permute.xlu0 %1738  ;;  %v1893_v19 = vmul.f32 %v4264_v60, %v1892_v11  ;;  %v3485_v60 = vld [vmem:[%s4780_s9 + $0x8] sm:$0xff]  ;;  %v3491_v32 = vld [vmem:[%s4779_s8] ss:$0 sm:$0xff] }
 0xf05   :  { %1759 = vmatpush.msra.mxu3 %v1739_v17 }
 0xf06   :  { %3244 = vmatmul.msk.f32.vlgmr.msra.gmra.mxu3 %vm272_vm9, %v1737_v26 }
 0xf0a   :  { %v1817_v39 = vpop.permute.xlu1 %1816 }
 0xf0b   :  { %1837 = vmatpush.msra.mxu2 %v1817_v39  ;;  %v4341_v39 = vld [vmem:[%s4781_s10] ss:$0 sm:$0xff] }
 0xf0c   :  { %v1895_v12 = vpop.permute.xlu0 %1894  ;;  %3247 = vmatmul.msk.f32.vlgmr.msra.gmra.mxu2 %vm272_vm9, %v1815_v40 }
 0xf0d   :  { %1915 = vmatpush.msrb.mxu3 %v1895_v12  ;;  %2032 = vmatpush.msrb.mxu2 %v3482_v37 }
 0xf0e   :  { %3250 = vmatmul.msk.f32.vlgmr.msrb.gmra.mxu3 %vm272_vm9, %v1893_v19 }
 0xf0f   :  { %2033 = vmatpush.msrb.mxu2 %v3483_v45  ;;  %2170 = vmatpush.msra.mxu3 %v3484_v23 }
 0xf11   :  { %2034 = vmatpush.msrb.mxu2 %v3485_v60  ;;  %2171 = vmatpush.msra.mxu3 %v3486_v14  ;;  %v4351_v14 = vld [vmem:[%s4783_s12] ss:$0 sm:$0xff] }
 0xf13   :  { %2035 = vmatpush.msrb.mxu2 %v3487_v15  ;;  %2172 = vmatpush.msra.mxu3 %v3488_v16 }
 0xf15   :  { %2173 = vmatpush.msra.mxu3 %v3489_v18 }
 0xf39   :  { %v1968_v25 = vpop.xlane.xlu2 %1967 }
 0xf3a   :  { %v1972_v46 = vmul.f32 %v1968_v25, %v3910_v13 }
 0xf3c   :  { %v1974_v50 = vsub.f32 %v4285_v7, %v1972_v46 }
 0xf3e   :  { %v1976_v9 = vmul.f32 %v1974_v50, %v1974_v50 }
 0xf40   :  { %v1978_v53 = vsel %vm158_vm2, %v1976_v9, 0.0 }
 0xf41   :  { %1979 = vadd.xlane.f32.xlu1 %v1978_v53 }
 0xf81   :  { %v1683_v31 = vpop.f32.mrf.mxu2 }
 0xf89   :  { %v1761_v54 = vpop.f32.mrf.mxu3 }
 0xf8a   :  { %1921 = vrot.lane.b32.xlu0 %v1761_v54, %s4817_s5 }
 0xf8f   :  { %v1839_v55 = vpop.f32.mrf.mxu2 }
 0xf91   :  { %v1917_v44 = vpop.f32.mrf.mxu3 }
 0xf92   :  { %1925 = vrot.lane.b32.xlu0 %v1839_v55, %s3610_s26 }
 0xf9a   :  { %1929 = vrot.lane.b32.xlu0 %v1917_v44, %s3611_s27 }
 0xfb4   :  { %v1980_v21 = vpop.xlane.xlu1 %1979 }
 0xfb5   :  { %v1984_v61 = vmul.f32 %v1980_v21, %v3910_v13 }
 0xfb7   :  { %v1986_v4 = vadd.f32 1e-05, %v1984_v61 }
 0xfb9   :  { %3420 = vrsqrt.f32 %v1986_v4  ;;  %vm1994_vm0 = vweird.f32 %v1986_v4 }
 0xfbf   :  { %v3421_v7 = vpop.eup %3420 }
 0xfc0   :  { %v1989_v20 = vmul.f32 %v3421_v7, %v1986_v4  ;;  %vm1995_vm15 = vweird.f32 %v3421_v7 }
 0xfc1   :  { %vm1996_vm1 = vmor %vm1994_vm0, %vm1995_vm15 }
 0xfc2   :  { %v1990_v48 = vmul.f32 %v3421_v7, %v1989_v20 }
 0xfc4   :  { %v1991_v63 = vmul.f32 0.5, %v1990_v48 }
 0xfc6   :  { %v1992_v6 = vsub.f32 1.5, %v1991_v63 }
 0xfc8   :  { %v1993_v1 = vmul.f32 %v3421_v7, %v1992_v6 }
 0xfca   :  { %v1997_v2 = vsel %vm1996_vm1, %v3421_v7, %v1993_v1 }
 0xfcb   :  { %v2008_v59 = vmul.f32 %v1997_v2, %v1974_v50 }
 0xfcd   :  { %v2010_v38 = vmul.f32 %v3490_v30, %v2008_v59 }
 0xfcf   :  { %v2012_v22 = vadd.f32 %v3491_v32, %v2010_v38 }
 0xfd1   :  { %3253 = vmatmul.msk.f32.vlgmr.msrb.gmra.mxu2 %vm158_vm2, %v2012_v22 }
 0xffc   :  { %v1922_v17 = vpop.permute.xlu0 %1921 }
 0xffd   :  { %v1932_v58 = vsel %vm272_vm9, %v1683_v31, %v1922_v17 }
0x1004   :  { %v1926_v26 = vpop.permute.xlu0 %1925 }
0x1005   :  { %v1933_v34 = vsel %vm594_vm3, %v1932_v58, %v1926_v26 }
0x100c   :  { %v1930_v35 = vpop.permute.xlu0 %1929 }
0x100d   :  { %v1934_v36 = vsel %vm596_vm4, %v1933_v34, %v1930_v35 }
0x100e   :  { %3252 = vmatmul.msk.f32.gmra.mxu0 %vm158_vm2, %v1934_v36 }
0x1054   :  { %v2037_v11 = vpop.f32.mrf.mxu2 }
0x1055   :  { %v2038_v40 = vadd.f32 %v4341_v39, %v2037_v11 }
0x1057   :  { %v2043_v12 = vmax.f32 %v2038_v40, 0.0 }
0x1059   :  { %3255 = vmatmul.msk.f32.vlgmr.msrb.gmra.mxu1 %vm1056_vm14, %v2043_v12 }
0x108b   :  { %v1961_v19 = vpop.f32.mrf.mxu0 }
0x108c   :  { %v1962_v37 = vadd.f32 %v4281_v62, %v1961_v19  ;;  %v4368_v19 = vld [vmem:[%s4784_s13] ss:$0 sm:$0xff] }
0x108e   :  { %v1965_v45 = vadd.f32 %v1962_v37, %v4129_v42 }
0x1090   :  { %v1969_v23 = vsel %vm158_vm2, %v1965_v45, 0.0 }
0x1091   :  { %1970 = vadd.xlane.f32.xlu0 %v1969_v23 }
0x10d6   :  { %v2068_v60 = vpop.f32.mrf.mxu1 }
0x10d7   :  { %v2069_v15 = vadd.f32 %v4351_v14, %v2068_v60 }
0x10d9   :  { %v2074_v16 = vadd.f32 %v2069_v15, %v2012_v22 }
0x10db   :  { %v2076_v18 = vsel %vm158_vm2, %v2074_v16, 0.0 }
0x10dc   :  { %2077 = vadd.xlane.f32.xlu1 %v2076_v18 }
0x1104   :  { %v1971_v25 = vpop.xlane.xlu0 %1970 }
0x1105   :  { %v1973_v62 = vmul.f32 %v1971_v25, %v3910_v13  ;;  %v4386_v25 = vld [vmem:[%s4775_s4] ss:$0 sm:$0xff]  ;;  %s4818_s4 = smov 88  }
0x1107   :  { %v1975_v46 = vsub.f32 %v1965_v45, %v1973_v62  ;;  %v4374_v45 = vld [vmem:[%s4785_s14] ss:$0 sm:$0xff] }
0x1109   :  { %v1977_v50 = vmul.f32 %v1975_v46, %v1975_v46 }
0x110b   :  { %v1981_v9 = vsel %vm158_vm2, %v1977_v50, 0.0 }
0x110c   :  { %1982 = vadd.xlane.f32.xlu2 %v1981_v9 }
0x114f   :  { %v2078_v53 = vpop.xlane.xlu1 %2077 }
0x1150   :  { %v2082_v31 = vmul.f32 %v2078_v53, %v3910_v13 }
0x1152   :  { %v2084_v54 = vsub.f32 %v2074_v16, %v2082_v31 }
0x1154   :  { %v2086_v55 = vmul.f32 %v2084_v54, %v2084_v54 }
0x1156   :  { %v2088_v44 = vsel %vm158_vm2, %v2086_v55, 0.0 }
0x1157   :  { %2089 = vadd.xlane.f32.xlu2 %v2088_v44 }
0x117f   :  { %v1983_v21 = vpop.xlane.xlu2 %1982 }
0x1180   :  { %v1985_v61 = vmul.f32 %v1983_v21, %v3910_v13 }
0x1182   :  { %v1987_v4 = vadd.f32 1e-05, %v1985_v61 }
0x1184   :  { %3422 = vrsqrt.f32 %v1987_v4  ;;  %vm2004_vm6 = vweird.f32 %v1987_v4 }
0x118a   :  { %v3423_v7 = vpop.eup %3422 }
0x118b   :  { %v1999_v20 = vmul.f32 %v3423_v7, %v1987_v4  ;;  %vm2005_vm5 = vweird.f32 %v3423_v7 }
0x118c   :  { %vm2006_vm7 = vmor %vm2004_vm6, %vm2005_vm5 }
0x118d   :  { %v2000_v48 = vmul.f32 %v3423_v7, %v1999_v20 }
0x118f   :  { %v2001_v63 = vmul.f32 0.5, %v2000_v48 }
0x1191   :  { %v2002_v6 = vsub.f32 1.5, %v2001_v63 }
0x1193   :  { %v2003_v1 = vmul.f32 %v3423_v7, %v2002_v6 }
0x1195   :  { %v2007_v2 = vsel %vm2006_vm7, %v3423_v7, %v2003_v1 }
0x1196   :  { %v2009_v59 = vmul.f32 %v2007_v2, %v1975_v46  ;;  %v4393_v46 = vmul.f32 %v4093_v49, %v4086_v29 }
0x1198   :  { %v2011_v38 = vmul.f32 %v3490_v30, %v2009_v59  ;;  %v1265_v50 = vadd.f32 %v4393_v46, %v4081_v8 }
0x119a   :  { %v4360_v22 = vadd.f32 %v3491_v32, %v2011_v38  ;;  %v1267_v53 = vsub.f32 1.0, %v1265_v50 }
0x119c   :  { %3254 = vmatmul.msk.f32.gmra.mxu2 %vm158_vm2, %v4360_v22 }
0x11ca   :  { %v2090_v17 = vpop.xlane.xlu2 %2089 }
0x11cb   :  { %v2094_v26 = vmul.f32 %v2090_v17, %v3910_v13 }
0x11cd   :  { %v2096_v58 = vadd.f32 1e-05, %v2094_v26 }
0x11cf   :  { %3424 = vrsqrt.f32 %v2096_v58  ;;  %vm2104_vm10 = vweird.f32 %v2096_v58 }
0x11d5   :  { %v3425_v34 = vpop.eup %3424 }
0x11d6   :  { %v2099_v35 = vmul.f32 %v3425_v34, %v2096_v58  ;;  %vm2105_vm8 = vweird.f32 %v3425_v34 }
0x11d7   :  { %vm2106_vm11 = vmor %vm2104_vm10, %vm2105_vm8 }
0x11d8   :  { %v2100_v36 = vmul.f32 %v3425_v34, %v2099_v35 }
0x11da   :  { %v2101_v11 = vmul.f32 0.5, %v2100_v36 }
0x11dc   :  { %v2102_v40 = vsub.f32 1.5, %v2101_v11 }
0x11de   :  { %v2103_v12 = vmul.f32 %v3425_v34, %v2102_v40 }
0x11e0   :  { %v2107_v30 = vsel %vm2106_vm11, %v3425_v34, %v2103_v12 }
0x11e1   :  { %v2118_v32 = vmul.f32 %v2107_v30, %v2084_v54  ;;  %v1269_v54 = vmul.f32 %v1267_v53, %v4095_v24 }
0x11e3   :  { %v2120_v37 = vmul.f32 %v4368_v19, %v2118_v32  ;;  %v4404_v29 = vadd.f32 %v1269_v54, %v4075_v0 }
0x11e5   :  { %v4377_v23 = vadd.f32 %v4374_v45, %v2120_v37  ;;  %v4410_v49 = vmul.f32 %v4404_v29, %v4095_v24 }
0x11e7   :  { %3257 = vmatmul.msk.f32.vlgmr.msra.gmra.mxu3 %vm158_vm2, %v4377_v23  ;;  %v4413_v61 = vadd.f32 %v4410_v49, %v1265_v50 }
0x11e9   :  { %vm2219_vm15 = vcmp.lt.f32.partialorder %v4413_v61, 1.0 }
0x11ea   :  { %v3259_v1 = vsel %vm2219_vm15, 1.0, %v3601_v28 }
0x121f   :  { %v2040_v60 = vpop.f32.mrf.mxu2 }
0x1220   :  { %v2041_v15 = vadd.f32 %v4341_v39, %v2040_v60 }
0x1222   :  { %v2044_v16 = vmax.f32 %v2041_v15, 0.0 }
0x1224   :  { %3256 = vmatmul.msk.f32.gmra.mxu1 %vm1056_vm14, %v2044_v16 }
0x126a   :  { %v2175_v18 = vpop.f32.mrf.mxu3 }
0x126b   :  { %v4389_v62 = vadd.f32 %v4386_v25, %v2175_v18 }
0x126d   :  { %2264 = vrot.lane.b32.xlu1 %v4389_v62, %s3599_s2  ;;  %v2181_v39 = vsub.f32 0.0, %v4389_v62 }
0x126f   :  { %v2183_v9 = vmul.f32 1.442695, %v2181_v39 }
0x1271   :  { %3426 = vpow2.f32 %v2183_v9 }
0x1275   :  { %2342 = vrot.lane.b32.xlu1 %v4389_v62, %s4818_s4 }
0x1277   :  { %v3427_v31 = vpop.eup %3426 }
0x1278   :  { %v2187_v55 = vadd.f32 1.0, %v3427_v31 }
0x127a   :  { %3428 = vrcp.f32 %v2187_v55  ;;  %v2200_v7 = vand.u32 2147483648, %v2187_v55  ;;  %v2198_v0 = vand.u32 2147483647, %v2187_v55  ;;  %vm2194_vm13 = vweird.f32 %v2187_v55 }
0x127c   :  { %v2201_v24 = vor.u32 1.1754944e-38, %v2200_v7  ;;  %vm2199_vm1 = vcmp.eq.f32.partialorder %v2198_v0, 8.507059e+37 }
0x127d   :  { %2420 = vrot.lane.b32.xlu1 %v4389_v62, %s4819_s1 }
0x1280   :  { %v3429_v44 = vpop.eup %3428 }
0x1281   :  { %v2190_v21 = vmul.f32 %v3429_v44, %v2187_v55  ;;  %vm2195_vm12 = vweird.f32 %v3429_v44 }
0x1282   :  { %vm2196_vm0 = vmor %vm2194_vm13, %vm2195_vm12 }
0x1283   :  { %v2191_v4 = vsub.f32 1.0, %v2190_v21 }
0x1285   :  { %2498 = vrot.lane.b32.xlu1 %v4389_v62, %s4820_s21  ;;  %v2192_v20 = vmul.f32 %v3429_v44, %v2191_v4 }
0x1287   :  { %v2193_v48 = vadd.f32 %v3429_v44, %v2192_v20 }
0x1289   :  { %v2197_v63 = vsel %vm2196_vm0, %v3429_v44, %v2193_v48 }
0x128a   :  { %v4418_v6 = vsel %vm2199_vm1, %v2201_v24, %v2197_v63 }
0x128b   :  { %v2225_v2 = vmul.f32 %v3259_v1, %v4418_v6 }
0x128d   :  { %2496 = vrot.lane.b32.xlu1 %v4389_v62, %s4814_s29  ;;  %v2227_v59 = vadd.f32 %v2225_v2, %v4413_v61 }
0x128f   :  { %vm2229_vm5 = vcmp.gt.f32.partialorder %v2227_v59, 0.9  ;;  %vm2237_vm6 = vcmp.le.f32.partialorder %v2227_v59, 0.9 }
0x1290   :  { %v3261_v38 = vsel %vm2229_vm5, 1.0, %v3601_v28  ;;  %v3263_v17 = vsel %vm2237_vm6, 1.0, %v3601_v28 }
0x1291   :  { %v4427_v26 = vmul.f32 %v3263_v17, %v3259_v1  ;;  %v4429_v58 = vmul.f32 %v3261_v38, %v3259_v1 }
0x1293   :  { %v2255_v34 = vadd.f32 %v4427_v26, %v4100_v41 }
0x1295   :  { %v4434_v35 = vadd.f32 %v2255_v34, %v4429_v58 }
0x12a1   :  { %v2071_v36 = vpop.f32.mrf.mxu1 }
0x12a2   :  { %v2072_v11 = vadd.f32 %v4351_v14, %v2071_v36 }
0x12a4   :  { %v2075_v40 = vadd.f32 %v2072_v11, %v4360_v22 }
0x12a6   :  { %v2079_v12 = vsel %vm158_vm2, %v2075_v40, 0.0 }
0x12a7   :  { %2080 = vadd.xlane.f32.xlu2 %v2079_v12 }
0x12df   :  { %v2265_v30 = vpop.permute.xlu1 %2264 }
0x12e0   :  { %3265 = vmatpush.xpose.msk.msrb.mxu0 %vm272_vm9, %v2265_v30 }
0x12e3   :  { %3266 = vmatmul.msk.f32.vlgmr.msrb.gmra.mxu0 %vm272_vm9, %v4389_v62 }
0x12e7   :  { %v2343_v32 = vpop.permute.xlu1 %2342 }
0x12e8   :  { %3268 = vmatpush.xpose.msk.msrb.mxu3 %vm272_vm9, %v2343_v32 }
0x12ef   :  { %v2421_v41 = vpop.permute.xlu1 %2420 }
0x12f7   :  { %v2499_v37 = vpop.permute.xlu1 %2498 }
0x12f8   :  { %3274 = vmatpush.xpose.msk.msra.mxu3 %vm272_vm9, %v2499_v37 }
0x12ff   :  { %v2497_v63 = vpop.permute.xlu1 %2496 }
0x131a   :  { %v2081_v60 = vpop.xlane.xlu2 %2080 }
0x131b   :  { %v2083_v14 = vmul.f32 %v2081_v60, %v3910_v13 }
0x131d   :  { %v2085_v22 = vsub.f32 %v2075_v40, %v2083_v14 }
0x131f   :  { %v2087_v15 = vmul.f32 %v2085_v22, %v2085_v22 }
0x1321   :  { %v2091_v16 = vsel %vm158_vm2, %v2087_v15, 0.0 }
0x1322   :  { %2092 = vadd.xlane.f32.xlu2 %v2091_v16 }
0x133a   :  { %2340 = vrot.lane.b32.xlu2 %v4389_v62, %s4821_s0 }
0x1360   :  { %v4448_v18 = vpop.f32.mrf.mxu0 }
0x1361   :  { %v2290_v39 = vsel %vm272_vm9, %v4448_v18, -inf }
0x1362   :  { %2291 = vmax.xlane.f32.xlu0 %v2290_v39 }
0x1376   :  { %2314 = vrot.lane.b32.xlu0 %v4389_v62, %s4822_s20 }
0x137e   :  { %2418 = vrot.lane.b32.xlu0 %v4389_v62, %s4823_s24 }
0x1395   :  { %v2093_v50 = vpop.xlane.xlu2 %2092 }
0x1396   :  { %v2095_v9 = vmul.f32 %v2093_v50, %v3910_v13 }
0x1398   :  { %v2097_v53 = vadd.f32 1e-05, %v2095_v9 }
0x139a   :  { %3430 = vrsqrt.f32 %v2097_v53  ;;  %vm2114_vm8 = vweird.f32 %v2097_v53 }
0x139d   :  { %v2341_v24 = vpop.permute.xlu2 %2340 }
0x13a0   :  { %v3431_v31 = vpop.eup %3430 }
0x13a1   :  { %v2109_v54 = vmul.f32 %v3431_v31, %v2097_v53  ;;  %vm2115_vm7 = vweird.f32 %v3431_v31 }
0x13a2   :  { %vm2116_vm10 = vmor %vm2114_vm8, %vm2115_vm7 }
0x13a3   :  { %v2110_v55 = vmul.f32 %v3431_v31, %v2109_v54 }
0x13a5   :  { %v2111_v44 = vmul.f32 0.5, %v2110_v55 }
0x13a7   :  { %v2112_v21 = vsub.f32 1.5, %v2111_v44 }
0x13a9   :  { %v2113_v4 = vmul.f32 %v3431_v31, %v2112_v21 }
0x13ab   :  { %v2117_v7 = vsel %vm2116_vm10, %v3431_v31, %v2113_v4 }
0x13ac   :  { %v2119_v20 = vmul.f32 %v2117_v7, %v2085_v22 }
0x13ae   :  { %v2121_v0 = vmul.f32 %v4368_v19, %v2119_v20 }
0x13b0   :  { %v4459_v48 = vadd.f32 %v4374_v45, %v2121_v0  ;;  %v4471_v45 = vmul.f32 %v4167_v51, %v4158_v57 }
0x13b2   :  { %3258 = vmatmul.msk.f32.gmra.mxu3 %vm158_vm2, %v4459_v48  ;;  %v1266_v17 = vadd.f32 %v4471_v45, %v4153_v33 }
0x13b4   :  { %v1268_v34 = vsub.f32 1.0, %v1266_v17 }
0x13b6   :  { %v1270_v51 = vmul.f32 %v1268_v34, %v4169_v47  ;;  %v3501_v34 = vld [vmem:[%s4782_s11 + $0x18] sm:$0xff] }
0x13b8   :  { %v4488_v11 = vadd.f32 %v1270_v51, %v4149_v27  ;;  %v3503_v51 = vld [vmem:[%s4782_s11 + $0x8] sm:$0xff] }
0x13ba   :  { %3269 = vmatmul.msk.f32.vlgmr.msrb.gmra.mxu3 %vm272_vm9, %v2341_v24  ;;  %v4492_v40 = vmul.f32 %v4488_v11, %v4169_v47 }
0x13bc   :  { %v4495_v32 = vadd.f32 %v4492_v40, %v1266_v17  ;;  %v3499_v17 = vld [vmem:[%s4782_s11 + $0x28] sm:$0xff] }
0x13be   :  { %vm2220_vm13 = vcmp.lt.f32.partialorder %v4495_v32, 1.0 }
0x13bf   :  { %v3260_v50 = vsel %vm2220_vm13, 1.0, %v3601_v28 }
0x13c2   :  { %3275 = vmatmul.msk.f32.vlgmr.msra.gmra.mxu3 %vm272_vm9, %v2497_v63 }
0x13d5   :  { %v2292_v1 = vpop.xlane.xlu0 %2291 }
0x13d6   :  { %v2293_v60 = vsub.f32 %v4448_v18, %v2292_v1 }
0x13d8   :  { %v2294_v47 = vmul.f32 1.442695, %v2293_v60 }
0x13e8   :  { %v2315_v2 = vpop.permute.xlu0 %2314 }
0x13e9   :  { %2335 = vmatpush.msra.mxu2 %v2315_v2 }
0x13eb   :  { %3271 = vmatpush.xpose.msk.msrb.mxu2 %vm272_vm9, %v2421_v41 }
0x1435   :  { %v2178_v59 = vpop.f32.mrf.mxu3 }
0x1436   :  { %v4467_v19 = vadd.f32 %v4386_v25, %v2178_v59  ;;  %v3497_v59 = vld [vmem:[%s4782_s11 + $0x38] sm:$0xff] }
0x1438   :  { %2666 = vrot.lane.b32.xlu1 %v4467_v19, %s4821_s0  ;;  %2668 = vrot.lane.b32.xlu0 %v4467_v19, %s4818_s4  ;;  %v2182_v38 = vsub.f32 0.0, %v4467_v19 }
0x1439   :  { %2590 = vrot.lane.b32.xlu2 %v4467_v19, %s3599_s2 }
0x143a   :  { %v2185_v25 = vmul.f32 1.442695, %v2182_v38  ;;  %v3498_v38 = vld [vmem:[%s4782_s11 + $0x30] sm:$0xff] }
0x143c   :  { %3432 = vpow2.f32 %v2185_v25  ;;  %v3500_v25 = vld [vmem:[%s4782_s11 + $0x20] sm:$0xff] }
0x143d   :  { %v4516_v20 = vpop.f32.mrf.mxu3 }
0x143e   :  { %v2368_v0 = vsel %vm272_vm9, %v4516_v20, -inf }
0x1440   :  { %2744 = vrot.lane.b32.xlu1 %v4467_v19, %s4823_s24  ;;  %2824 = vrot.lane.b32.xlu0 %v4467_v19, %s4820_s21 }
0x1442   :  { %v3433_v57 = vpop.eup %3432 }
0x1443   :  { %v2188_v36 = vadd.f32 1.0, %v3433_v57  ;;  %v3502_v57 = vld [vmem:[%s4782_s11 + $0x10] sm:$0xff] }
0x1445   :  { %3434 = vrcp.f32 %v2188_v36  ;;  %v2215_v37 = vand.u32 2147483648, %v2188_v36  ;;  %v2213_v22 = vand.u32 2147483647, %v2188_v36  ;;  %vm2209_vm12 = vweird.f32 %v2188_v36 }
0x1446   :  { %3436 = vpow2.f32 %v2294_v47 }
0x1447   :  { %v2216_v27 = vor.u32 1.1754944e-38, %v2215_v37  ;;  %vm2214_vm0 = vcmp.eq.f32.partialorder %v2213_v22, 8.507059e+37 }
0x144b   :  { %v3435_v12 = vpop.eup %3434 }
0x144c   :  { %v2205_v30 = vmul.f32 %v3435_v12, %v2188_v36  ;;  %vm2210_vm11 = vweird.f32 %v3435_v12  ;;  %v3437_v55 = vpop.eup %3436  ;;  %v3504_v36 = vld [vmem:[%s4782_s11] sm:$0xff]  ;;  %s3616_s11 = smov [#allocation7]  }
0x144d   :  { %vm2211_vm15 = vmor %vm2209_vm12, %vm2210_vm11  ;;  %v2296_v7 = vsel %vm272_vm9, %v3437_v55, 0.0 }
0x144e   :  { %v2206_v41 = vsub.f32 1.0, %v2205_v30 }
0x1450   :  { %v2207_v14 = vmul.f32 %v3435_v12, %v2206_v41 }
0x1452   :  { %v2208_v15 = vadd.f32 %v3435_v12, %v2207_v14 }
0x1454   :  { %v2212_v16 = vsel %vm2211_vm15, %v3435_v12, %v2208_v15 }
0x1455   :  { %v4499_v39 = vsel %vm2214_vm0, %v2216_v27, %v2212_v16 }
0x1456   :  { %v2226_v9 = vmul.f32 %v3260_v50, %v4499_v39 }
0x1458   :  { %v2228_v18 = vadd.f32 %v2226_v9, %v4495_v32 }
0x145a   :  { %vm2230_vm1 = vcmp.gt.f32.partialorder %v2228_v18, 0.9  ;;  %vm2238_vm5 = vcmp.le.f32.partialorder %v2228_v18, 0.9 }
0x145b   :  { %v3262_v53 = vsel %vm2230_vm1, 1.0, %v3601_v28  ;;  %v3264_v31 = vsel %vm2238_vm5, 1.0, %v3601_v28  ;;  %v2419_v28 = vpop.permute.xlu0 %2418 }
0x145c   :  { %v4506_v54 = vmul.f32 %v3264_v31, %v3260_v50  ;;  %v4508_v44 = vmul.f32 %v3262_v53, %v3260_v50 }
0x145e   :  { %v2256_v21 = vadd.f32 %v4506_v54, %v4174_v52  ;;  %v4524_v52 = vpop.f32.mrf.mxu3 }
0x145f   :  { %v2524_v63 = vsel %vm272_vm9, %v4524_v52, -inf }
0x1460   :  { %v4513_v4 = vadd.f32 %v2256_v21, %v4508_v44 }
0x1462   :  { %2297 = vadd.xlane.f32.xlu2 %v2296_v7 }
0x146a   :  { %2369 = vmax.xlane.f32.xlu0 %v2368_v0 }
0x147a   :  { %2746 = vrot.lane.b32.xlu2 %v4467_v19, %s4819_s1 }
0x1482   :  { %2822 = vrot.lane.b32.xlu2 %v4467_v19, %s4814_s29 }
0x1493   :  { %v2591_v12 = vpop.permute.xlu2 %2590 }
0x14aa   :  { %v2669_v24 = vpop.permute.xlu0 %2668  ;;  %v2667_v1 = vpop.permute.xlu1 %2666 }
0x14ab   :  { %2525 = vmax.xlane.f32.xlu2 %v2524_v63  ;;  %3280 = vmatpush.xpose.msk.msrb.mxu3 %vm272_vm9, %v2669_v24 }
0x14ae   :  { %3281 = vmatmul.msk.f32.vlgmr.msrb.gmra.mxu3 %vm272_vm9, %v2667_v1 }
0x14b2   :  { %v2825_v2 = vpop.permute.xlu0 %2824  ;;  %v2745_v31 = vpop.permute.xlu1 %2744 }
0x14b3   :  { %3286 = vmatpush.xpose.msk.msra.mxu3 %vm272_vm9, %v2825_v2 }
0x14b7   :  { %3039 = vmatpush.msrb.mxu3 %v3497_v59 }
0x14b9   :  { %3040 = vmatpush.msrb.mxu3 %v3498_v38 }
0x14bb   :  { %3041 = vmatpush.msrb.mxu3 %v3499_v17 }
0x14bd   :  { %3042 = vmatpush.msrb.mxu3 %v3500_v25 }
0x14bf   :  { %3043 = vmatpush.msrb.mxu3 %v3501_v34 }
0x14c1   :  { %3044 = vmatpush.msrb.mxu3 %v3502_v57 }
0x14c3   :  { %3045 = vmatpush.msrb.mxu3 %v3503_v51 }
0x14c5   :  { %3046 = vmatpush.msrb.mxu3 %v3504_v36 }
0x14d5   :  { %v2298_v30 = vpop.xlane.xlu2 %2297 }
0x14d6   :  { %3438 = vrcp.f32 %v2298_v30  ;;  %v2310_v22 = vand.u32 2147483648, %v2298_v30  ;;  %v2308_v27 = vand.u32 2147483647, %v2298_v30  ;;  %vm2304_vm7 = vweird.f32 %v2298_v30 }
0x14d8   :  { %v2311_v16 = vor.u32 1.1754944e-38, %v2310_v22  ;;  %vm2309_vm10 = vcmp.eq.f32.partialorder %v2308_v27, 8.507059e+37 }
0x14dc   :  { %v3439_v41 = vpop.eup %3438 }
0x14dd   :  { %v2300_v37 = vmul.f32 %v3439_v41, %v2298_v30  ;;  %v2747_v60 = vpop.permute.xlu2 %2746  ;;  %vm2305_vm6 = vweird.f32 %v3439_v41  ;;  %v2370_v21 = vpop.xlane.xlu0 %2369 }
0x14de   :  { %vm2306_vm8 = vmor %vm2304_vm7, %vm2305_vm6  ;;  %v2371_v7 = vsub.f32 %v4516_v20, %v2370_v21 }
0x14df   :  { %v2301_v14 = vsub.f32 1.0, %v2300_v37 }
0x14e0   :  { %v2372_v24 = vmul.f32 1.442695, %v2371_v7 }
0x14e1   :  { %v2302_v15 = vmul.f32 %v3439_v41, %v2301_v14 }
0x14e2   :  { %3440 = vpow2.f32 %v2372_v24 }
0x14e3   :  { %v2303_v47 = vadd.f32 %v3439_v41, %v2302_v15 }
0x14e5   :  { %v2307_v50 = vsel %vm2306_vm8, %v3439_v41, %v2303_v47  ;;  %v2823_v9 = vpop.permute.xlu2 %2822 }
0x14e6   :  { %v2312_v18 = vsel %vm2309_vm10, %v2311_v16, %v2307_v50  ;;  %3287 = vmatmul.msk.f32.vlgmr.msra.gmra.mxu3 %vm272_vm9, %v2823_v9 }
0x14e7   :  { %v2313_v53 = vmul.f32 %v3437_v55, %v2312_v18 }
0x14e8   :  { %v3441_v59 = vpop.eup %3440 }
0x14e9   :  { %3267 = vmatmul.msk.f32.vlgmr.msra.gmra.mxu2 %vm272_vm9, %v2313_v53  ;;  %v2374_v38 = vsel %vm272_vm9, %v3441_v59, 0.0 }
0x14ea   :  { %3277 = vmatpush.xpose.msk.msra.mxu2 %vm272_vm9, %v2591_v12 }
0x14f1   :  { %3272 = vmatmul.msk.f32.vlgmr.msrb.gmra.mxu2 %vm272_vm9, %v2419_v28 }
0x14f2   :  { %3283 = vmatpush.xpose.msk.msrb.mxu2 %vm272_vm9, %v2747_v60 }
0x14f9   :  { %3278 = vmatmul.msk.f32.vlgmr.msra.gmra.mxu2 %vm272_vm9, %v4467_v19 }
0x14fa   :  { %2933 = vmatpush.msra.mxu2 %v4212_v3 }
0x14fc   :  { %2934 = vmatpush.msra.mxu2 %v4221_v10 }
0x14fe   :  { %2935 = vmatpush.msra.mxu2 %v4228_v5 }
0x1500   :  { %2936 = vmatpush.msra.mxu2 %v4236_v56 }
0x1501   :  { %3284 = vmatmul.msk.f32.vlgmr.msrb.gmra.mxu2 %vm272_vm9, %v2745_v31 }
0x151e   :  { %v2526_v3 = vpop.xlane.xlu2 %2525 }
0x151f   :  { %v2527_v10 = vsub.f32 %v4524_v52, %v2526_v3 }
0x1521   :  { %v2528_v2 = vmul.f32 1.442695, %v2527_v10 }
0x1523   :  { %3442 = vpow2.f32 %v2528_v2 }
0x1529   :  { %v4576_v25 = vpop.eup %3442 }
0x152a   :  { %v2530_v52 = vsel %vm272_vm9, %v4576_v25, 0.0 }
0x1531   :  { %v2691_v63 = vpop.f32.mrf.mxu3 }
0x1532   :  { %v2694_v1 = vsel %vm272_vm9, %v2691_v63, -inf }
0x1569   :  { %v2847_v20 = vpop.f32.mrf.mxu3 }
0x156a   :  { %v2850_v17 = vsel %vm272_vm9, %v2847_v20, -inf }
0x156c   :  { %v4567_v55 = vpop.f32.mrf.mxu2 }
0x1574   :  { %v2443_v0 = vpop.f32.mrf.mxu2 }
0x1575   :  { %v2446_v28 = vsel %vm272_vm9, %v2443_v0, -inf }
0x1576   :  { %2447 = vmax.xlane.f32.xlu1 %v2446_v28 }
0x157c   :  { %v2613_v5 = vpop.f32.mrf.mxu2 }
0x157d   :  { %v2616_v56 = vsel %vm272_vm9, %v2613_v5, -inf }
0x157e   :  { %2617 = vmax.xlane.f32.xlu0 %v2616_v56  ;;  %2695 = vmax.xlane.f32.xlu1 %v2694_v1 }
0x1584   :  { %v2769_v18 = vpop.f32.mrf.mxu2 }
0x1585   :  { %v2772_v7 = vsel %vm272_vm9, %v2769_v18, -inf }
0x1586   :  { %2375 = vadd.xlane.f32.xlu1 %v2374_v38  ;;  %2851 = vmax.xlane.f32.xlu0 %v2850_v17 }
0x158e   :  { %2531 = vadd.xlane.f32.xlu0 %v2530_v52 }
0x15a2   :  { %2392 = vrot.lane.b32.xlu0 %v4389_v62, %s4816_s22 }
0x15aa   :  { %2640 = vrot.lane.b32.xlu0 %v4467_v19, %s4822_s20  ;;  %s3162_s20 = sshll.u32 %s4786_s15, 4  ;;  %s3163_s20 = int_to_ptr.hbm [resolvable:$true] %s3162_s20 }
0x15b2   :  { %2718 = vrot.lane.b32.xlu0 %v4467_v19, %s4816_s22 }
0x15ba   :  { %2874 = vrot.lane.b32.xlu0 %v4467_v19, %s4815_s30 }
0x15e9   :  { %v2448_v34 = vpop.xlane.xlu1 %2447 }
0x15ea   :  { %v2449_v31 = vsub.f32 %v2443_v0, %v2448_v34 }
0x15ec   :  { %v2450_v28 = vmul.f32 1.442695, %v2449_v31 }
0x15f1   :  { %v2618_v57 = vpop.xlane.xlu0 %2617  ;;  %v2696_v51 = vpop.xlane.xlu1 %2695 }
0x15f2   :  { %v2619_v36 = vsub.f32 %v2613_v5, %v2618_v57  ;;  %v2697_v12 = vsub.f32 %v2691_v63, %v2696_v51 }
0x15f4   :  { %v2620_v30 = vmul.f32 1.442695, %v2619_v36  ;;  %v2698_v41 = vmul.f32 1.442695, %v2697_v12 }
0x15f6   :  { %3444 = vpow2.f32 %v2620_v30 }
0x15f7   :  { %3446 = vpow2.f32 %v2698_v41 }
0x15f9   :  { %v2376_v37 = vpop.xlane.xlu1 %2375  ;;  %v2852_v60 = vpop.xlane.xlu0 %2851 }
0x15fa   :  { %3448 = vrcp.f32 %v2376_v37  ;;  %v2853_v15 = vsub.f32 %v2847_v20, %v2852_v60  ;;  %v2388_v63 = vand.u32 2147483648, %v2376_v37  ;;  %vm2382_vm12 = vweird.f32 %v2376_v37 }
0x15fb   :  { %v2386_v10 = vand.u32 2147483647, %v2376_v37 }
0x15fc   :  { %v4588_v14 = vpop.eup %3444  ;;  %v2854_v9 = vmul.f32 1.442695, %v2853_v15  ;;  %v2389_v1 = vor.u32 1.1754944e-38, %v2388_v63 }
0x15fd   :  { %v4590_v22 = vpop.eup %3446  ;;  %v2622_v27 = vsel %vm272_vm9, %v4588_v14, 0.0  ;;  %vm2387_vm15 = vcmp.eq.f32.partialorder %v2386_v10, 8.507059e+37 }
0x15fe   :  { %2623 = vadd.xlane.f32.xlu1 %v2622_v27  ;;  %v2700_v47 = vsel %vm272_vm9, %v4590_v22, 0.0  ;;  %3450 = vpow2.f32 %v2854_v9 }
0x15ff   :  { %2701 = vadd.xlane.f32.xlu2 %v2700_v47  ;;  %3452 = vpow2.f32 %v2450_v28 }
0x1600   :  { %v3449_v16 = vpop.eup %3448 }
0x1601   :  { %v2378_v50 = vmul.f32 %v3449_v16, %v2376_v37  ;;  %vm2383_vm11 = vweird.f32 %v3449_v16  ;;  %v2532_v5 = vpop.xlane.xlu0 %2531 }
0x1602   :  { %vm2384_vm13 = vmor %vm2382_vm12, %vm2383_vm11  ;;  %3454 = vrcp.f32 %v2532_v5  ;;  %vm2538_vm1 = vweird.f32 %v2532_v5 }
0x1603   :  { %v2379_v53 = vsub.f32 1.0, %v2378_v50 }
0x1604   :  { %v4597_v3 = vpop.eup %3450 }
0x1605   :  { %v2380_v21 = vmul.f32 %v3449_v16, %v2379_v53  ;;  %v2856_v0 = vsel %vm272_vm9, %v4597_v3, 0.0  ;;  %v4601_v20 = vpop.eup %3452  ;;  %v2542_v53 = vand.u32 2147483647, %v2532_v5 }
0x1606   :  { %v2452_v52 = vsel %vm272_vm9, %v4601_v20, 0.0 }
0x1607   :  { %2773 = vmax.xlane.f32.xlu2 %v2772_v7  ;;  %v2381_v24 = vadd.f32 %v3449_v16, %v2380_v21  ;;  %vm2543_vm6 = vcmp.eq.f32.partialorder %v2542_v53, 8.507059e+37 }
0x1608   :  { %v3455_v57 = vpop.eup %3454 }
0x1609   :  { %v2385_v56 = vsel %vm2384_vm13, %v3449_v16, %v2381_v24  ;;  %vm2539_vm0 = vweird.f32 %v3455_v57 }
0x160a   :  { %v2390_v2 = vsel %vm2387_vm15, %v2389_v1, %v2385_v56  ;;  %vm2540_vm5 = vmor %vm2538_vm1, %vm2539_vm0 }
0x160b   :  { %v2391_v17 = vmul.f32 %v3441_v59, %v2390_v2  ;;  %v2534_v59 = vmul.f32 %v3455_v57, %v2532_v5 }
0x160d   :  { %v2535_v30 = vsub.f32 1.0, %v2534_v59 }
0x160f   :  { %2857 = vadd.xlane.f32.xlu2 %v2856_v0  ;;  %v2536_v15 = vmul.f32 %v3455_v57, %v2535_v30 }
0x1611   :  { %v2537_v16 = vadd.f32 %v3455_v57, %v2536_v15 }
0x1613   :  { %v2541_v7 = vsel %vm2540_vm5, %v3455_v57, %v2537_v16 }
0x1614   :  { %v2393_v38 = vpop.permute.xlu0 %2392 }
0x1615   :  { %2413 = vmatpush.msra.mxu0 %v2393_v38 }
0x1616   :  { %3270 = vmatmul.msk.f32.vlgmr.msra.gmra.mxu0 %vm272_vm9, %v2391_v17 }
0x1617   :  { %2453 = vadd.xlane.f32.xlu2 %v2452_v52 }
0x161c   :  { %v4610_v37 = vpop.permute.xlu0 %2640 }
0x1624   :  { %v2719_v21 = vpop.permute.xlu0 %2718 }
0x162c   :  { %v2875_v57 = vpop.permute.xlu0 %2874 }
0x162f   :  { %2548 = vrot.lane.b32.xlu2 %v4389_v62, %s4815_s30 }
0x1637   :  { %2796 = vrot.lane.b32.xlu2 %v4467_v19, %s4813_s28 }
0x1672   :  { %v2702_v34 = vpop.xlane.xlu2 %2701 }
0x1673   :  { %3456 = vrcp.f32 %v2702_v34  ;;  %v2714_v1 = vand.u32 2147483648, %v2702_v34  ;;  %vm2708_vm8 = vweird.f32 %v2702_v34  ;;  %v2712_v2 = vand.u32 2147483647, %v2702_v34 }
0x1675   :  { %vm2713_vm11 = vcmp.eq.f32.partialorder %v2712_v2, 8.507059e+37 }
0x1679   :  { %v3457_v41 = vpop.eup %3456 }
0x167a   :  { %v2774_v51 = vpop.xlane.xlu2 %2773  ;;  %v2704_v27 = vmul.f32 %v3457_v41, %v2702_v34  ;;  %vm2709_vm7 = vweird.f32 %v3457_v41 }
0x167b   :  { %v2775_v36 = vsub.f32 %v2769_v18, %v2774_v51  ;;  %v2544_v18 = vand.u32 2147483648, %v2532_v5  ;;  %vm2710_vm10 = vmor %vm2708_vm8, %vm2709_vm7  ;;  %v2715_v51 = vor.u32 1.1754944e-38, %v2714_v1 }
0x167c   :  { %v2705_v50 = vsub.f32 1.0, %v2704_v27 }
0x167d   :  { %v2776_v12 = vmul.f32 1.442695, %v2775_v36  ;;  %v2545_v63 = vor.u32 1.1754944e-38, %v2544_v18 }
0x167e   :  { %v2706_v28 = vmul.f32 %v3457_v41, %v2705_v50 }
0x167f   :  { %3458 = vpow2.f32 %v2776_v12  ;;  %v2546_v10 = vsel %vm2543_vm6, %v2545_v63, %v2541_v7 }
0x1680   :  { %v2707_v56 = vadd.f32 %v3457_v41, %v2706_v28  ;;  %v2547_v17 = vmul.f32 %v4576_v25, %v2546_v10 }
0x1682   :  { %v2858_v60 = vpop.xlane.xlu2 %2857  ;;  %v2711_v5 = vsel %vm2710_vm10, %v3457_v41, %v2707_v56 }
0x1683   :  { %3460 = vrcp.f32 %v2858_v60  ;;  %v2716_v36 = vsel %vm2713_vm11, %v2715_v51, %v2711_v5  ;;  %v2870_v12 = vand.u32 2147483648, %v2858_v60  ;;  %vm2864_vm13 = vweird.f32 %v2858_v60 }
0x1684   :  { %v2868_v34 = vand.u32 2147483647, %v2858_v60  ;;  %v2717_v30 = vmul.f32 %v4590_v22, %v2716_v36  ;;  %v2624_v22 = vpop.xlane.xlu1 %2623 }
0x1685   :  { %v4612_v47 = vpop.eup %3458  ;;  %v2871_v41 = vor.u32 1.1754944e-38, %v2870_v12  ;;  %vm2630_vm10 = vweird.f32 %v2624_v22 }
0x1686   :  { %v2778_v19 = vsel %vm272_vm9, %v4612_v47, 0.0  ;;  %vm2869_vm0 = vcmp.eq.f32.partialorder %v2868_v34, 8.507059e+37 }
0x1687   :  { %2779 = vadd.xlane.f32.xlu1 %v2778_v19 }
0x1689   :  { %v3461_v9 = vpop.eup %3460 }
0x168a   :  { %v4616_v31 = vpop.xlane.xlu2 %2453  ;;  %v2860_v24 = vmul.f32 %v3461_v9, %v2858_v60  ;;  %vm2865_vm12 = vweird.f32 %v3461_v9 }
0x168b   :  { %vm2866_vm15 = vmor %vm2864_vm13, %vm2865_vm12  ;;  %3462 = vrcp.f32 %v4616_v31  ;;  %v2466_v28 = vand.u32 2147483648, %v4616_v31  ;;  %vm2460_vm5 = vweird.f32 %v4616_v31 }
0x168c   :  { %v2861_v0 = vsub.f32 1.0, %v2860_v24  ;;  %3464 = vrcp.f32 %v2624_v22  ;;  %v2464_v24 = vand.u32 2147483647, %v4616_v31 }
0x168e   :  { %v2862_v52 = vmul.f32 %v3461_v9, %v2861_v0  ;;  %v2467_v0 = vor.u32 1.1754944e-38, %v2466_v28  ;;  %vm2465_vm7 = vcmp.eq.f32.partialorder %v2464_v24, 8.507059e+37 }
0x1690   :  { %v2863_v59 = vadd.f32 %v3461_v9, %v2862_v52  ;;  %v2634_v52 = vand.u32 2147483647, %v2624_v22 }
0x1691   :  { %v3463_v60 = vpop.eup %3462 }
0x1692   :  { %v2549_v38 = vpop.permute.xlu2 %2548  ;;  %v2867_v25 = vsel %vm2866_vm15, %v3461_v9, %v2863_v59  ;;  %v2456_v16 = vmul.f32 %v3463_v60, %v4616_v31  ;;  %v3465_v18 = vpop.eup %3464  ;;  %vm2461_vm1 = vweird.f32 %v3463_v60  ;;  %vm2635_vm12 = vcmp.eq.f32.partialorder %v2634_v52, 8.507059e+37 }
0x1693   :  { %2569 = vmatpush.msrb.mxu0 %v2549_v38  ;;  %v2872_v15 = vsel %vm2869_vm0, %v2871_v41, %v2867_v25  ;;  %v2415_v19 = vpop.f32.mrf.mxu0  ;;  %v2626_v53 = vmul.f32 %v3465_v18, %v2624_v22  ;;  %vm2462_vm6 = vmor %vm2460_vm5, %vm2461_vm1  ;;  %vm2631_vm8 = vweird.f32 %v3465_v18 }
0x1694   :  { %3276 = vmatmul.msk.f32.vlgmr.msrb.gmra.mxu0 %vm272_vm9, %v2547_v17  ;;  %v2873_v27 = vmul.f32 %v4597_v3, %v2872_v15  ;;  %v2457_v50 = vsub.f32 1.0, %v2456_v16  ;;  %v2636_v17 = vand.u32 2147483648, %v2624_v22  ;;  %vm2632_vm11 = vmor %vm2630_vm10, %vm2631_vm8  ;;  %vm3153_vm8 = vcmask 15360  }
0x1695   :  { %2739 = vmatpush.msra.mxu0 %v2719_v21  ;;  %v2627_v21 = vsub.f32 1.0, %v2626_v53 }
0x1696   :  { %v2637_v59 = vor.u32 1.1754944e-38, %v2636_v17  ;;  %v3509_v17 = vld [vmem:[%s4777_s6] ss:$0 sm:$0xff] }
0x1697   :  { %2895 = vmatpush.msrb.mxu0 %v2875_v57  ;;  %v2628_v63 = vmul.f32 %v3465_v18, %v2627_v21 }
0x1699   :  { %v2629_v2 = vadd.f32 %v3465_v18, %v2628_v63 }
0x169a   :  { %v2797_v12 = vpop.permute.xlu2 %2796 }
0x169b   :  { %v2633_v31 = vsel %vm2632_vm11, %v3465_v18, %v2629_v2 }
0x169c   :  { %3282 = vmatmul.msk.f32.vlgmr.msra.gmra.mxu0 %vm272_vm9, %v2717_v30  ;;  %v2638_v34 = vsel %vm2635_vm12, %v2637_v59, %v2633_v31 }
0x16a0   :  { %2470 = vrot.lane.b32.xlu1 %v4389_v62, %s4813_s28  ;;  %v2458_v62 = vmul.f32 %v3463_v60, %v2457_v50  ;;  %s3160_s28 = sshll.u32 %s3616_s11, 4  ;;  %s3161_s28 = int_to_ptr.vmem [resolvable:$true] %s3160_s28 }
0x16a2   :  { %v2459_v3 = vadd.f32 %v3463_v60, %v2458_v62 }
0x16a4   :  { %3288 = vmatmul.msk.f32.vlgmr.msrb.gmra.mxu0 %vm272_vm9, %v2873_v27  ;;  %v2463_v10 = vsel %vm2462_vm6, %v3463_v60, %v2459_v3  ;;  %v3506_v60 = vld [vmem:[%s4780_s9 + $0x10] sm:$0xff] }
0x16a5   :  { %v2468_v1 = vsel %vm2465_vm7, %v2467_v0, %v2463_v10 }
0x16a6   :  { %v2469_v51 = vmul.f32 %v4601_v20, %v2468_v1  ;;  %v2639_v20 = vmul.f32 %v4588_v14, %v2638_v34  ;;  %v3507_v14 = vld [vmem:[%s4780_s9 + $0x8] sm:$0xff]  ;;  %v2246_v34 = vmul.f32 %v4506_v54, %v4499_v39 }
0x16a8   :  { %2575 = vrot.lane.b32.xlu1 %v2415_v19, %s4817_s5 }
0x16fa   :  { %v2780_v9 = vpop.xlane.xlu1 %2779 }
0x16fb   :  { %3466 = vrcp.f32 %v2780_v9  ;;  %v2792_v25 = vand.u32 2147483648, %v2780_v9  ;;  %vm2786_vm15 = vweird.f32 %v2780_v9  ;;  %v2790_v15 = vand.u32 2147483647, %v2780_v9 }
0x16fd   :  { %v2793_v19 = vor.u32 1.1754944e-38, %v2792_v25  ;;  %vm2791_vm1 = vcmp.eq.f32.partialorder %v2790_v15, 8.507059e+37  ;;  %v1282_v25 = vadd.f32 %v4492_v40, %v4471_v45 }
0x1701   :  { %v3467_v7 = vpop.eup %3466 }
0x1702   :  { %v2782_v56 = vmul.f32 %v3467_v7, %v2780_v9  ;;  %vm2787_vm13 = vweird.f32 %v3467_v7  ;;  %v3508_v9 = vld [vmem:[%s4780_s9] sm:$0xff] }
0x1703   :  { %vm2788_vm0 = vmor %vm2786_vm15, %vm2787_vm13 }
0x1704   :  { %v2783_v38 = vsub.f32 1.0, %v2782_v56 }
0x1706   :  { %v2784_v36 = vmul.f32 %v3467_v7, %v2783_v38 }
0x1708   :  { %v2785_v30 = vadd.f32 %v3467_v7, %v2784_v36 }
0x170a   :  { %v2789_v27 = vsel %vm2788_vm0, %v3467_v7, %v2785_v30  ;;  %v2248_v30 = vadd.f32 %v2246_v34, %v4495_v32 }
0x170b   :  { %v2794_v22 = vsel %vm2791_vm1, %v2793_v19, %v2789_v27 }
0x170c   :  { %v2795_v50 = vmul.f32 %v4612_v47, %v2794_v22 }
0x1711   :  { %v2571_v5 = vpop.f32.mrf.mxu0 }
0x1712   :  { %v2471_v57 = vpop.permute.xlu1 %2470  ;;  %2583 = vrot.lane.b32.xlu0 %v2571_v5, %s3611_s27 }
0x1713   :  { %2491 = vmatpush.msra.mxu1 %v2471_v57 }
0x1714   :  { %3273 = vmatmul.msk.f32.vlgmr.msra.gmra.mxu1 %vm272_vm9, %v2469_v51 }
0x1715   :  { %2661 = vmatpush.msrb.mxu1 %v4610_v37  ;;  %v3505_v37 = vld [vmem:[%s4780_s9 + $0x18] sm:$0xff] }
0x1717   :  { %2817 = vmatpush.msra.mxu1 %v2797_v12  ;;  %v1155_v12 = vsub.f32 1.0, %v4153_v33 }
0x1719   :  { %v2741_v41 = vpop.f32.mrf.mxu0 }
0x171a   :  { %2901 = vrot.lane.b32.xlu1 %v2741_v41, %s4817_s5  ;;  %v2576_v21 = vpop.permute.xlu1 %2575  ;;  %v2250_v41 = vsub.f32 1.0, %v2248_v30 }
0x171b   :  { %v2586_v3 = vsel %vm272_vm9, %v4567_v55, %v2576_v21  ;;  %v3613_v55 = vmov 96  }
0x171c   :  { %3279 = vmatmul.msk.f32.vlgmr.msrb.gmra.mxu1 %vm272_vm9, %v2639_v20  ;;  %3318 = vset.pattern.permute.xlu2 %v3613_v55  ;;  %v2252_v15 = vmul.f32 %v2250_v41, %v4508_v44  ;;  %v2137_v20 = vsub.f32 1.0, %v1282_v25 }
0x171d   :  { %3012 = vmatpush.msrb.mxu1 %v3505_v37  ;;  %3319 = vset.pattern.permute.xlu0 %v3613_v55 }
0x171e   :  { %3320 = vset.pattern.permute.xlu1 %v3613_v55  ;;  %v4681_v27 = vadd.f32 %v2252_v15, %v4488_v11 }
0x171f   :  { %3013 = vmatpush.msrb.mxu1 %v3506_v60 }
0x1720   :  { %v2260_v19 = vmul.f32 %v4681_v27, %v4508_v44 }
0x1721   :  { %v2897_v16 = vpop.f32.mrf.mxu0  ;;  %3014 = vmatpush.msrb.mxu1 %v3507_v14 }
0x1722   :  { %2909 = vrot.lane.b32.xlu0 %v2897_v16, %s3611_s27  ;;  %v4685_v37 = vadd.f32 %v2260_v19, %v2246_v34 }
0x1723   :  { %3015 = vmatpush.msrb.mxu1 %v3508_v9 }
0x1724   :  { %3285 = vmatmul.msk.f32.vlgmr.msra.gmra.mxu1 %vm272_vm9, %v2795_v50 }
0x1784   :  { %v2584_v47 = vpop.permute.xlu0 %2583 }
0x178c   :  { %v2902_v63 = vpop.permute.xlu1 %2901 }
0x1791   :  { %v2493_v18 = vpop.f32.mrf.mxu1 }
0x1792   :  { %2579 = vrot.lane.b32.xlu2 %v2493_v18, %s3610_s26 }
0x1794   :  { %v2910_v0 = vpop.permute.xlu0 %2909 }
0x1799   :  { %v2663_v53 = vpop.f32.mrf.mxu1 }
0x179a   :  { %v2912_v10 = vsel %vm272_vm9, %v2663_v53, %v2902_v63 }
0x17a1   :  { %v2819_v62 = vpop.f32.mrf.mxu1 }
0x17a2   :  { %2905 = vrot.lane.b32.xlu2 %v2819_v62, %s3610_s26 }
0x17ec   :  { %v2580_v7 = vpop.permute.xlu2 %2579 }
0x17ed   :  { %v2587_v28 = vsel %vm594_vm3, %v2586_v3, %v2580_v7 }
0x17ee   :  { %v2588_v24 = vsel %vm596_vm4, %v2587_v28, %v2584_v47 }
0x17ef   :  { %3289 = vmatmul.msk.f32.vlgmr.msra.gmra.mxu2 %vm158_vm2, %v2588_v24 }
0x17fc   :  { %v2906_v56 = vpop.permute.xlu2 %2905 }
0x17fd   :  { %v2913_v1 = vsel %vm594_vm3, %v2912_v10, %v2906_v56 }
0x17fe   :  { %v2914_v2 = vsel %vm596_vm4, %v2913_v1, %v2910_v0 }
0x17ff   :  { %3290 = vmatmul.msk.f32.gmra.mxu2 %vm158_vm2, %v2914_v2 }
0x1872   :  { %v2938_v38 = vpop.f32.mrf.mxu2 }
0x1873   :  { %v2939_v5 = vadd.f32 %v3509_v17, %v2938_v38 }
0x1875   :  { %v2944_v52 = vadd.f32 %v2939_v5, %v4377_v23 }
0x1877   :  { %v2946_v57 = vsel %vm158_vm2, %v2944_v52, 0.0 }
0x1878   :  { %2947 = vadd.xlane.f32.xlu1 %v2946_v57  ;;  %v3510_v57 = vld [vmem:[%s4778_s7] ss:$0 sm:$0xff] }
0x1882   :  { %v2941_v51 = vpop.f32.mrf.mxu2 }
0x1883   :  { %v2942_v31 = vadd.f32 %v3509_v17, %v2941_v51 }
0x1885   :  { %v2945_v36 = vadd.f32 %v2942_v31, %v4459_v48 }
0x1887   :  { %v2949_v59 = vsel %vm158_vm2, %v2945_v36, 0.0 }
0x1888   :  { %2950 = vadd.xlane.f32.xlu2 %v2949_v59 }
0x18a0   :  { %1144 = vperm.xlu2 %3318, %v4081_v8  }
0x18a8   :  { %1163 = vperm.xlu2 %3318, %v1155_v12  }
0x18b0   :  { %2131 = vperm.xlu2 %3318, %v1282_v25  }
0x18b8   :  { %2145 = vperm.xlu2 %3318, %v2137_v20  }
0x18c0   :  { %3111 = vperm.xlu2 %3318, %v4685_v37  }
0x18eb   :  { %v2948_v32 = vpop.xlane.xlu1 %2947 }
0x18ec   :  { %v2952_v39 = vmul.f32 %v2948_v32, %v3910_v13 }
0x18ee   :  { %v2954_v45 = vsub.f32 %v2944_v52, %v2952_v39  ;;  %v3512_v39 = vld [vmem:[%s4781_s10] ss:$0 sm:$0xff]  ;;  %s3614_s10 = smov 32  }
0x18f0   :  { %v2956_v40 = vmul.f32 %v2954_v45, %v2954_v45 }
0x18f2   :  { %v2958_v54 = vsel %vm158_vm2, %v2956_v40, 0.0 }
0x18f3   :  { %2959 = vadd.xlane.f32.xlu0 %v2958_v54 }
0x18fb   :  { %v2951_v22 = vpop.xlane.xlu2 %2950 }
0x18fc   :  { %v2953_v11 = vmul.f32 %v2951_v22, %v3910_v13 }
0x18fe   :  { %v2955_v60 = vsub.f32 %v2945_v36, %v2953_v11 }
0x1900   :  { %v2957_v16 = vmul.f32 %v2955_v60, %v2955_v60 }
0x1902   :  { %v2961_v14 = vsel %vm158_vm2, %v2957_v16, 0.0 }
0x1903   :  { %2962 = vadd.xlane.f32.xlu1 %v2961_v14  ;;  %v4693_v44 = vpop.permute.xlu2 %1144 }
0x1907   :  { %1149 = vperm.xlu0 %3319, %v4153_v33  }
0x190b   :  { %v1164_v18 = vpop.permute.xlu2 %1163 }
0x190c   :  { %v1167_v56 = vmul.f32 0.0, %v1164_v18 }
0x1913   :  { %v2132_v3 = vpop.permute.xlu2 %2131 }
0x1914   :  { %v2135_v5 = vmul.f32 %v2132_v3, %v4459_v48 }
0x191b   :  { %v2146_v38 = vpop.permute.xlu2 %2145 }
0x1966   :  { %v2960_v50 = vpop.xlane.xlu0 %2959 }
0x1967   :  { %v2964_v9 = vmul.f32 %v2960_v50, %v3910_v13  ;;  %v3513_v50 = vld [vmem:[%s4783_s12] ss:$0 sm:$0xff]  ;;  %s3615_s12 = smov 33  }
0x1969   :  { %v2966_v53 = vadd.f32 1e-05, %v2964_v9 }
0x196b   :  { %3468 = vrsqrt.f32 %v2966_v53  ;;  %vm2974_vm3 = vweird.f32 %v2966_v53 }
0x1971   :  { %v3469_v62 = vpop.eup %3468 }
0x1972   :  { %v2969_v21 = vmul.f32 %v3469_v62, %v2966_v53  ;;  %vm2975_vm9 = vweird.f32 %v3469_v62 }
0x1973   :  { %vm2976_vm4 = vmor %vm2974_vm3, %vm2975_vm9 }
0x1974   :  { %v2970_v7 = vmul.f32 %v3469_v62, %v2969_v21 }
0x1976   :  { %v2971_v47 = vmul.f32 0.5, %v2970_v7  ;;  %v2963_v28 = vpop.xlane.xlu1 %2962 }
0x1977   :  { %v2965_v24 = vmul.f32 %v2963_v28, %v3910_v13 }
0x1978   :  { %v2972_v63 = vsub.f32 1.5, %v2971_v47 }
0x1979   :  { %v2967_v10 = vadd.f32 1e-05, %v2965_v24  ;;  %v1150_v33 = vpop.permute.xlu0 %1149 }
0x197a   :  { %v2973_v0 = vmul.f32 %v3469_v62, %v2972_v63  ;;  %v1153_v1 = vmul.f32 %v1150_v33, %v4129_v42  ;;  %v3511_v42 = vld [vmem:[%s4779_s8] ss:$0 sm:$0xff]  ;;  %v1154_v63 = vsub.f32 1.0, %v4081_v8 }
0x197b   :  { %3470 = vrsqrt.f32 %v2967_v10  ;;  %vm2984_vm6 = vweird.f32 %v2967_v10 }
0x197c   :  { %v2977_v2 = vsel %vm2976_vm4, %v3469_v62, %v2973_v0  ;;  %v1169_v55 = vadd.f32 %v1167_v56, %v1153_v1 }
0x197d   :  { %v2988_v17 = vmul.f32 %v2977_v2, %v2954_v45 }
0x197e   :  { %v2149_v52 = vmul.f32 %v2146_v38, %v1169_v55 }
0x197f   :  { %v2990_v51 = vmul.f32 %v3510_v57, %v2988_v17 }
0x1980   :  { %v4702_v31 = vadd.f32 %v2149_v52, %v2135_v5  ;;  %v1152_v5 = vmul.f32 %v4693_v44, %v4051_v43  ;;  %v3112_v43 = vpop.permute.xlu2 %3111 }
0x1981   :  { %v3471_v36 = vpop.eup %3470  ;;  %v2992_v59 = vadd.f32 %v3511_v42, %v2990_v51 }
0x1982   :  { %v2979_v12 = vmul.f32 %v3471_v36, %v2967_v10  ;;  %vm2985_vm5 = vweird.f32 %v3471_v36  ;;  %v1281_v10 = vadd.f32 %v4410_v49, %v4393_v46 }
0x1983   :  { %3291 = vmatmul.msk.f32.vlgmr.msrb.gmra.mxu1 %vm158_vm2, %v2992_v59  ;;  %vm2986_vm7 = vmor %vm2984_vm6, %vm2985_vm5 }
0x1984   :  { %v2980_v34 = vmul.f32 %v3471_v36, %v2979_v12 }
0x1986   :  { %v2981_v30 = vmul.f32 0.5, %v2980_v34 }
0x1988   :  { %v2982_v48 = vsub.f32 1.5, %v2981_v30 }
0x198a   :  { %v2983_v25 = vmul.f32 %v3471_v36, %v2982_v48 }
0x198c   :  { %v2987_v41 = vsel %vm2986_vm7, %v3471_v36, %v2983_v25 }
0x198d   :  { %v2989_v15 = vmul.f32 %v2987_v41, %v2955_v60  ;;  %v2245_v60 = vmul.f32 %v4427_v26, %v4418_v6 }
0x198f   :  { %v2991_v20 = vmul.f32 %v3510_v57, %v2989_v15  ;;  %v2247_v14 = vadd.f32 %v2245_v60, %v4413_v61 }
0x1991   :  { %v2993_v19 = vadd.f32 %v3511_v42, %v2991_v20  ;;  %v2249_v53 = vsub.f32 1.0, %v2247_v14 }
0x1993   :  { %3292 = vmatmul.msk.f32.gmra.mxu1 %vm158_vm2, %v2993_v19  ;;  %v2251_v21 = vmul.f32 %v2249_v53, %v4429_v58 }
0x1995   :  { %v2253_v3 = vadd.f32 %v2251_v21, %v4404_v29  ;;  %v2136_v29 = vsub.f32 1.0, %v1281_v10 }
0x1997   :  { %v2259_v6 = vmul.f32 %v2253_v3, %v4429_v58  ;;  %v3117_v58 = vsub.f32 1.0, %v4685_v37 }
0x1999   :  { %v2261_v61 = vadd.f32 %v2259_v6, %v2245_v60  ;;  %v3514_v60 = vld [vmem:[%s4784_s13] ss:$0 sm:$0xff] }
0x199b   :  { %v3116_v24 = vsub.f32 1.0, %v2261_v61 }
0x1a00   :  { %v3017_v32 = vpop.f32.mrf.mxu1 }
0x1a01   :  { %v3018_v45 = vadd.f32 %v3512_v39, %v3017_v32 }
0x1a03   :  { %v3023_v40 = vmax.f32 %v3018_v45, 0.0 }
0x1a05   :  { %3293 = vmatmul.msk.f32.vlgmr.msrb.gmra.mxu3 %vm1056_vm14, %v3023_v40 }
0x1a10   :  { %v3020_v54 = vpop.f32.mrf.mxu1 }
0x1a11   :  { %v3021_v22 = vadd.f32 %v3512_v39, %v3020_v54 }
0x1a13   :  { %v3024_v11 = vmax.f32 %v3021_v22, 0.0 }
0x1a15   :  { %3294 = vmatmul.msk.f32.gmra.mxu3 %vm1056_vm14, %v3024_v11  ;;  %vm3150_vm14 = vcmask 7168  }
0x1a88   :  { %v3048_v16 = vpop.f32.mrf.mxu3 }
0x1a89   :  { %v3049_v9 = vadd.f32 %v3513_v50, %v3048_v16 }
0x1a8b   :  { %v3054_v18 = vadd.f32 %v3049_v9, %v2992_v59 }
0x1a8d   :  { %v3056_v62 = vsel %vm158_vm2, %v3054_v18, 0.0 }
0x1a8e   :  { %3057 = vadd.xlane.f32.xlu0 %v3056_v62 }
0x1a98   :  { %v3051_v7 = vpop.f32.mrf.mxu3 }
0x1a99   :  { %v3052_v26 = vadd.f32 %v3513_v50, %v3051_v7  ;;  %v3515_v50 = vld [vmem:[%s4785_s14] ss:$0 sm:$0xff] }
0x1a9b   :  { %v3055_v47 = vadd.f32 %v3052_v26, %v2993_v19 }
0x1a9d   :  { %v3059_v28 = vsel %vm158_vm2, %v3055_v47, 0.0 }
0x1a9e   :  { %3060 = vadd.xlane.f32.xlu1 %v3059_v28 }
0x1aa2   :  { %3120 = vperm.xlu0 %3319, %v3116_v24  }
0x1aaa   :  { %3136 = vrot.lane.b32.xlu0 %v2253_v3, %s3614_s10 }
0x1ab7   :  { %1158 = vperm.xlu1 %3320, %v1154_v63  }
0x1abf   :  { %2126 = vperm.xlu1 %3320, %v1281_v10  }
0x1ac7   :  { %2140 = vperm.xlu1 %3320, %v2136_v29  }
0x1acf   :  { %3106 = vperm.xlu1 %3320, %v2261_v61  }
0x1ad7   :  { %3125 = vperm.xlu1 %3320, %v3117_v58  }
0x1adf   :  { %3144 = vrot.lane.b32.xlu1 %v4434_v35, %s3615_s12 }
0x1b01   :  { %v3058_v33 = vpop.xlane.xlu0 %3057 }
0x1b02   :  { %v3062_v56 = vmul.f32 %v3058_v33, %v3910_v13 }
0x1b04   :  { %v3064_v0 = vsub.f32 %v3054_v18, %v3062_v56 }
0x1b06   :  { %v3066_v1 = vmul.f32 %v3064_v0, %v3064_v0 }
0x1b08   :  { %v3068_v8 = vsel %vm158_vm2, %v3066_v1, 0.0 }
0x1b09   :  { %3069 = vadd.xlane.f32.xlu2 %v3068_v8 }
0x1b11   :  { %v3061_v2 = vpop.xlane.xlu1 %3060 }
0x1b12   :  { %v3063_v46 = vmul.f32 %v3061_v2, %v3910_v13 }
0x1b14   :  { %v4733_v49 = vsub.f32 %v3055_v47, %v3063_v46  ;;  %v3121_v59 = vpop.permute.xlu0 %3120 }
0x1b16   :  { %v3067_v37 = vmul.f32 %v4733_v49, %v4733_v49 }
0x1b18   :  { %v3071_v55 = vsel %vm158_vm2, %v3067_v37, 0.0 }
0x1b19   :  { %3072 = vadd.xlane.f32.xlu0 %v3071_v55 }
0x1b21   :  { %3138 = vrot.lane.b32.xlu2 %v4681_v27, %s3614_s10 }
0x1b29   :  { %v1159_v35 = vpop.permute.xlu1 %1158 }
0x1b2a   :  { %v1166_v17 = vmul.f32 0.0, %v1159_v35 }
0x1b2c   :  { %v1168_v52 = vadd.f32 %v1166_v17, %v1152_v5 }
0x1b2d   :  { %3146 = vrot.lane.b32.xlu0 %v4513_v4, %s3615_s12  ;;  %v3137_v4 = vpop.permute.xlu0 %3136 }
0x1b31   :  { %v2127_v38 = vpop.permute.xlu1 %2126 }
0x1b32   :  { %v2134_v51 = vmul.f32 %v2127_v38, %v4377_v23 }
0x1b39   :  { %v2141_v57 = vpop.permute.xlu1 %2140 }
0x1b3a   :  { %v2148_v36 = vmul.f32 %v2141_v57, %v1168_v52 }
0x1b3c   :  { %v2150_v42 = vadd.f32 %v2148_v36, %v2134_v51 }
0x1b3e   :  { %v3128_v12 = vmul.f32 %v3121_v59, %v2150_v42 }
0x1b41   :  { %v3107_v34 = vpop.permute.xlu1 %3106 }
0x1b49   :  { %v3126_v30 = vpop.permute.xlu1 %3125 }
0x1b4a   :  { %v3129_v27 = vmul.f32 %v3126_v30, %v4702_v31 }
0x1b51   :  { %v3145_v48 = vpop.permute.xlu1 %3144 }
0x1b52   :  { %v3151_v25 = vsel %vm3150_vm14, %v3137_v4, %v3145_v48 }
0x1b53   :  { %3154 = vst.msk [vmem:[%s4787_s16] sm:$0xff] %vm3153_vm8, %v3151_v25 }
0x1b7c   :  { %v3070_v23 = vpop.xlane.xlu2 %3069 }
0x1b7d   :  { %v3074_v44 = vmul.f32 %v3070_v23, %v3910_v13 }
0x1b7f   :  { %v3076_v41 = vadd.f32 1e-05, %v3074_v44 }
0x1b81   :  { %3472 = vrsqrt.f32 %v3076_v41  ;;  %vm3084_vm11 = vweird.f32 %v3076_v41 }
0x1b84   :  { %v3139_v7 = vpop.permute.xlu2 %3138 }
0x1b87   :  { %v3473_v15 = vpop.eup %3472 }
0x1b88   :  { %v3079_v20 = vmul.f32 %v3473_v15, %v3076_v41  ;;  %vm3085_vm10 = vweird.f32 %v3473_v15 }
0x1b89   :  { %vm3086_vm12 = vmor %vm3084_vm11, %vm3085_vm10 }
0x1b8a   :  { %v3080_v31 = vmul.f32 %v3473_v15, %v3079_v20 }
0x1b8c   :  { %v3081_v19 = vmul.f32 0.5, %v3080_v31  ;;  %v3073_v32 = vpop.xlane.xlu0 %3072 }
0x1b8d   :  { %v3075_v39 = vmul.f32 %v3073_v32, %v3910_v13 }
0x1b8e   :  { %v3082_v45 = vsub.f32 1.5, %v3081_v19 }
0x1b8f   :  { %v3077_v40 = vadd.f32 1e-05, %v3075_v39 }
0x1b90   :  { %v3083_v54 = vmul.f32 %v3473_v15, %v3082_v45 }
0x1b91   :  { %3474 = vrsqrt.f32 %v3077_v40  ;;  %vm3094_vm15 = vweird.f32 %v3077_v40 }
0x1b92   :  { %v3087_v22 = vsel %vm3086_vm12, %v3473_v15, %v3083_v54 }
0x1b93   :  { %v3098_v11 = vmul.f32 %v3087_v22, %v3064_v0 }
0x1b95   :  { %v3100_v16 = vmul.f32 %v3514_v60, %v3098_v11 }
0x1b97   :  { %v3475_v14 = vpop.eup %3474  ;;  %v3102_v13 = vadd.f32 %v3515_v50, %v3100_v16 }
0x1b98   :  { %v3089_v9 = vmul.f32 %v3475_v14, %v3077_v40  ;;  %vm3095_vm13 = vweird.f32 %v3475_v14 }
0x1b99   :  { %v3114_v18 = vmul.f32 %v3107_v34, %v3102_v13  ;;  %vm3096_vm0 = vmor %vm3094_vm15, %vm3095_vm13 }
0x1b9a   :  { %v3090_v53 = vmul.f32 %v3475_v14, %v3089_v9 }
0x1b9b   :  { %v3130_v62 = vadd.f32 %v3128_v12, %v3114_v18 }
0x1b9c   :  { %v3091_v21 = vmul.f32 0.5, %v3090_v53 }
0x1b9d   :  { %3132 = vst.msk [vmem:[#allocation7] sm:$0xff] %vm158_vm2, %v3130_v62 }
0x1b9e   :  { %v3092_v3 = vsub.f32 1.5, %v3091_v21 }
0x1b9f   :  { %v3147_v6 = vpop.permute.xlu0 %3146 }
0x1ba0   :  { %v3093_v26 = vmul.f32 %v3475_v14, %v3092_v3  ;;  %v3152_v47 = vsel %vm3150_vm14, %v3139_v7, %v3147_v6 }
0x1ba1   :  { %3155 = vst.msk [vmem:[%s4787_s16 + $0x8] sm:$0xff] %vm3153_vm8, %v3152_v47 }
0x1ba2   :  { %v3097_v61 = vsel %vm3096_vm0, %v3475_v14, %v3093_v26 }
0x1ba3   :  { %v3099_v28 = vmul.f32 %v3097_v61, %v4733_v49 }
0x1ba5   :  { %v3101_v24 = vmul.f32 %v3514_v60, %v3099_v28 }
0x1ba7   :  { %v3103_v63 = vadd.f32 %v3515_v50, %v3101_v24 }
0x1ba9   :  { %v3115_v10 = vmul.f32 %v3112_v43, %v3103_v63 }
0x1bab   :  { %v3131_v29 = vadd.f32 %v3129_v27, %v3115_v10 }
0x1bad   :  { %3133 = vst.msk [vmem:[#allocation7 + $0x8] sm:$0xff] %vm158_vm2, %v3131_v29 }
0x1bae   :  { %3168 = dma.vmem_to_hbm [thread:$0]  %s3161_s28, 256, %s3163_s20, [#allocation4], %s4824_s19, %s4824_s19, %s4817_s5  }
0x1baf   :  { %3592 = dma.done.wait [#allocation4], 256  }
0x1bb0   :  { %3593 = vsyncadd [#allocation4], 4294967040 }
0x1bb1   :  { %3177 = vsyncpa [#allocation3], 1 }
0x1bb2   :  { %3178 = vsyncpa [#allocation6], 1 }
0x1bb3   :  { %3179 = vsyncpa [#allocation4], 1 }

</bundles_post_ra>
